<compile_context>
chip_gen: v7x
topology: tpu7x:2x2x1
jax: 0.10.0
libtpu: 0.0.40
codegen_flags: <defaults>
</compile_context>

<pallas_src>
import jax
import jax.numpy as jnp
from jax.experimental import pallas as pl
from jax.experimental.pallas import tpu as pltpu

# ---------------- model dims (small, deterministic) ----------------
B = 2          # batch
T = 8          # sequence length
D_IN = 16      # input_dim
H = 32         # hidden_dim
MID = 16       # mid_dim
OUT = 1        # output_dim
NUM_LAYERS = 3
GH = 4 * H     # gate width (i,f,o,g after permutation) == 128 lanes


# ---------------- Pallas kernel ----------------
def lstm_attn_kernel(x_ref,            # (T*B, D_IN) time-major, flattened
                     wih0_ref,         # (D_IN, 4H)   gate cols permuted [i,f,o,g]
                     whh0_ref,         # (H, 4H)
                     b0_ref,           # (1, 4H)      b_ih + b_hh, layer 0
                     wih1_ref,         # (H, 4H)      layer 1
                     whh1_ref,         # (H, 4H)
                     b1_ref,           # (1, 4H)
                     wih2_ref,         # (H, 4H)      layer 2
                     whh2_ref,         # (H, 4H)
                     b2_ref,           # (1, 4H)
                     wattn_ref,        # (1, H)
                     battn_ref,        # (1, 1)       SMEM scalar
                     wfc1_ref,         # (H, MID)
                     bfc1_ref,         # (1, MID)
                     wfc2_ref,         # (MID, OUT)
                     bfc2_ref,         # (1, OUT)
                     out_ref):         # (B, OUT)
    # ---- hoist weight/bias loads: read once, reuse every timestep ----
    whh0 = whh0_ref[...]
    wih1 = wih1_ref[...]
    whh1 = whh1_ref[...]
    b1 = b1_ref[...]
    wih2 = wih2_ref[...]
    whh2 = whh2_ref[...]
    b2 = b2_ref[...]
    wa = wattn_ref[...]                 # (1, H)
    b_attn = battn_ref[0, 0]            # SMEM scalar

    # ---- layer-0 input projection for the whole sequence in one matmul ----
    # (T*B, D_IN) @ (D_IN, 4H) + bias; off the serial recurrent chain.
    pre0 = (jnp.dot(x_ref[...], wih0_ref[...],
                    preferred_element_type=jnp.float32) + b0_ref[...])   # (T*B, 4H)

    def gate_act(gates, c_prev):
        # Gate columns permuted to [i, f, o, g].  Apply the transcendentals to
        # the FULL 4H-lane vreg (EUP processes whole vregs anyway) and slice
        # i/f/o/g afterwards so no masked lane-select sits before the EUP push.
        sig = jax.nn.sigmoid(gates)
        tnh = jnp.tanh(gates)
        i = sig[:, 0 * H:1 * H]
        f = sig[:, 1 * H:2 * H]
        o = sig[:, 2 * H:3 * H]
        g = tnh[:, 3 * H:4 * H]
        c_new = f * c_prev + i * g
        h_new = o * jnp.tanh(c_new)
        return h_new, c_new

    zeros = jnp.zeros((B, H), jnp.float32)
    h0 = c0 = h1 = c1 = h2 = c2 = zeros

    h2_list = []
    score_list = []

    # Fully-unrolled time loop: recurrent state stays in vregs, indices are
    # static, and the LLO scheduler sees the whole chain.
    for t in range(T):
        # Recurrent partials only depend on t-1 state: issue them at the top of
        # the step so the MXU work (and bias adds) overlap with the EUP latency
        # of the cells computed below (MXU pushes were idle anyway).
        rec0 = jnp.dot(h0, whh0, preferred_element_type=jnp.float32)
        rec1 = jnp.dot(h1, whh1, preferred_element_type=jnp.float32) + b1
        rec2 = jnp.dot(h2, whh2, preferred_element_type=jnp.float32) + b2

        # layer 0: input part precomputed, only the recurrent partial remains
        gates0 = pre0[t * B:(t + 1) * B, :] + rec0
        h0, c0 = gate_act(gates0, c0)

        # layer 1: only the fresh-h0 matmul is on the chain
        gates1 = jnp.dot(h0, wih1, preferred_element_type=jnp.float32) + rec1
        h1, c1 = gate_act(gates1, c1)

        # layer 2: only the fresh-h1 matmul is on the chain
        gates2 = jnp.dot(h1, wih2, preferred_element_type=jnp.float32) + rec2
        h2, c2 = gate_act(gates2, c2)

        # Keep h2 register-resident and fold the attention score under the
        # recurrence (side consumer, off the serial dependency chain).
        h2_list.append(h2)
        score_list.append(jnp.sum(h2 * wa, axis=-1, keepdims=True) + b_attn)  # (B,1)

    # ---- attention over time (softmax along T == PyTorch dim=1) ----
    scores = jnp.concatenate(score_list, axis=-1)            # (B, T)
    m = jnp.max(scores, axis=-1, keepdims=True)
    e = jnp.exp(scores - m)
    attn = e / jnp.sum(e, axis=-1, keepdims=True)            # (B, T)

    context = jnp.zeros((B, H), jnp.float32)
    for t in range(T):
        context = context + attn[:, t:t + 1] * h2_list[t]    # (B, H)

    # ---- head: fc_1 -> relu -> fc_2 -> scaled sigmoid ----
    hmid = jnp.maximum(
        jnp.dot(context, wfc1_ref[...], preferred_element_type=jnp.float32)
        + bfc1_ref[...], 0.0)
    logit = (jnp.dot(hmid, wfc2_ref[...], preferred_element_type=jnp.float32)
             + bfc2_ref[...])
    out_ref[...] = jax.nn.sigmoid(logit) * (0.16 - 0.08) + 0.08


# ---------------- wrapper ----------------
def _permute_gates(w):
    """Reorder last axis from PyTorch LSTM gate order [i,f,g,o] to [i,f,o,g]."""
    i, f, g, o = jnp.split(w, 4, axis=-1)
    return jnp.concatenate([i, f, o, g], axis=-1)


def multilayer_lstm_attention(x, p):
    """x: (B, T, D_IN) float32, p: dict of PyTorch-shaped params."""
    # time-major + flattened so the layer-0 projection is one (T*B, D_IN) matmul
    x2d = jnp.transpose(x, (1, 0, 2)).reshape(T * B, D_IN)

    # Pre-transpose weights (act @ W^T -> (M,K)@(K,N)), permute gate columns to
    # [i,f,o,g], and fold b_ih+b_hh.  Layers are kept UN-fused so the kernel can
    # overlap the h_prev @ W_hh partial with the layer below.
    wih_t = [_permute_gates(jnp.transpose(p["w_ih"][l])) for l in range(NUM_LAYERS)]
    whh_t = [_permute_gates(jnp.transpose(p["w_hh"][l])) for l in range(NUM_LAYERS)]
    b = [_permute_gates((p["b_ih"][l] + p["b_hh"][l]).reshape(1, GH))
         for l in range(NUM_LAYERS)]

    w_attn = p["w_attn"]                                     # (1, H)
    b_attn = p["b_attn"].reshape(1, 1)                       # scalar -> SMEM
    w1_t = jnp.transpose(p["w_fc1"])                         # (H, MID)
    bfc1 = p["b_fc1"].reshape(1, MID)
    w2_t = jnp.transpose(p["w_fc2"])                         # (MID, OUT)
    bfc2 = p["b_fc2"].reshape(1, OUT)

    vmem = pl.BlockSpec(memory_space=pltpu.MemorySpace.VMEM)
    smem = pl.BlockSpec(memory_space=pltpu.MemorySpace.SMEM)

    return pl.pallas_call(
        lstm_attn_kernel,
        out_shape=jax.ShapeDtypeStruct((B, OUT), jnp.float32),
        in_specs=[vmem,                       # x2d
                  vmem, vmem, vmem,           # layer 0: wih0, whh0, b0
                  vmem, vmem, vmem,           # layer 1: wih1, whh1, b1
                  vmem, vmem, vmem,           # layer 2: wih2, whh2, b2
                  vmem, smem,                 # attention: w_attn, b_attn(SMEM)
                  vmem, vmem, vmem, vmem],    # head: wfc1, bfc1, wfc2, bfc2
        out_specs=vmem,
    )(x2d,
      wih_t[0], whh_t[0], b[0],
      wih_t[1], whh_t[1], b[1],
      wih_t[2], whh_t[2], b[2],
      w_attn, b_attn,
      w1_t, bfc1, w2_t, bfc2)


# ---------------- pure-JAX reference (mirrors the PyTorch forward) ----------------
def reference_forward(x, p):
    h = [jnp.zeros((B, H), jnp.float32) for _ in range(NUM_LAYERS)]
    c = [jnp.zeros((B, H), jnp.float32) for _ in range(NUM_LAYERS)]
    outs = []
    for t in range(T):
        inp = x[:, t, :]
        for l in range(NUM_LAYERS):
            gates = (inp @ p["w_ih"][l].T + p["b_ih"][l]
                     + h[l] @ p["w_hh"][l].T + p["b_hh"][l])
            i = jax.nn.sigmoid(gates[:, 0 * H:1 * H])
            f = jax.nn.sigmoid(gates[:, 1 * H:2 * H])
            g = jnp.tanh(gates[:, 2 * H:3 * H])
            o = jax.nn.sigmoid(gates[:, 3 * H:4 * H])
            c[l] = f * c[l] + i * g
            h[l] = o * jnp.tanh(c[l])
            inp = h[l]
        outs.append(h[-1])
    out = jnp.stack(outs, axis=1)                              # (B, T, H)
    scores = out @ p["w_attn"].T + p["b_attn"]                 # (B, T, 1)
    attn = jax.nn.softmax(scores, axis=1)
    context = jnp.sum(attn * out, axis=1)                      # (B, H)
    h1 = jnp.maximum(context @ p["w_fc1"].T + p["b_fc1"], 0.0)
    o2 = h1 @ p["w_fc2"].T + p["b_fc2"]
    return jax.nn.sigmoid(o2) * (0.16 - 0.08) + 0.08


# ---------------- deterministic parameter init ----------------
def init_params(key):
    scale = 1.0 / jnp.sqrt(jnp.float32(H))
    keys = jax.random.split(key, 32)
    kit = iter(keys)

    def u(k, shape):
        return jax.random.uniform(k, shape, jnp.float32, -scale, scale)

    p = {"w_ih": [], "w_hh": [], "b_ih": [], "b_hh": []}
    in_dims = [D_IN, H, H]
    for l in range(NUM_LAYERS):
        p["w_ih"].append(u(next(kit), (4 * H, in_dims[l])))
        p["w_hh"].append(u(next(kit), (4 * H, H)))
        p["b_ih"].append(u(next(kit), (4 * H,)))
        p["b_hh"].append(u(next(kit), (4 * H,)))
    p["w_attn"] = u(next(kit), (1, H))
    p["b_attn"] = u(next(kit), (1,))
    p["w_fc1"] = u(next(kit), (MID, H))
    p["b_fc1"] = u(next(kit), (MID,))
    p["w_fc2"] = u(next(kit), (OUT, MID))
    p["b_fc2"] = u(next(kit), (OUT,))
    return p


if __name__ == "__main__":
    key = jax.random.PRNGKey(0)
    k_x, k_p = jax.random.split(key)
    x = jax.random.normal(k_x, (B, T, D_IN), jnp.float32)
    params = init_params(k_p)

    out = multilayer_lstm_attention(x, params)
    out = jax.block_until_ready(out)

    ref = reference_forward(x, params)
    assert out.shape == (B, OUT), out.shape
    assert jnp.allclose(out, ref, atol=1e-5, rtol=1e-5), (out, ref)
    print("KERNEL_OK")
</pallas_src>

<mosaic_0001>
module attributes {stable_mosaic.version = 11 : i64} {
  func.func @lstm_attn_kernel(%arg0: memref<16x16xf32, #tpu.memory_space<vmem>>, %arg1: memref<16x128xf32, #tpu.memory_space<vmem>>, %arg2: memref<32x128xf32, #tpu.memory_space<vmem>>, %arg3: memref<1x128xf32, #tpu.memory_space<vmem>>, %arg4: memref<32x128xf32, #tpu.memory_space<vmem>>, %arg5: memref<32x128xf32, #tpu.memory_space<vmem>>, %arg6: memref<1x128xf32, #tpu.memory_space<vmem>>, %arg7: memref<32x128xf32, #tpu.memory_space<vmem>>, %arg8: memref<32x128xf32, #tpu.memory_space<vmem>>, %arg9: memref<1x128xf32, #tpu.memory_space<vmem>>, %arg10: memref<1x32xf32, #tpu.memory_space<vmem>>, %arg11: memref<1x1xf32, #tpu.memory_space<smem>>, %arg12: memref<32x16xf32, #tpu.memory_space<vmem>>, %arg13: memref<1x16xf32, #tpu.memory_space<vmem>>, %arg14: memref<16x1xf32, #tpu.memory_space<vmem>>, %arg15: memref<1x1xf32, #tpu.memory_space<vmem>>, %arg16: memref<2x1xf32, #tpu.memory_space<vmem>>) attributes {dimension_semantics = [], scalar_prefetch = 0 : i64, scratch_operands = 0 : i64, tpu.core_type = #tpu.core_type<tc>} {
    %c0 = arith.constant 0 : index
    %c0_0 = arith.constant 0 : index
    %0 = vector.load %arg2[%c0, %c0_0] : memref<32x128xf32, #tpu.memory_space<vmem>>, vector<32x128xf32>
    %c0_1 = arith.constant 0 : index
    %c0_2 = arith.constant 0 : index
    %1 = vector.load %arg4[%c0_1, %c0_2] : memref<32x128xf32, #tpu.memory_space<vmem>>, vector<32x128xf32>
    %c0_3 = arith.constant 0 : index
    %c0_4 = arith.constant 0 : index
    %2 = vector.load %arg5[%c0_3, %c0_4] : memref<32x128xf32, #tpu.memory_space<vmem>>, vector<32x128xf32>
    %c0_5 = arith.constant 0 : index
    %c0_6 = arith.constant 0 : index
    %3 = vector.load %arg6[%c0_5, %c0_6] : memref<1x128xf32, #tpu.memory_space<vmem>>, vector<1x128xf32>
    %c0_7 = arith.constant 0 : index
    %c0_8 = arith.constant 0 : index
    %4 = vector.load %arg7[%c0_7, %c0_8] : memref<32x128xf32, #tpu.memory_space<vmem>>, vector<32x128xf32>
    %c0_9 = arith.constant 0 : index
    %c0_10 = arith.constant 0 : index
    %5 = vector.load %arg8[%c0_9, %c0_10] : memref<32x128xf32, #tpu.memory_space<vmem>>, vector<32x128xf32>
    %c0_11 = arith.constant 0 : index
    %c0_12 = arith.constant 0 : index
    %6 = vector.load %arg9[%c0_11, %c0_12] : memref<1x128xf32, #tpu.memory_space<vmem>>, vector<1x128xf32>
    %c0_13 = arith.constant 0 : index
    %c0_14 = arith.constant 0 : index
    %7 = vector.load %arg10[%c0_13, %c0_14] : memref<1x32xf32, #tpu.memory_space<vmem>>, vector<1x32xf32>
    %c0_15 = arith.constant 0 : index
    %c0_16 = arith.constant 0 : index
    %8 = memref.load %arg11[%c0_15, %c0_16] : memref<1x1xf32, #tpu.memory_space<smem>>
    %c0_17 = arith.constant 0 : index
    %c0_18 = arith.constant 0 : index
    %9 = vector.load %arg0[%c0_17, %c0_18] : memref<16x16xf32, #tpu.memory_space<vmem>>, vector<16x16xf32>
    %c0_19 = arith.constant 0 : index
    %c0_20 = arith.constant 0 : index
    %10 = vector.load %arg1[%c0_19, %c0_20] : memref<16x128xf32, #tpu.memory_space<vmem>>, vector<16x128xf32>
    %cst = arith.constant dense<0.000000e+00> : vector<16x128xf32>
    %11 = tpu.matmul %9, %10, %cst {dimension_numbers = #tpu.dot_dimension_numbers<[1], [0], [0], [1], [0, 0, 1, 1], [], []>} : vector<16x16xf32>, vector<16x128xf32>, vector<16x128xf32> -> vector<16x128xf32>
    %c0_21 = arith.constant 0 : index
    %c0_22 = arith.constant 0 : index
    %12 = vector.load %arg3[%c0_21, %c0_22] : memref<1x128xf32, #tpu.memory_space<vmem>>, vector<1x128xf32>
    %13 = vector.broadcast %12 : vector<1x128xf32> to vector<16x128xf32>
    %14 = arith.addf %11, %13 : vector<16x128xf32>
    %cst_23 = arith.constant 0.000000e+00 : f32
    %15 = vector.broadcast %cst_23 : f32 to vector<2x32xf32>
    %cst_24 = arith.constant dense<0.000000e+00> : vector<2x128xf32>
    %16 = tpu.matmul %15, %0, %cst_24 {dimension_numbers = #tpu.dot_dimension_numbers<[1], [0], [0], [1], [0, 0, 1, 1], [], []>} : vector<2x32xf32>, vector<32x128xf32>, vector<2x128xf32> -> vector<2x128xf32>
    %cst_25 = arith.constant dense<0.000000e+00> : vector<2x128xf32>
    %17 = tpu.matmul %15, %2, %cst_25 {dimension_numbers = #tpu.dot_dimension_numbers<[1], [0], [0], [1], [0, 0, 1, 1], [], []>} : vector<2x32xf32>, vector<32x128xf32>, vector<2x128xf32> -> vector<2x128xf32>
    %18 = vector.broadcast %3 : vector<1x128xf32> to vector<2x128xf32>
    %19 = arith.addf %17, %18 : vector<2x128xf32>
    %cst_26 = arith.constant dense<0.000000e+00> : vector<2x128xf32>
    %20 = tpu.matmul %15, %5, %cst_26 {dimension_numbers = #tpu.dot_dimension_numbers<[1], [0], [0], [1], [0, 0, 1, 1], [], []>} : vector<2x32xf32>, vector<32x128xf32>, vector<2x128xf32> -> vector<2x128xf32>
    %21 = vector.broadcast %6 : vector<1x128xf32> to vector<2x128xf32>
    %22 = arith.addf %20, %21 : vector<2x128xf32>
    %23 = vector.extract_strided_slice %14 {offsets = [0, 0], sizes = [2, 128], strides = [1, 1]} : vector<16x128xf32> to vector<2x128xf32>
    %24 = arith.addf %23, %16 : vector<2x128xf32>
    %25 = arith.negf %24 : vector<2x128xf32>
    %26 = math.exp %25 : vector<2x128xf32>
    %cst_27 = arith.constant 1.000000e+00 : f32
    %27 = vector.broadcast %cst_27 : f32 to vector<2x128xf32>
    %28 = arith.addf %27, %26 : vector<2x128xf32>
    %29 = arith.divf %27, %28 : vector<2x128xf32>
    %30 = math.tanh %24 : vector<2x128xf32>
    %31 = vector.extract_strided_slice %29 {offsets = [0, 0], sizes = [2, 32], strides = [1, 1]} : vector<2x128xf32> to vector<2x32xf32>
    %32 = vector.extract_strided_slice %29 {offsets = [0, 32], sizes = [2, 32], strides = [1, 1]} : vector<2x128xf32> to vector<2x32xf32>
    %33 = vector.extract_strided_slice %29 {offsets = [0, 64], sizes = [2, 32], strides = [1, 1]} : vector<2x128xf32> to vector<2x32xf32>
    %34 = vector.extract_strided_slice %30 {offsets = [0, 96], sizes = [2, 32], strides = [1, 1]} : vector<2x128xf32> to vector<2x32xf32>
    %35 = arith.mulf %32, %15 : vector<2x32xf32>
    %36 = arith.mulf %31, %34 : vector<2x32xf32>
    %37 = arith.addf %35, %36 : vector<2x32xf32>
    %38 = math.tanh %37 : vector<2x32xf32>
    %39 = arith.mulf %33, %38 : vector<2x32xf32>
    %cst_28 = arith.constant dense<0.000000e+00> : vector<2x128xf32>
    %40 = tpu.matmul %39, %1, %cst_28 {dimension_numbers = #tpu.dot_dimension_numbers<[1], [0], [0], [1], [0, 0, 1, 1], [], []>} : vector<2x32xf32>, vector<32x128xf32>, vector<2x128xf32> -> vector<2x128xf32>
    %41 = arith.addf %40, %19 : vector<2x128xf32>
    %42 = arith.negf %41 : vector<2x128xf32>
    %43 = math.exp %42 : vector<2x128xf32>
    %cst_29 = arith.constant 1.000000e+00 : f32
    %44 = vector.broadcast %cst_29 : f32 to vector<2x128xf32>
    %45 = arith.addf %44, %43 : vector<2x128xf32>
    %46 = arith.divf %44, %45 : vector<2x128xf32>
    %47 = math.tanh %41 : vector<2x128xf32>
    %48 = vector.extract_strided_slice %46 {offsets = [0, 0], sizes = [2, 32], strides = [1, 1]} : vector<2x128xf32> to vector<2x32xf32>
    %49 = vector.extract_strided_slice %46 {offsets = [0, 32], sizes = [2, 32], strides = [1, 1]} : vector<2x128xf32> to vector<2x32xf32>
    %50 = vector.extract_strided_slice %46 {offsets = [0, 64], sizes = [2, 32], strides = [1, 1]} : vector<2x128xf32> to vector<2x32xf32>
    %51 = vector.extract_strided_slice %47 {offsets = [0, 96], sizes = [2, 32], strides = [1, 1]} : vector<2x128xf32> to vector<2x32xf32>
    %52 = arith.mulf %49, %15 : vector<2x32xf32>
    %53 = arith.mulf %48, %51 : vector<2x32xf32>
    %54 = arith.addf %52, %53 : vector<2x32xf32>
    %55 = math.tanh %54 : vector<2x32xf32>
    %56 = arith.mulf %50, %55 : vector<2x32xf32>
    %cst_30 = arith.constant dense<0.000000e+00> : vector<2x128xf32>
    %57 = tpu.matmul %56, %4, %cst_30 {dimension_numbers = #tpu.dot_dimension_numbers<[1], [0], [0], [1], [0, 0, 1, 1], [], []>} : vector<2x32xf32>, vector<32x128xf32>, vector<2x128xf32> -> vector<2x128xf32>
    %58 = arith.addf %57, %22 : vector<2x128xf32>
    %59 = arith.negf %58 : vector<2x128xf32>
    %60 = math.exp %59 : vector<2x128xf32>
    %cst_31 = arith.constant 1.000000e+00 : f32
    %61 = vector.broadcast %cst_31 : f32 to vector<2x128xf32>
    %62 = arith.addf %61, %60 : vector<2x128xf32>
    %63 = arith.divf %61, %62 : vector<2x128xf32>
    %64 = math.tanh %58 : vector<2x128xf32>
    %65 = vector.extract_strided_slice %63 {offsets = [0, 0], sizes = [2, 32], strides = [1, 1]} : vector<2x128xf32> to vector<2x32xf32>
    %66 = vector.extract_strided_slice %63 {offsets = [0, 32], sizes = [2, 32], strides = [1, 1]} : vector<2x128xf32> to vector<2x32xf32>
    %67 = vector.extract_strided_slice %63 {offsets = [0, 64], sizes = [2, 32], strides = [1, 1]} : vector<2x128xf32> to vector<2x32xf32>
    %68 = vector.extract_strided_slice %64 {offsets = [0, 96], sizes = [2, 32], strides = [1, 1]} : vector<2x128xf32> to vector<2x32xf32>
    %69 = arith.mulf %66, %15 : vector<2x32xf32>
    %70 = arith.mulf %65, %68 : vector<2x32xf32>
    %71 = arith.addf %69, %70 : vector<2x32xf32>
    %72 = math.tanh %71 : vector<2x32xf32>
    %73 = arith.mulf %67, %72 : vector<2x32xf32>
    %74 = vector.broadcast %7 : vector<1x32xf32> to vector<2x32xf32>
    %75 = arith.mulf %73, %74 : vector<2x32xf32>
    %cst_32 = arith.constant dense<0.000000e+00> : vector<2xf32>
    %76 = vector.multi_reduction <add>, %75, %cst_32 [1] : vector<2x32xf32> to vector<2xf32>
    %77 = vector.shape_cast %76 : vector<2xf32> to vector<2x1xf32>
    %78 = vector.broadcast %8 : f32 to vector<2x1xf32>
    %79 = arith.addf %77, %78 : vector<2x1xf32>
    %cst_33 = arith.constant dense<0.000000e+00> : vector<2x128xf32>
    %80 = tpu.matmul %39, %0, %cst_33 {dimension_numbers = #tpu.dot_dimension_numbers<[1], [0], [0], [1], [0, 0, 1, 1], [], []>} : vector<2x32xf32>, vector<32x128xf32>, vector<2x128xf32> -> vector<2x128xf32>
    %cst_34 = arith.constant dense<0.000000e+00> : vector<2x128xf32>
    %81 = tpu.matmul %56, %2, %cst_34 {dimension_numbers = #tpu.dot_dimension_numbers<[1], [0], [0], [1], [0, 0, 1, 1], [], []>} : vector<2x32xf32>, vector<32x128xf32>, vector<2x128xf32> -> vector<2x128xf32>
    %82 = vector.broadcast %3 : vector<1x128xf32> to vector<2x128xf32>
    %83 = arith.addf %81, %82 : vector<2x128xf32>
    %cst_35 = arith.constant dense<0.000000e+00> : vector<2x128xf32>
    %84 = tpu.matmul %73, %5, %cst_35 {dimension_numbers = #tpu.dot_dimension_numbers<[1], [0], [0], [1], [0, 0, 1, 1], [], []>} : vector<2x32xf32>, vector<32x128xf32>, vector<2x128xf32> -> vector<2x128xf32>
    %85 = vector.broadcast %6 : vector<1x128xf32> to vector<2x128xf32>
    %86 = arith.addf %84, %85 : vector<2x128xf32>
    %87 = vector.extract_strided_slice %14 {offsets = [2, 0], sizes = [2, 128], strides = [1, 1]} : vector<16x128xf32> to vector<2x128xf32>
    %88 = arith.addf %87, %80 : vector<2x128xf32>
    %89 = arith.negf %88 : vector<2x128xf32>
    %90 = math.exp %89 : vector<2x128xf32>
    %cst_36 = arith.constant 1.000000e+00 : f32
    %91 = vector.broadcast %cst_36 : f32 to vector<2x128xf32>
    %92 = arith.addf %91, %90 : vector<2x128xf32>
    %93 = arith.divf %91, %92 : vector<2x128xf32>
    %94 = math.tanh %88 : vector<2x128xf32>
    %95 = vector.extract_strided_slice %93 {offsets = [0, 0], sizes = [2, 32], strides = [1, 1]} : vector<2x128xf32> to vector<2x32xf32>
    %96 = vector.extract_strided_slice %93 {offsets = [0, 32], sizes = [2, 32], strides = [1, 1]} : vector<2x128xf32> to vector<2x32xf32>
    %97 = vector.extract_strided_slice %93 {offsets = [0, 64], sizes = [2, 32], strides = [1, 1]} : vector<2x128xf32> to vector<2x32xf32>
    %98 = vector.extract_strided_slice %94 {offsets = [0, 96], sizes = [2, 32], strides = [1, 1]} : vector<2x128xf32> to vector<2x32xf32>
    %99 = arith.mulf %96, %37 : vector<2x32xf32>
    %100 = arith.mulf %95, %98 : vector<2x32xf32>
    %101 = arith.addf %99, %100 : vector<2x32xf32>
    %102 = math.tanh %101 : vector<2x32xf32>
    %103 = arith.mulf %97, %102 : vector<2x32xf32>
    %cst_37 = arith.constant dense<0.000000e+00> : vector<2x128xf32>
    %104 = tpu.matmul %103, %1, %cst_37 {dimension_numbers = #tpu.dot_dimension_numbers<[1], [0], [0], [1], [0, 0, 1, 1], [], []>} : vector<2x32xf32>, vector<32x128xf32>, vector<2x128xf32> -> vector<2x128xf32>
    %105 = arith.addf %104, %83 : vector<2x128xf32>
    %106 = arith.negf %105 : vector<2x128xf32>
    %107 = math.exp %106 : vector<2x128xf32>
    %cst_38 = arith.constant 1.000000e+00 : f32
    %108 = vector.broadcast %cst_38 : f32 to vector<2x128xf32>
    %109 = arith.addf %108, %107 : vector<2x128xf32>
    %110 = arith.divf %108, %109 : vector<2x128xf32>
    %111 = math.tanh %105 : vector<2x128xf32>
    %112 = vector.extract_strided_slice %110 {offsets = [0, 0], sizes = [2, 32], strides = [1, 1]} : vector<2x128xf32> to vector<2x32xf32>
    %113 = vector.extract_strided_slice %110 {offsets = [0, 32], sizes = [2, 32], strides = [1, 1]} : vector<2x128xf32> to vector<2x32xf32>
    %114 = vector.extract_strided_slice %110 {offsets = [0, 64], sizes = [2, 32], strides = [1, 1]} : vector<2x128xf32> to vector<2x32xf32>
    %115 = vector.extract_strided_slice %111 {offsets = [0, 96], sizes = [2, 32], strides = [1, 1]} : vector<2x128xf32> to vector<2x32xf32>
    %116 = arith.mulf %113, %54 : vector<2x32xf32>
    %117 = arith.mulf %112, %115 : vector<2x32xf32>
    %118 = arith.addf %116, %117 : vector<2x32xf32>
    %119 = math.tanh %118 : vector<2x32xf32>
    %120 = arith.mulf %114, %119 : vector<2x32xf32>
    %cst_39 = arith.constant dense<0.000000e+00> : vector<2x128xf32>
    %121 = tpu.matmul %120, %4, %cst_39 {dimension_numbers = #tpu.dot_dimension_numbers<[1], [0], [0], [1], [0, 0, 1, 1], [], []>} : vector<2x32xf32>, vector<32x128xf32>, vector<2x128xf32> -> vector<2x128xf32>
    %122 = arith.addf %121, %86 : vector<2x128xf32>
    %123 = arith.negf %122 : vector<2x128xf32>
    %124 = math.exp %123 : vector<2x128xf32>
    %cst_40 = arith.constant 1.000000e+00 : f32
    %125 = vector.broadcast %cst_40 : f32 to vector<2x128xf32>
    %126 = arith.addf %125, %124 : vector<2x128xf32>
    %127 = arith.divf %125, %126 : vector<2x128xf32>
    %128 = math.tanh %122 : vector<2x128xf32>
    %129 = vector.extract_strided_slice %127 {offsets = [0, 0], sizes = [2, 32], strides = [1, 1]} : vector<2x128xf32> to vector<2x32xf32>
    %130 = vector.extract_strided_slice %127 {offsets = [0, 32], sizes = [2, 32], strides = [1, 1]} : vector<2x128xf32> to vector<2x32xf32>
    %131 = vector.extract_strided_slice %127 {offsets = [0, 64], sizes = [2, 32], strides = [1, 1]} : vector<2x128xf32> to vector<2x32xf32>
    %132 = vector.extract_strided_slice %128 {offsets = [0, 96], sizes = [2, 32], strides = [1, 1]} : vector<2x128xf32> to vector<2x32xf32>
    %133 = arith.mulf %130, %71 : vector<2x32xf32>
    %134 = arith.mulf %129, %132 : vector<2x32xf32>
    %135 = arith.addf %133, %134 : vector<2x32xf32>
    %136 = math.tanh %135 : vector<2x32xf32>
    %137 = arith.mulf %131, %136 : vector<2x32xf32>
    %138 = vector.broadcast %7 : vector<1x32xf32> to vector<2x32xf32>
    %139 = arith.mulf %137, %138 : vector<2x32xf32>
    %cst_41 = arith.constant dense<0.000000e+00> : vector<2xf32>
    %140 = vector.multi_reduction <add>, %139, %cst_41 [1] : vector<2x32xf32> to vector<2xf32>
    %141 = vector.shape_cast %140 : vector<2xf32> to vector<2x1xf32>
    %142 = vector.broadcast %8 : f32 to vector<2x1xf32>
    %143 = arith.addf %141, %142 : vector<2x1xf32>
    %cst_42 = arith.constant dense<0.000000e+00> : vector<2x128xf32>
    %144 = tpu.matmul %103, %0, %cst_42 {dimension_numbers = #tpu.dot_dimension_numbers<[1], [0], [0], [1], [0, 0, 1, 1], [], []>} : vector<2x32xf32>, vector<32x128xf32>, vector<2x128xf32> -> vector<2x128xf32>
    %cst_43 = arith.constant dense<0.000000e+00> : vector<2x128xf32>
    %145 = tpu.matmul %120, %2, %cst_43 {dimension_numbers = #tpu.dot_dimension_numbers<[1], [0], [0], [1], [0, 0, 1, 1], [], []>} : vector<2x32xf32>, vector<32x128xf32>, vector<2x128xf32> -> vector<2x128xf32>
    %146 = vector.broadcast %3 : vector<1x128xf32> to vector<2x128xf32>
    %147 = arith.addf %145, %146 : vector<2x128xf32>
    %cst_44 = arith.constant dense<0.000000e+00> : vector<2x128xf32>
    %148 = tpu.matmul %137, %5, %cst_44 {dimension_numbers = #tpu.dot_dimension_numbers<[1], [0], [0], [1], [0, 0, 1, 1], [], []>} : vector<2x32xf32>, vector<32x128xf32>, vector<2x128xf32> -> vector<2x128xf32>
    %149 = vector.broadcast %6 : vector<1x128xf32> to vector<2x128xf32>
    %150 = arith.addf %148, %149 : vector<2x128xf32>
    %151 = vector.extract_strided_slice %14 {offsets = [4, 0], sizes = [2, 128], strides = [1, 1]} : vector<16x128xf32> to vector<2x128xf32>
    %152 = arith.addf %151, %144 : vector<2x128xf32>
    %153 = arith.negf %152 : vector<2x128xf32>
    %154 = math.exp %153 : vector<2x128xf32>
    %cst_45 = arith.constant 1.000000e+00 : f32
    %155 = vector.broadcast %cst_45 : f32 to vector<2x128xf32>
    %156 = arith.addf %155, %154 : vector<2x128xf32>
    %157 = arith.divf %155, %156 : vector<2x128xf32>
    %158 = math.tanh %152 : vector<2x128xf32>
    %159 = vector.extract_strided_slice %157 {offsets = [0, 0], sizes = [2, 32], strides = [1, 1]} : vector<2x128xf32> to vector<2x32xf32>
    %160 = vector.extract_strided_slice %157 {offsets = [0, 32], sizes = [2, 32], strides = [1, 1]} : vector<2x128xf32> to vector<2x32xf32>
    %161 = vector.extract_strided_slice %157 {offsets = [0, 64], sizes = [2, 32], strides = [1, 1]} : vector<2x128xf32> to vector<2x32xf32>
    %162 = vector.extract_strided_slice %158 {offsets = [0, 96], sizes = [2, 32], strides = [1, 1]} : vector<2x128xf32> to vector<2x32xf32>
    %163 = arith.mulf %160, %101 : vector<2x32xf32>
    %164 = arith.mulf %159, %162 : vector<2x32xf32>
    %165 = arith.addf %163, %164 : vector<2x32xf32>
    %166 = math.tanh %165 : vector<2x32xf32>
    %167 = arith.mulf %161, %166 : vector<2x32xf32>
    %cst_46 = arith.constant dense<0.000000e+00> : vector<2x128xf32>
    %168 = tpu.matmul %167, %1, %cst_46 {dimension_numbers = #tpu.dot_dimension_numbers<[1], [0], [0], [1], [0, 0, 1, 1], [], []>} : vector<2x32xf32>, vector<32x128xf32>, vector<2x128xf32> -> vector<2x128xf32>
    %169 = arith.addf %168, %147 : vector<2x128xf32>
    %170 = arith.negf %169 : vector<2x128xf32>
    %171 = math.exp %170 : vector<2x128xf32>
    %cst_47 = arith.constant 1.000000e+00 : f32
    %172 = vector.broadcast %cst_47 : f32 to vector<2x128xf32>
    %173 = arith.addf %172, %171 : vector<2x128xf32>
    %174 = arith.divf %172, %173 : vector<2x128xf32>
    %175 = math.tanh %169 : vector<2x128xf32>
    %176 = vector.extract_strided_slice %174 {offsets = [0, 0], sizes = [2, 32], strides = [1, 1]} : vector<2x128xf32> to vector<2x32xf32>
    %177 = vector.extract_strided_slice %174 {offsets = [0, 32], sizes = [2, 32], strides = [1, 1]} : vector<2x128xf32> to vector<2x32xf32>
    %178 = vector.extract_strided_slice %174 {offsets = [0, 64], sizes = [2, 32], strides = [1, 1]} : vector<2x128xf32> to vector<2x32xf32>
    %179 = vector.extract_strided_slice %175 {offsets = [0, 96], sizes = [2, 32], strides = [1, 1]} : vector<2x128xf32> to vector<2x32xf32>
    %180 = arith.mulf %177, %118 : vector<2x32xf32>
    %181 = arith.mulf %176, %179 : vector<2x32xf32>
    %182 = arith.addf %180, %181 : vector<2x32xf32>
    %183 = math.tanh %182 : vector<2x32xf32>
    %184 = arith.mulf %178, %183 : vector<2x32xf32>
    %cst_48 = arith.constant dense<0.000000e+00> : vector<2x128xf32>
    %185 = tpu.matmul %184, %4, %cst_48 {dimension_numbers = #tpu.dot_dimension_numbers<[1], [0], [0], [1], [0, 0, 1, 1], [], []>} : vector<2x32xf32>, vector<32x128xf32>, vector<2x128xf32> -> vector<2x128xf32>
    %186 = arith.addf %185, %150 : vector<2x128xf32>
    %187 = arith.negf %186 : vector<2x128xf32>
    %188 = math.exp %187 : vector<2x128xf32>
    %cst_49 = arith.constant 1.000000e+00 : f32
    %189 = vector.broadcast %cst_49 : f32 to vector<2x128xf32>
    %190 = arith.addf %189, %188 : vector<2x128xf32>
    %191 = arith.divf %189, %190 : vector<2x128xf32>
    %192 = math.tanh %186 : vector<2x128xf32>
    %193 = vector.extract_strided_slice %191 {offsets = [0, 0], sizes = [2, 32], strides = [1, 1]} : vector<2x128xf32> to vector<2x32xf32>
    %194 = vector.extract_strided_slice %191 {offsets = [0, 32], sizes = [2, 32], strides = [1, 1]} : vector<2x128xf32> to vector<2x32xf32>
    %195 = vector.extract_strided_slice %191 {offsets = [0, 64], sizes = [2, 32], strides = [1, 1]} : vector<2x128xf32> to vector<2x32xf32>
    %196 = vector.extract_strided_slice %192 {offsets = [0, 96], sizes = [2, 32], strides = [1, 1]} : vector<2x128xf32> to vector<2x32xf32>
    %197 = arith.mulf %194, %135 : vector<2x32xf32>
    %198 = arith.mulf %193, %196 : vector<2x32xf32>
    %199 = arith.addf %197, %198 : vector<2x32xf32>
    %200 = math.tanh %199 : vector<2x32xf32>
    %201 = arith.mulf %195, %200 : vector<2x32xf32>
    %202 = vector.broadcast %7 : vector<1x32xf32> to vector<2x32xf32>
    %203 = arith.mulf %201, %202 : vector<2x32xf32>
    %cst_50 = arith.constant dense<0.000000e+00> : vector<2xf32>
    %204 = vector.multi_reduction <add>, %203, %cst_50 [1] : vector<2x32xf32> to vector<2xf32>
    %205 = vector.shape_cast %204 : vector<2xf32> to vector<2x1xf32>
    %206 = vector.broadcast %8 : f32 to vector<2x1xf32>
    %207 = arith.addf %205, %206 : vector<2x1xf32>
    %cst_51 = arith.constant dense<0.000000e+00> : vector<2x128xf32>
    %208 = tpu.matmul %167, %0, %cst_51 {dimension_numbers = #tpu.dot_dimension_numbers<[1], [0], [0], [1], [0, 0, 1, 1], [], []>} : vector<2x32xf32>, vector<32x128xf32>, vector<2x128xf32> -> vector<2x128xf32>
    %cst_52 = arith.constant dense<0.000000e+00> : vector<2x128xf32>
    %209 = tpu.matmul %184, %2, %cst_52 {dimension_numbers = #tpu.dot_dimension_numbers<[1], [0], [0], [1], [0, 0, 1, 1], [], []>} : vector<2x32xf32>, vector<32x128xf32>, vector<2x128xf32> -> vector<2x128xf32>
    %210 = vector.broadcast %3 : vector<1x128xf32> to vector<2x128xf32>
    %211 = arith.addf %209, %210 : vector<2x128xf32>
    %cst_53 = arith.constant dense<0.000000e+00> : vector<2x128xf32>
    %212 = tpu.matmul %201, %5, %cst_53 {dimension_numbers = #tpu.dot_dimension_numbers<[1], [0], [0], [1], [0, 0, 1, 1], [], []>} : vector<2x32xf32>, vector<32x128xf32>, vector<2x128xf32> -> vector<2x128xf32>
    %213 = vector.broadcast %6 : vector<1x128xf32> to vector<2x128xf32>
    %214 = arith.addf %212, %213 : vector<2x128xf32>
    %215 = vector.extract_strided_slice %14 {offsets = [6, 0], sizes = [2, 128], strides = [1, 1]} : vector<16x128xf32> to vector<2x128xf32>
    %216 = arith.addf %215, %208 : vector<2x128xf32>
    %217 = arith.negf %216 : vector<2x128xf32>
    %218 = math.exp %217 : vector<2x128xf32>
    %cst_54 = arith.constant 1.000000e+00 : f32
    %219 = vector.broadcast %cst_54 : f32 to vector<2x128xf32>
    %220 = arith.addf %219, %218 : vector<2x128xf32>
    %221 = arith.divf %219, %220 : vector<2x128xf32>
    %222 = math.tanh %216 : vector<2x128xf32>
    %223 = vector.extract_strided_slice %221 {offsets = [0, 0], sizes = [2, 32], strides = [1, 1]} : vector<2x128xf32> to vector<2x32xf32>
    %224 = vector.extract_strided_slice %221 {offsets = [0, 32], sizes = [2, 32], strides = [1, 1]} : vector<2x128xf32> to vector<2x32xf32>
    %225 = vector.extract_strided_slice %221 {offsets = [0, 64], sizes = [2, 32], strides = [1, 1]} : vector<2x128xf32> to vector<2x32xf32>
    %226 = vector.extract_strided_slice %222 {offsets = [0, 96], sizes = [2, 32], strides = [1, 1]} : vector<2x128xf32> to vector<2x32xf32>
    %227 = arith.mulf %224, %165 : vector<2x32xf32>
    %228 = arith.mulf %223, %226 : vector<2x32xf32>
    %229 = arith.addf %227, %228 : vector<2x32xf32>
    %230 = math.tanh %229 : vector<2x32xf32>
    %231 = arith.mulf %225, %230 : vector<2x32xf32>
    %cst_55 = arith.constant dense<0.000000e+00> : vector<2x128xf32>
    %232 = tpu.matmul %231, %1, %cst_55 {dimension_numbers = #tpu.dot_dimension_numbers<[1], [0], [0], [1], [0, 0, 1, 1], [], []>} : vector<2x32xf32>, vector<32x128xf32>, vector<2x128xf32> -> vector<2x128xf32>
    %233 = arith.addf %232, %211 : vector<2x128xf32>
    %234 = arith.negf %233 : vector<2x128xf32>
    %235 = math.exp %234 : vector<2x128xf32>
    %cst_56 = arith.constant 1.000000e+00 : f32
    %236 = vector.broadcast %cst_56 : f32 to vector<2x128xf32>
    %237 = arith.addf %236, %235 : vector<2x128xf32>
    %238 = arith.divf %236, %237 : vector<2x128xf32>
    %239 = math.tanh %233 : vector<2x128xf32>
    %240 = vector.extract_strided_slice %238 {offsets = [0, 0], sizes = [2, 32], strides = [1, 1]} : vector<2x128xf32> to vector<2x32xf32>
    %241 = vector.extract_strided_slice %238 {offsets = [0, 32], sizes = [2, 32], strides = [1, 1]} : vector<2x128xf32> to vector<2x32xf32>
    %242 = vector.extract_strided_slice %238 {offsets = [0, 64], sizes = [2, 32], strides = [1, 1]} : vector<2x128xf32> to vector<2x32xf32>
    %243 = vector.extract_strided_slice %239 {offsets = [0, 96], sizes = [2, 32], strides = [1, 1]} : vector<2x128xf32> to vector<2x32xf32>
    %244 = arith.mulf %241, %182 : vector<2x32xf32>
    %245 = arith.mulf %240, %243 : vector<2x32xf32>
    %246 = arith.addf %244, %245 : vector<2x32xf32>
    %247 = math.tanh %246 : vector<2x32xf32>
    %248 = arith.mulf %242, %247 : vector<2x32xf32>
    %cst_57 = arith.constant dense<0.000000e+00> : vector<2x128xf32>
    %249 = tpu.matmul %248, %4, %cst_57 {dimension_numbers = #tpu.dot_dimension_numbers<[1], [0], [0], [1], [0, 0, 1, 1], [], []>} : vector<2x32xf32>, vector<32x128xf32>, vector<2x128xf32> -> vector<2x128xf32>
    %250 = arith.addf %249, %214 : vector<2x128xf32>
    %251 = arith.negf %250 : vector<2x128xf32>
    %252 = math.exp %251 : vector<2x128xf32>
    %cst_58 = arith.constant 1.000000e+00 : f32
    %253 = vector.broadcast %cst_58 : f32 to vector<2x128xf32>
    %254 = arith.addf %253, %252 : vector<2x128xf32>
    %255 = arith.divf %253, %254 : vector<2x128xf32>
    %256 = math.tanh %250 : vector<2x128xf32>
    %257 = vector.extract_strided_slice %255 {offsets = [0, 0], sizes = [2, 32], strides = [1, 1]} : vector<2x128xf32> to vector<2x32xf32>
    %258 = vector.extract_strided_slice %255 {offsets = [0, 32], sizes = [2, 32], strides = [1, 1]} : vector<2x128xf32> to vector<2x32xf32>
    %259 = vector.extract_strided_slice %255 {offsets = [0, 64], sizes = [2, 32], strides = [1, 1]} : vector<2x128xf32> to vector<2x32xf32>
    %260 = vector.extract_strided_slice %256 {offsets = [0, 96], sizes = [2, 32], strides = [1, 1]} : vector<2x128xf32> to vector<2x32xf32>
    %261 = arith.mulf %258, %199 : vector<2x32xf32>
    %262 = arith.mulf %257, %260 : vector<2x32xf32>
    %263 = arith.addf %261, %262 : vector<2x32xf32>
    %264 = math.tanh %263 : vector<2x32xf32>
    %265 = arith.mulf %259, %264 : vector<2x32xf32>
    %266 = vector.broadcast %7 : vector<1x32xf32> to vector<2x32xf32>
    %267 = arith.mulf %265, %266 : vector<2x32xf32>
    %cst_59 = arith.constant dense<0.000000e+00> : vector<2xf32>
    %268 = vector.multi_reduction <add>, %267, %cst_59 [1] : vector<2x32xf32> to vector<2xf32>
    %269 = vector.shape_cast %268 : vector<2xf32> to vector<2x1xf32>
    %270 = vector.broadcast %8 : f32 to vector<2x1xf32>
    %271 = arith.addf %269, %270 : vector<2x1xf32>
    %cst_60 = arith.constant dense<0.000000e+00> : vector<2x128xf32>
    %272 = tpu.matmul %231, %0, %cst_60 {dimension_numbers = #tpu.dot_dimension_numbers<[1], [0], [0], [1], [0, 0, 1, 1], [], []>} : vector<2x32xf32>, vector<32x128xf32>, vector<2x128xf32> -> vector<2x128xf32>
    %cst_61 = arith.constant dense<0.000000e+00> : vector<2x128xf32>
    %273 = tpu.matmul %248, %2, %cst_61 {dimension_numbers = #tpu.dot_dimension_numbers<[1], [0], [0], [1], [0, 0, 1, 1], [], []>} : vector<2x32xf32>, vector<32x128xf32>, vector<2x128xf32> -> vector<2x128xf32>
    %274 = vector.broadcast %3 : vector<1x128xf32> to vector<2x128xf32>
    %275 = arith.addf %273, %274 : vector<2x128xf32>
    %cst_62 = arith.constant dense<0.000000e+00> : vector<2x128xf32>
    %276 = tpu.matmul %265, %5, %cst_62 {dimension_numbers = #tpu.dot_dimension_numbers<[1], [0], [0], [1], [0, 0, 1, 1], [], []>} : vector<2x32xf32>, vector<32x128xf32>, vector<2x128xf32> -> vector<2x128xf32>
    %277 = vector.broadcast %6 : vector<1x128xf32> to vector<2x128xf32>
    %278 = arith.addf %276, %277 : vector<2x128xf32>
    %279 = vector.extract_strided_slice %14 {offsets = [8, 0], sizes = [2, 128], strides = [1, 1]} : vector<16x128xf32> to vector<2x128xf32>
    %280 = arith.addf %279, %272 : vector<2x128xf32>
    %281 = arith.negf %280 : vector<2x128xf32>
    %282 = math.exp %281 : vector<2x128xf32>
    %cst_63 = arith.constant 1.000000e+00 : f32
    %283 = vector.broadcast %cst_63 : f32 to vector<2x128xf32>
    %284 = arith.addf %283, %282 : vector<2x128xf32>
    %285 = arith.divf %283, %284 : vector<2x128xf32>
    %286 = math.tanh %280 : vector<2x128xf32>
    %287 = vector.extract_strided_slice %285 {offsets = [0, 0], sizes = [2, 32], strides = [1, 1]} : vector<2x128xf32> to vector<2x32xf32>
    %288 = vector.extract_strided_slice %285 {offsets = [0, 32], sizes = [2, 32], strides = [1, 1]} : vector<2x128xf32> to vector<2x32xf32>
    %289 = vector.extract_strided_slice %285 {offsets = [0, 64], sizes = [2, 32], strides = [1, 1]} : vector<2x128xf32> to vector<2x32xf32>
    %290 = vector.extract_strided_slice %286 {offsets = [0, 96], sizes = [2, 32], strides = [1, 1]} : vector<2x128xf32> to vector<2x32xf32>
    %291 = arith.mulf %288, %229 : vector<2x32xf32>
    %292 = arith.mulf %287, %290 : vector<2x32xf32>
    %293 = arith.addf %291, %292 : vector<2x32xf32>
    %294 = math.tanh %293 : vector<2x32xf32>
    %295 = arith.mulf %289, %294 : vector<2x32xf32>
    %cst_64 = arith.constant dense<0.000000e+00> : vector<2x128xf32>
    %296 = tpu.matmul %295, %1, %cst_64 {dimension_numbers = #tpu.dot_dimension_numbers<[1], [0], [0], [1], [0, 0, 1, 1], [], []>} : vector<2x32xf32>, vector<32x128xf32>, vector<2x128xf32> -> vector<2x128xf32>
    %297 = arith.addf %296, %275 : vector<2x128xf32>
    %298 = arith.negf %297 : vector<2x128xf32>
    %299 = math.exp %298 : vector<2x128xf32>
    %cst_65 = arith.constant 1.000000e+00 : f32
    %300 = vector.broadcast %cst_65 : f32 to vector<2x128xf32>
    %301 = arith.addf %300, %299 : vector<2x128xf32>
    %302 = arith.divf %300, %301 : vector<2x128xf32>
    %303 = math.tanh %297 : vector<2x128xf32>
    %304 = vector.extract_strided_slice %302 {offsets = [0, 0], sizes = [2, 32], strides = [1, 1]} : vector<2x128xf32> to vector<2x32xf32>
    %305 = vector.extract_strided_slice %302 {offsets = [0, 32], sizes = [2, 32], strides = [1, 1]} : vector<2x128xf32> to vector<2x32xf32>
    %306 = vector.extract_strided_slice %302 {offsets = [0, 64], sizes = [2, 32], strides = [1, 1]} : vector<2x128xf32> to vector<2x32xf32>
    %307 = vector.extract_strided_slice %303 {offsets = [0, 96], sizes = [2, 32], strides = [1, 1]} : vector<2x128xf32> to vector<2x32xf32>
    %308 = arith.mulf %305, %246 : vector<2x32xf32>
    %309 = arith.mulf %304, %307 : vector<2x32xf32>
    %310 = arith.addf %308, %309 : vector<2x32xf32>
    %311 = math.tanh %310 : vector<2x32xf32>
    %312 = arith.mulf %306, %311 : vector<2x32xf32>
    %cst_66 = arith.constant dense<0.000000e+00> : vector<2x128xf32>
    %313 = tpu.matmul %312, %4, %cst_66 {dimension_numbers = #tpu.dot_dimension_numbers<[1], [0], [0], [1], [0, 0, 1, 1], [], []>} : vector<2x32xf32>, vector<32x128xf32>, vector<2x128xf32> -> vector<2x128xf32>
    %314 = arith.addf %313, %278 : vector<2x128xf32>
    %315 = arith.negf %314 : vector<2x128xf32>
    %316 = math.exp %315 : vector<2x128xf32>
    %cst_67 = arith.constant 1.000000e+00 : f32
    %317 = vector.broadcast %cst_67 : f32 to vector<2x128xf32>
    %318 = arith.addf %317, %316 : vector<2x128xf32>
    %319 = arith.divf %317, %318 : vector<2x128xf32>
    %320 = math.tanh %314 : vector<2x128xf32>
    %321 = vector.extract_strided_slice %319 {offsets = [0, 0], sizes = [2, 32], strides = [1, 1]} : vector<2x128xf32> to vector<2x32xf32>
    %322 = vector.extract_strided_slice %319 {offsets = [0, 32], sizes = [2, 32], strides = [1, 1]} : vector<2x128xf32> to vector<2x32xf32>
    %323 = vector.extract_strided_slice %319 {offsets = [0, 64], sizes = [2, 32], strides = [1, 1]} : vector<2x128xf32> to vector<2x32xf32>
    %324 = vector.extract_strided_slice %320 {offsets = [0, 96], sizes = [2, 32], strides = [1, 1]} : vector<2x128xf32> to vector<2x32xf32>
    %325 = arith.mulf %322, %263 : vector<2x32xf32>
    %326 = arith.mulf %321, %324 : vector<2x32xf32>
    %327 = arith.addf %325, %326 : vector<2x32xf32>
    %328 = math.tanh %327 : vector<2x32xf32>
    %329 = arith.mulf %323, %328 : vector<2x32xf32>
    %330 = vector.broadcast %7 : vector<1x32xf32> to vector<2x32xf32>
    %331 = arith.mulf %329, %330 : vector<2x32xf32>
    %cst_68 = arith.constant dense<0.000000e+00> : vector<2xf32>
    %332 = vector.multi_reduction <add>, %331, %cst_68 [1] : vector<2x32xf32> to vector<2xf32>
    %333 = vector.shape_cast %332 : vector<2xf32> to vector<2x1xf32>
    %334 = vector.broadcast %8 : f32 to vector<2x1xf32>
    %335 = arith.addf %333, %334 : vector<2x1xf32>
    %cst_69 = arith.constant dense<0.000000e+00> : vector<2x128xf32>
    %336 = tpu.matmul %295, %0, %cst_69 {dimension_numbers = #tpu.dot_dimension_numbers<[1], [0], [0], [1], [0, 0, 1, 1], [], []>} : vector<2x32xf32>, vector<32x128xf32>, vector<2x128xf32> -> vector<2x128xf32>
    %cst_70 = arith.constant dense<0.000000e+00> : vector<2x128xf32>
    %337 = tpu.matmul %312, %2, %cst_70 {dimension_numbers = #tpu.dot_dimension_numbers<[1], [0], [0], [1], [0, 0, 1, 1], [], []>} : vector<2x32xf32>, vector<32x128xf32>, vector<2x128xf32> -> vector<2x128xf32>
    %338 = vector.broadcast %3 : vector<1x128xf32> to vector<2x128xf32>
    %339 = arith.addf %337, %338 : vector<2x128xf32>
    %cst_71 = arith.constant dense<0.000000e+00> : vector<2x128xf32>
    %340 = tpu.matmul %329, %5, %cst_71 {dimension_numbers = #tpu.dot_dimension_numbers<[1], [0], [0], [1], [0, 0, 1, 1], [], []>} : vector<2x32xf32>, vector<32x128xf32>, vector<2x128xf32> -> vector<2x128xf32>
    %341 = vector.broadcast %6 : vector<1x128xf32> to vector<2x128xf32>
    %342 = arith.addf %340, %341 : vector<2x128xf32>
    %343 = vector.extract_strided_slice %14 {offsets = [10, 0], sizes = [2, 128], strides = [1, 1]} : vector<16x128xf32> to vector<2x128xf32>
    %344 = arith.addf %343, %336 : vector<2x128xf32>
    %345 = arith.negf %344 : vector<2x128xf32>
    %346 = math.exp %345 : vector<2x128xf32>
    %cst_72 = arith.constant 1.000000e+00 : f32
    %347 = vector.broadcast %cst_72 : f32 to vector<2x128xf32>
    %348 = arith.addf %347, %346 : vector<2x128xf32>
    %349 = arith.divf %347, %348 : vector<2x128xf32>
    %350 = math.tanh %344 : vector<2x128xf32>
    %351 = vector.extract_strided_slice %349 {offsets = [0, 0], sizes = [2, 32], strides = [1, 1]} : vector<2x128xf32> to vector<2x32xf32>
    %352 = vector.extract_strided_slice %349 {offsets = [0, 32], sizes = [2, 32], strides = [1, 1]} : vector<2x128xf32> to vector<2x32xf32>
    %353 = vector.extract_strided_slice %349 {offsets = [0, 64], sizes = [2, 32], strides = [1, 1]} : vector<2x128xf32> to vector<2x32xf32>
    %354 = vector.extract_strided_slice %350 {offsets = [0, 96], sizes = [2, 32], strides = [1, 1]} : vector<2x128xf32> to vector<2x32xf32>
    %355 = arith.mulf %352, %293 : vector<2x32xf32>
    %356 = arith.mulf %351, %354 : vector<2x32xf32>
    %357 = arith.addf %355, %356 : vector<2x32xf32>
    %358 = math.tanh %357 : vector<2x32xf32>
    %359 = arith.mulf %353, %358 : vector<2x32xf32>
    %cst_73 = arith.constant dense<0.000000e+00> : vector<2x128xf32>
    %360 = tpu.matmul %359, %1, %cst_73 {dimension_numbers = #tpu.dot_dimension_numbers<[1], [0], [0], [1], [0, 0, 1, 1], [], []>} : vector<2x32xf32>, vector<32x128xf32>, vector<2x128xf32> -> vector<2x128xf32>
    %361 = arith.addf %360, %339 : vector<2x128xf32>
    %362 = arith.negf %361 : vector<2x128xf32>
    %363 = math.exp %362 : vector<2x128xf32>
    %cst_74 = arith.constant 1.000000e+00 : f32
    %364 = vector.broadcast %cst_74 : f32 to vector<2x128xf32>
    %365 = arith.addf %364, %363 : vector<2x128xf32>
    %366 = arith.divf %364, %365 : vector<2x128xf32>
    %367 = math.tanh %361 : vector<2x128xf32>
    %368 = vector.extract_strided_slice %366 {offsets = [0, 0], sizes = [2, 32], strides = [1, 1]} : vector<2x128xf32> to vector<2x32xf32>
    %369 = vector.extract_strided_slice %366 {offsets = [0, 32], sizes = [2, 32], strides = [1, 1]} : vector<2x128xf32> to vector<2x32xf32>
    %370 = vector.extract_strided_slice %366 {offsets = [0, 64], sizes = [2, 32], strides = [1, 1]} : vector<2x128xf32> to vector<2x32xf32>
    %371 = vector.extract_strided_slice %367 {offsets = [0, 96], sizes = [2, 32], strides = [1, 1]} : vector<2x128xf32> to vector<2x32xf32>
    %372 = arith.mulf %369, %310 : vector<2x32xf32>
    %373 = arith.mulf %368, %371 : vector<2x32xf32>
    %374 = arith.addf %372, %373 : vector<2x32xf32>
    %375 = math.tanh %374 : vector<2x32xf32>
    %376 = arith.mulf %370, %375 : vector<2x32xf32>
    %cst_75 = arith.constant dense<0.000000e+00> : vector<2x128xf32>
    %377 = tpu.matmul %376, %4, %cst_75 {dimension_numbers = #tpu.dot_dimension_numbers<[1], [0], [0], [1], [0, 0, 1, 1], [], []>} : vector<2x32xf32>, vector<32x128xf32>, vector<2x128xf32> -> vector<2x128xf32>
    %378 = arith.addf %377, %342 : vector<2x128xf32>
    %379 = arith.negf %378 : vector<2x128xf32>
    %380 = math.exp %379 : vector<2x128xf32>
    %cst_76 = arith.constant 1.000000e+00 : f32
    %381 = vector.broadcast %cst_76 : f32 to vector<2x128xf32>
    %382 = arith.addf %381, %380 : vector<2x128xf32>
    %383 = arith.divf %381, %382 : vector<2x128xf32>
    %384 = math.tanh %378 : vector<2x128xf32>
    %385 = vector.extract_strided_slice %383 {offsets = [0, 0], sizes = [2, 32], strides = [1, 1]} : vector<2x128xf32> to vector<2x32xf32>
    %386 = vector.extract_strided_slice %383 {offsets = [0, 32], sizes = [2, 32], strides = [1, 1]} : vector<2x128xf32> to vector<2x32xf32>
    %387 = vector.extract_strided_slice %383 {offsets = [0, 64], sizes = [2, 32], strides = [1, 1]} : vector<2x128xf32> to vector<2x32xf32>
    %388 = vector.extract_strided_slice %384 {offsets = [0, 96], sizes = [2, 32], strides = [1, 1]} : vector<2x128xf32> to vector<2x32xf32>
    %389 = arith.mulf %386, %327 : vector<2x32xf32>
    %390 = arith.mulf %385, %388 : vector<2x32xf32>
    %391 = arith.addf %389, %390 : vector<2x32xf32>
    %392 = math.tanh %391 : vector<2x32xf32>
    %393 = arith.mulf %387, %392 : vector<2x32xf32>
    %394 = vector.broadcast %7 : vector<1x32xf32> to vector<2x32xf32>
    %395 = arith.mulf %393, %394 : vector<2x32xf32>
    %cst_77 = arith.constant dense<0.000000e+00> : vector<2xf32>
    %396 = vector.multi_reduction <add>, %395, %cst_77 [1] : vector<2x32xf32> to vector<2xf32>
    %397 = vector.shape_cast %396 : vector<2xf32> to vector<2x1xf32>
    %398 = vector.broadcast %8 : f32 to vector<2x1xf32>
    %399 = arith.addf %397, %398 : vector<2x1xf32>
    %cst_78 = arith.constant dense<0.000000e+00> : vector<2x128xf32>
    %400 = tpu.matmul %359, %0, %cst_78 {dimension_numbers = #tpu.dot_dimension_numbers<[1], [0], [0], [1], [0, 0, 1, 1], [], []>} : vector<2x32xf32>, vector<32x128xf32>, vector<2x128xf32> -> vector<2x128xf32>
    %cst_79 = arith.constant dense<0.000000e+00> : vector<2x128xf32>
    %401 = tpu.matmul %376, %2, %cst_79 {dimension_numbers = #tpu.dot_dimension_numbers<[1], [0], [0], [1], [0, 0, 1, 1], [], []>} : vector<2x32xf32>, vector<32x128xf32>, vector<2x128xf32> -> vector<2x128xf32>
    %402 = vector.broadcast %3 : vector<1x128xf32> to vector<2x128xf32>
    %403 = arith.addf %401, %402 : vector<2x128xf32>
    %cst_80 = arith.constant dense<0.000000e+00> : vector<2x128xf32>
    %404 = tpu.matmul %393, %5, %cst_80 {dimension_numbers = #tpu.dot_dimension_numbers<[1], [0], [0], [1], [0, 0, 1, 1], [], []>} : vector<2x32xf32>, vector<32x128xf32>, vector<2x128xf32> -> vector<2x128xf32>
    %405 = vector.broadcast %6 : vector<1x128xf32> to vector<2x128xf32>
    %406 = arith.addf %404, %405 : vector<2x128xf32>
    %407 = vector.extract_strided_slice %14 {offsets = [12, 0], sizes = [2, 128], strides = [1, 1]} : vector<16x128xf32> to vector<2x128xf32>
    %408 = arith.addf %407, %400 : vector<2x128xf32>
    %409 = arith.negf %408 : vector<2x128xf32>
    %410 = math.exp %409 : vector<2x128xf32>
    %cst_81 = arith.constant 1.000000e+00 : f32
    %411 = vector.broadcast %cst_81 : f32 to vector<2x128xf32>
    %412 = arith.addf %411, %410 : vector<2x128xf32>
    %413 = arith.divf %411, %412 : vector<2x128xf32>
    %414 = math.tanh %408 : vector<2x128xf32>
    %415 = vector.extract_strided_slice %413 {offsets = [0, 0], sizes = [2, 32], strides = [1, 1]} : vector<2x128xf32> to vector<2x32xf32>
    %416 = vector.extract_strided_slice %413 {offsets = [0, 32], sizes = [2, 32], strides = [1, 1]} : vector<2x128xf32> to vector<2x32xf32>
    %417 = vector.extract_strided_slice %413 {offsets = [0, 64], sizes = [2, 32], strides = [1, 1]} : vector<2x128xf32> to vector<2x32xf32>
    %418 = vector.extract_strided_slice %414 {offsets = [0, 96], sizes = [2, 32], strides = [1, 1]} : vector<2x128xf32> to vector<2x32xf32>
    %419 = arith.mulf %416, %357 : vector<2x32xf32>
    %420 = arith.mulf %415, %418 : vector<2x32xf32>
    %421 = arith.addf %419, %420 : vector<2x32xf32>
    %422 = math.tanh %421 : vector<2x32xf32>
    %423 = arith.mulf %417, %422 : vector<2x32xf32>
    %cst_82 = arith.constant dense<0.000000e+00> : vector<2x128xf32>
    %424 = tpu.matmul %423, %1, %cst_82 {dimension_numbers = #tpu.dot_dimension_numbers<[1], [0], [0], [1], [0, 0, 1, 1], [], []>} : vector<2x32xf32>, vector<32x128xf32>, vector<2x128xf32> -> vector<2x128xf32>
    %425 = arith.addf %424, %403 : vector<2x128xf32>
    %426 = arith.negf %425 : vector<2x128xf32>
    %427 = math.exp %426 : vector<2x128xf32>
    %cst_83 = arith.constant 1.000000e+00 : f32
    %428 = vector.broadcast %cst_83 : f32 to vector<2x128xf32>
    %429 = arith.addf %428, %427 : vector<2x128xf32>
    %430 = arith.divf %428, %429 : vector<2x128xf32>
    %431 = math.tanh %425 : vector<2x128xf32>
    %432 = vector.extract_strided_slice %430 {offsets = [0, 0], sizes = [2, 32], strides = [1, 1]} : vector<2x128xf32> to vector<2x32xf32>
    %433 = vector.extract_strided_slice %430 {offsets = [0, 32], sizes = [2, 32], strides = [1, 1]} : vector<2x128xf32> to vector<2x32xf32>
    %434 = vector.extract_strided_slice %430 {offsets = [0, 64], sizes = [2, 32], strides = [1, 1]} : vector<2x128xf32> to vector<2x32xf32>
    %435 = vector.extract_strided_slice %431 {offsets = [0, 96], sizes = [2, 32], strides = [1, 1]} : vector<2x128xf32> to vector<2x32xf32>
    %436 = arith.mulf %433, %374 : vector<2x32xf32>
    %437 = arith.mulf %432, %435 : vector<2x32xf32>
    %438 = arith.addf %436, %437 : vector<2x32xf32>
    %439 = math.tanh %438 : vector<2x32xf32>
    %440 = arith.mulf %434, %439 : vector<2x32xf32>
    %cst_84 = arith.constant dense<0.000000e+00> : vector<2x128xf32>
    %441 = tpu.matmul %440, %4, %cst_84 {dimension_numbers = #tpu.dot_dimension_numbers<[1], [0], [0], [1], [0, 0, 1, 1], [], []>} : vector<2x32xf32>, vector<32x128xf32>, vector<2x128xf32> -> vector<2x128xf32>
    %442 = arith.addf %441, %406 : vector<2x128xf32>
    %443 = arith.negf %442 : vector<2x128xf32>
    %444 = math.exp %443 : vector<2x128xf32>
    %cst_85 = arith.constant 1.000000e+00 : f32
    %445 = vector.broadcast %cst_85 : f32 to vector<2x128xf32>
    %446 = arith.addf %445, %444 : vector<2x128xf32>
    %447 = arith.divf %445, %446 : vector<2x128xf32>
    %448 = math.tanh %442 : vector<2x128xf32>
    %449 = vector.extract_strided_slice %447 {offsets = [0, 0], sizes = [2, 32], strides = [1, 1]} : vector<2x128xf32> to vector<2x32xf32>
    %450 = vector.extract_strided_slice %447 {offsets = [0, 32], sizes = [2, 32], strides = [1, 1]} : vector<2x128xf32> to vector<2x32xf32>
    %451 = vector.extract_strided_slice %447 {offsets = [0, 64], sizes = [2, 32], strides = [1, 1]} : vector<2x128xf32> to vector<2x32xf32>
    %452 = vector.extract_strided_slice %448 {offsets = [0, 96], sizes = [2, 32], strides = [1, 1]} : vector<2x128xf32> to vector<2x32xf32>
    %453 = arith.mulf %450, %391 : vector<2x32xf32>
    %454 = arith.mulf %449, %452 : vector<2x32xf32>
    %455 = arith.addf %453, %454 : vector<2x32xf32>
    %456 = math.tanh %455 : vector<2x32xf32>
    %457 = arith.mulf %451, %456 : vector<2x32xf32>
    %458 = vector.broadcast %7 : vector<1x32xf32> to vector<2x32xf32>
    %459 = arith.mulf %457, %458 : vector<2x32xf32>
    %cst_86 = arith.constant dense<0.000000e+00> : vector<2xf32>
    %460 = vector.multi_reduction <add>, %459, %cst_86 [1] : vector<2x32xf32> to vector<2xf32>
    %461 = vector.shape_cast %460 : vector<2xf32> to vector<2x1xf32>
    %462 = vector.broadcast %8 : f32 to vector<2x1xf32>
    %463 = arith.addf %461, %462 : vector<2x1xf32>
    %cst_87 = arith.constant dense<0.000000e+00> : vector<2x128xf32>
    %464 = tpu.matmul %423, %0, %cst_87 {dimension_numbers = #tpu.dot_dimension_numbers<[1], [0], [0], [1], [0, 0, 1, 1], [], []>} : vector<2x32xf32>, vector<32x128xf32>, vector<2x128xf32> -> vector<2x128xf32>
    %cst_88 = arith.constant dense<0.000000e+00> : vector<2x128xf32>
    %465 = tpu.matmul %440, %2, %cst_88 {dimension_numbers = #tpu.dot_dimension_numbers<[1], [0], [0], [1], [0, 0, 1, 1], [], []>} : vector<2x32xf32>, vector<32x128xf32>, vector<2x128xf32> -> vector<2x128xf32>
    %466 = vector.broadcast %3 : vector<1x128xf32> to vector<2x128xf32>
    %467 = arith.addf %465, %466 : vector<2x128xf32>
    %cst_89 = arith.constant dense<0.000000e+00> : vector<2x128xf32>
    %468 = tpu.matmul %457, %5, %cst_89 {dimension_numbers = #tpu.dot_dimension_numbers<[1], [0], [0], [1], [0, 0, 1, 1], [], []>} : vector<2x32xf32>, vector<32x128xf32>, vector<2x128xf32> -> vector<2x128xf32>
    %469 = vector.broadcast %6 : vector<1x128xf32> to vector<2x128xf32>
    %470 = arith.addf %468, %469 : vector<2x128xf32>
    %471 = vector.extract_strided_slice %14 {offsets = [14, 0], sizes = [2, 128], strides = [1, 1]} : vector<16x128xf32> to vector<2x128xf32>
    %472 = arith.addf %471, %464 : vector<2x128xf32>
    %473 = arith.negf %472 : vector<2x128xf32>
    %474 = math.exp %473 : vector<2x128xf32>
    %cst_90 = arith.constant 1.000000e+00 : f32
    %475 = vector.broadcast %cst_90 : f32 to vector<2x128xf32>
    %476 = arith.addf %475, %474 : vector<2x128xf32>
    %477 = arith.divf %475, %476 : vector<2x128xf32>
    %478 = math.tanh %472 : vector<2x128xf32>
    %479 = vector.extract_strided_slice %477 {offsets = [0, 0], sizes = [2, 32], strides = [1, 1]} : vector<2x128xf32> to vector<2x32xf32>
    %480 = vector.extract_strided_slice %477 {offsets = [0, 32], sizes = [2, 32], strides = [1, 1]} : vector<2x128xf32> to vector<2x32xf32>
    %481 = vector.extract_strided_slice %477 {offsets = [0, 64], sizes = [2, 32], strides = [1, 1]} : vector<2x128xf32> to vector<2x32xf32>
    %482 = vector.extract_strided_slice %478 {offsets = [0, 96], sizes = [2, 32], strides = [1, 1]} : vector<2x128xf32> to vector<2x32xf32>
    %483 = arith.mulf %480, %421 : vector<2x32xf32>
    %484 = arith.mulf %479, %482 : vector<2x32xf32>
    %485 = arith.addf %483, %484 : vector<2x32xf32>
    %486 = math.tanh %485 : vector<2x32xf32>
    %487 = arith.mulf %481, %486 : vector<2x32xf32>
    %cst_91 = arith.constant dense<0.000000e+00> : vector<2x128xf32>
    %488 = tpu.matmul %487, %1, %cst_91 {dimension_numbers = #tpu.dot_dimension_numbers<[1], [0], [0], [1], [0, 0, 1, 1], [], []>} : vector<2x32xf32>, vector<32x128xf32>, vector<2x128xf32> -> vector<2x128xf32>
    %489 = arith.addf %488, %467 : vector<2x128xf32>
    %490 = arith.negf %489 : vector<2x128xf32>
    %491 = math.exp %490 : vector<2x128xf32>
    %cst_92 = arith.constant 1.000000e+00 : f32
    %492 = vector.broadcast %cst_92 : f32 to vector<2x128xf32>
    %493 = arith.addf %492, %491 : vector<2x128xf32>
    %494 = arith.divf %492, %493 : vector<2x128xf32>
    %495 = math.tanh %489 : vector<2x128xf32>
    %496 = vector.extract_strided_slice %494 {offsets = [0, 0], sizes = [2, 32], strides = [1, 1]} : vector<2x128xf32> to vector<2x32xf32>
    %497 = vector.extract_strided_slice %494 {offsets = [0, 32], sizes = [2, 32], strides = [1, 1]} : vector<2x128xf32> to vector<2x32xf32>
    %498 = vector.extract_strided_slice %494 {offsets = [0, 64], sizes = [2, 32], strides = [1, 1]} : vector<2x128xf32> to vector<2x32xf32>
    %499 = vector.extract_strided_slice %495 {offsets = [0, 96], sizes = [2, 32], strides = [1, 1]} : vector<2x128xf32> to vector<2x32xf32>
    %500 = arith.mulf %497, %438 : vector<2x32xf32>
    %501 = arith.mulf %496, %499 : vector<2x32xf32>
    %502 = arith.addf %500, %501 : vector<2x32xf32>
    %503 = math.tanh %502 : vector<2x32xf32>
    %504 = arith.mulf %498, %503 : vector<2x32xf32>
    %cst_93 = arith.constant dense<0.000000e+00> : vector<2x128xf32>
    %505 = tpu.matmul %504, %4, %cst_93 {dimension_numbers = #tpu.dot_dimension_numbers<[1], [0], [0], [1], [0, 0, 1, 1], [], []>} : vector<2x32xf32>, vector<32x128xf32>, vector<2x128xf32> -> vector<2x128xf32>
    %506 = arith.addf %505, %470 : vector<2x128xf32>
    %507 = arith.negf %506 : vector<2x128xf32>
    %508 = math.exp %507 : vector<2x128xf32>
    %cst_94 = arith.constant 1.000000e+00 : f32
    %509 = vector.broadcast %cst_94 : f32 to vector<2x128xf32>
    %510 = arith.addf %509, %508 : vector<2x128xf32>
    %511 = arith.divf %509, %510 : vector<2x128xf32>
    %512 = math.tanh %506 : vector<2x128xf32>
    %513 = vector.extract_strided_slice %511 {offsets = [0, 0], sizes = [2, 32], strides = [1, 1]} : vector<2x128xf32> to vector<2x32xf32>
    %514 = vector.extract_strided_slice %511 {offsets = [0, 32], sizes = [2, 32], strides = [1, 1]} : vector<2x128xf32> to vector<2x32xf32>
    %515 = vector.extract_strided_slice %511 {offsets = [0, 64], sizes = [2, 32], strides = [1, 1]} : vector<2x128xf32> to vector<2x32xf32>
    %516 = vector.extract_strided_slice %512 {offsets = [0, 96], sizes = [2, 32], strides = [1, 1]} : vector<2x128xf32> to vector<2x32xf32>
    %517 = arith.mulf %514, %455 : vector<2x32xf32>
    %518 = arith.mulf %513, %516 : vector<2x32xf32>
    %519 = arith.addf %517, %518 : vector<2x32xf32>
    %520 = math.tanh %519 : vector<2x32xf32>
    %521 = arith.mulf %515, %520 : vector<2x32xf32>
    %522 = vector.broadcast %7 : vector<1x32xf32> to vector<2x32xf32>
    %523 = arith.mulf %521, %522 : vector<2x32xf32>
    %cst_95 = arith.constant dense<0.000000e+00> : vector<2xf32>
    %524 = vector.multi_reduction <add>, %523, %cst_95 [1] : vector<2x32xf32> to vector<2xf32>
    %525 = vector.shape_cast %524 : vector<2xf32> to vector<2x1xf32>
    %526 = vector.broadcast %8 : f32 to vector<2x1xf32>
    %527 = arith.addf %525, %526 : vector<2x1xf32>
    %528 = tpu.concatenate %79, %143, %207, %271, %335, %399, %463, %527 in 1 : vector<2x1xf32>, vector<2x1xf32>, vector<2x1xf32>, vector<2x1xf32>, vector<2x1xf32>, vector<2x1xf32>, vector<2x1xf32>, vector<2x1xf32> -> vector<2x8xf32>
    %cst_96 = arith.constant dense<0xFF800000> : vector<2xf32>
    %529 = vector.multi_reduction <maximumf>, %528, %cst_96 [1] : vector<2x8xf32> to vector<2xf32>
    %530 = vector.shape_cast %529 : vector<2xf32> to vector<2x1xf32>
    %531 = vector.broadcast %530 : vector<2x1xf32> to vector<2x8xf32>
    %532 = arith.subf %528, %531 : vector<2x8xf32>
    %533 = math.exp %532 : vector<2x8xf32>
    %cst_97 = arith.constant dense<0.000000e+00> : vector<2xf32>
    %534 = vector.multi_reduction <add>, %533, %cst_97 [1] : vector<2x8xf32> to vector<2xf32>
    %535 = vector.shape_cast %534 : vector<2xf32> to vector<2x1xf32>
    %536 = vector.broadcast %535 : vector<2x1xf32> to vector<2x8xf32>
    %537 = arith.divf %533, %536 : vector<2x8xf32>
    %cst_98 = arith.constant 0.000000e+00 : f32
    %538 = vector.broadcast %cst_98 : f32 to vector<2x32xf32>
    %539 = vector.extract_strided_slice %537 {offsets = [0, 0], sizes = [2, 1], strides = [1, 1]} : vector<2x8xf32> to vector<2x1xf32>
    %540 = vector.broadcast %539 : vector<2x1xf32> to vector<2x32xf32>
    %541 = arith.mulf %540, %73 : vector<2x32xf32>
    %542 = arith.addf %538, %541 : vector<2x32xf32>
    %543 = vector.extract_strided_slice %537 {offsets = [0, 1], sizes = [2, 1], strides = [1, 1]} : vector<2x8xf32> to vector<2x1xf32>
    %544 = vector.broadcast %543 : vector<2x1xf32> to vector<2x32xf32>
    %545 = arith.mulf %544, %137 : vector<2x32xf32>
    %546 = arith.addf %542, %545 : vector<2x32xf32>
    %547 = vector.extract_strided_slice %537 {offsets = [0, 2], sizes = [2, 1], strides = [1, 1]} : vector<2x8xf32> to vector<2x1xf32>
    %548 = vector.broadcast %547 : vector<2x1xf32> to vector<2x32xf32>
    %549 = arith.mulf %548, %201 : vector<2x32xf32>
    %550 = arith.addf %546, %549 : vector<2x32xf32>
    %551 = vector.extract_strided_slice %537 {offsets = [0, 3], sizes = [2, 1], strides = [1, 1]} : vector<2x8xf32> to vector<2x1xf32>
    %552 = vector.broadcast %551 : vector<2x1xf32> to vector<2x32xf32>
    %553 = arith.mulf %552, %265 : vector<2x32xf32>
    %554 = arith.addf %550, %553 : vector<2x32xf32>
    %555 = vector.extract_strided_slice %537 {offsets = [0, 4], sizes = [2, 1], strides = [1, 1]} : vector<2x8xf32> to vector<2x1xf32>
    %556 = vector.broadcast %555 : vector<2x1xf32> to vector<2x32xf32>
    %557 = arith.mulf %556, %329 : vector<2x32xf32>
    %558 = arith.addf %554, %557 : vector<2x32xf32>
    %559 = vector.extract_strided_slice %537 {offsets = [0, 5], sizes = [2, 1], strides = [1, 1]} : vector<2x8xf32> to vector<2x1xf32>
    %560 = vector.broadcast %559 : vector<2x1xf32> to vector<2x32xf32>
    %561 = arith.mulf %560, %393 : vector<2x32xf32>
    %562 = arith.addf %558, %561 : vector<2x32xf32>
    %563 = vector.extract_strided_slice %537 {offsets = [0, 6], sizes = [2, 1], strides = [1, 1]} : vector<2x8xf32> to vector<2x1xf32>
    %564 = vector.broadcast %563 : vector<2x1xf32> to vector<2x32xf32>
    %565 = arith.mulf %564, %457 : vector<2x32xf32>
    %566 = arith.addf %562, %565 : vector<2x32xf32>
    %567 = vector.extract_strided_slice %537 {offsets = [0, 7], sizes = [2, 1], strides = [1, 1]} : vector<2x8xf32> to vector<2x1xf32>
    %568 = vector.broadcast %567 : vector<2x1xf32> to vector<2x32xf32>
    %569 = arith.mulf %568, %521 : vector<2x32xf32>
    %570 = arith.addf %566, %569 : vector<2x32xf32>
    %c0_99 = arith.constant 0 : index
    %c0_100 = arith.constant 0 : index
    %571 = vector.load %arg12[%c0_99, %c0_100] : memref<32x16xf32, #tpu.memory_space<vmem>>, vector<32x16xf32>
    %cst_101 = arith.constant dense<0.000000e+00> : vector<2x16xf32>
    %572 = tpu.matmul %570, %571, %cst_101 {dimension_numbers = #tpu.dot_dimension_numbers<[1], [0], [0], [1], [0, 0, 1, 1], [], []>} : vector<2x32xf32>, vector<32x16xf32>, vector<2x16xf32> -> vector<2x16xf32>
    %c0_102 = arith.constant 0 : index
    %c0_103 = arith.constant 0 : index
    %573 = vector.load %arg13[%c0_102, %c0_103] : memref<1x16xf32, #tpu.memory_space<vmem>>, vector<1x16xf32>
    %574 = vector.broadcast %573 : vector<1x16xf32> to vector<2x16xf32>
    %575 = arith.addf %572, %574 : vector<2x16xf32>
    %cst_104 = arith.constant 0.000000e+00 : f32
    %576 = vector.broadcast %cst_104 : f32 to vector<2x16xf32>
    %577 = arith.maximumf %575, %576 : vector<2x16xf32>
    %c0_105 = arith.constant 0 : index
    %c0_106 = arith.constant 0 : index
    %578 = vector.load %arg14[%c0_105, %c0_106] : memref<16x1xf32, #tpu.memory_space<vmem>>, vector<16x1xf32>
    %cst_107 = arith.constant dense<0.000000e+00> : vector<2x1xf32>
    %579 = tpu.matmul %577, %578, %cst_107 {dimension_numbers = #tpu.dot_dimension_numbers<[1], [0], [0], [1], [0, 0, 1, 1], [], []>} : vector<2x16xf32>, vector<16x1xf32>, vector<2x1xf32> -> vector<2x1xf32>
    %c0_108 = arith.constant 0 : index
    %c0_109 = arith.constant 0 : index
    %580 = vector.load %arg15[%c0_108, %c0_109] : memref<1x1xf32, #tpu.memory_space<vmem>>, vector<1x1xf32>
    %581 = vector.broadcast %580 : vector<1x1xf32> to vector<2x1xf32>
    %582 = arith.addf %579, %581 : vector<2x1xf32>
    %583 = arith.negf %582 : vector<2x1xf32>
    %584 = math.exp %583 : vector<2x1xf32>
    %cst_110 = arith.constant 1.000000e+00 : f32
    %585 = vector.broadcast %cst_110 : f32 to vector<2x1xf32>
    %586 = arith.addf %585, %584 : vector<2x1xf32>
    %587 = arith.divf %585, %586 : vector<2x1xf32>
    %cst_111 = arith.constant 8.000000e-02 : f32
    %588 = vector.broadcast %cst_111 : f32 to vector<2x1xf32>
    %589 = arith.mulf %587, %588 : vector<2x1xf32>
    %cst_112 = arith.constant 8.000000e-02 : f32
    %590 = vector.broadcast %cst_112 : f32 to vector<2x1xf32>
    %591 = arith.addf %589, %590 : vector<2x1xf32>
    %c0_113 = arith.constant 0 : index
    %c0_114 = arith.constant 0 : index
    %592 = vector.load %arg16[%c0_113, %c0_114] : memref<2x1xf32, #tpu.memory_space<vmem>>, vector<2x1xf32>
    tpu.vector_store %arg16[%c0_113, %c0_114], %591 {strides = array<i32>} : memref<2x1xf32, #tpu.memory_space<vmem>>, vector<2x1xf32>,
    return
  }
}

</mosaic_0001>

<bundles_post_ra>
// kernel: tpu_custom_call.1
= control target key start
LH: loop header
LB: loop body
LE: loop exit
PB: predicated region body
PF: predicated region fallthrough
CT: control target
= control target key end

     0   :  { %s6435_s0 = inlined_call_operand.hbm [shape: f32[16,16], index: 0, kind: input, shape index: {}]   ;;  %s6436_s1 = inlined_call_operand.hbm [shape: f32[16,128], index: 1, kind: input, shape index: {}]   ;;  %s6437_s2 = inlined_call_operand.vmem [shape: f32[32,128], index: 2, kind: input, shape index: {}]   ;;  %s6438_s3 = inlined_call_operand.vmem [shape: f32[1,128], index: 3, kind: input, shape index: {}]   ;;  %s6439_s4 = inlined_call_operand.vmem [shape: f32[32,128], index: 4, kind: input, shape index: {}]   ;;  %s6440_s5 = inlined_call_operand.hbm [shape: f32[32,128], index: 5, kind: input, shape index: {}]   ;;  %s6441_s6 = inlined_call_operand.vmem [shape: f32[1,128], index: 6, kind: input, shape index: {}]   ;;  %s6442_s7 = inlined_call_operand.vmem [shape: f32[32,128], index: 7, kind: input, shape index: {}]   ;;  %s6443_s8 = inlined_call_operand.hbm [shape: f32[32,128], index: 8, kind: input, shape index: {}]   ;;  %s6444_s9 = inlined_call_operand.hbm [shape: f32[1,128], index: 9, kind: input, shape index: {}]   ;;  %s6445_s10 = inlined_call_operand.hbm [shape: f32[1,32], index: 10, kind: input, shape index: {}]   ;;  %s6446_s11 = inlined_call_operand.<no memory space> [shape: f32[1,1], index: 11, kind: input, shape index: {}]   ;;  %s6447_s12 = inlined_call_operand.vmem [shape: f32[32,16], index: 12, kind: input, shape index: {}]   ;;  %s6448_s13 = inlined_call_operand.vmem [shape: f32[1,16], index: 13, kind: input, shape index: {}]   ;;  %s6449_s14 = inlined_call_operand.vmem [shape: f32[16,1], index: 14, kind: input, shape index: {}]   ;;  %s6450_s15 = inlined_call_operand.<no memory space> [shape: f32[1,1], index: 15, kind: input, shape index: {}]   ;;  %s6451_s16 = inlined_call_operand.vmem [shape: f32[2,1], index: 16, kind: output, shape index: {}]  }
   0x1   :  { %6453 = sst [smem:[#allocation18_spill]] %s6435_s0  ;;  %v22_v0 = vstv %s6450_s15 }
   0x2   :  { %23 = vst [vmem:[#allocation3] sm:$0x1] %v22_v0 }
   0x3   :  { %24 = vsyncpa [#allocation5], 0 }
   0x4   :  { %25 = vsyncpa [#allocation7], 0 }
   0x5   :  { %26 = vsyncpa [#allocation10], 0 }
   0x6   :  { %27 = vsyncpa [#allocation13], 0  ;;  %s5577_s23 = smov [#allocation6]   ;;  %s5578_s25 = smov [#allocation9]  }
   0x7   :  { %s45_s24 = sshll.u32 %s5577_s23, 4  ;;  %s79_s26 = sshll.u32 %s5578_s25, 4  ;;  %s46_s24 = int_to_ptr.vmem [resolvable:$true] %s45_s24  ;;  %s5686_s26 = int_to_ptr.vmem [resolvable:$true] %s79_s26 }
   0x8   :  { %s5437_s29 = scalar_lea.hbm %s6436_s1, 256 }
   0x9   :  { %p5438_p0 = scmp.ne.s32.totalorder %s6436_s1, %s5437_s29  ;;  %p5441_p1 = scmp.lt.u32.totalorder %s5437_s29, %s6436_s1 }
   0xb   :  { %p5443_p2 = pnand %p5441_p1, %p5438_p0 }
   0xd   :  { %5446 = shalt.err (!%p5443_p2)
}
   0xe   :  { %s5447_s18 = scalar_lea.vmem %s46_s24, 256  ;;  %p5452_p4 = scmp.lt.s32.totalorder %s46_s24, %s46_s24 }
   0xf   :  { %p5448_p3 = scmp.ne.s32.totalorder %s46_s24, %s5447_s18  ;;  %p5453_p5 = scmp.lt.s32.totalorder %s5447_s18, %s5447_s18 }
  0x11   :  { %p5454_p6 = por %p5453_p5, %p5452_p4 }
  0x13   :  { %p5455_p7 = pnand %p5454_p6, %p5448_p3 }
  0x15   :  { %5458 = shalt.err (!%p5455_p7)
}
  0x16   :  { %s5579_s19 = smov 128   ;;  %s5580_s20 = smov 8  }
  0x17   :  { %51 = dma.hbm_to_vmem [thread:$0]  %s6436_s1, 256, %s46_s24, [#allocation7], %s5579_s19, %s5579_s19, %s5580_s20  }
  0x18   :  { %s5459_s27 = scalar_lea.hbm %s6443_s8, 512 }
  0x19   :  { %p5460_p8 = scmp.ne.s32.totalorder %s6443_s8, %s5459_s27  ;;  %p5463_p9 = scmp.lt.u32.totalorder %s5459_s27, %s6443_s8 }
  0x1b   :  { %p5465_p10 = pnand %p5463_p9, %p5460_p8 }
  0x1d   :  { %5468 = shalt.err (!%p5465_p10)
}
  0x1e   :  { %s5469_s15 = scalar_lea.vmem %s5686_s26, 512  ;;  %p5474_p12 = scmp.lt.s32.totalorder %s5686_s26, %s5686_s26 }
  0x1f   :  { %p5470_p11 = scmp.ne.s32.totalorder %s5686_s26, %s5469_s15  ;;  %p5475_p13 = scmp.lt.s32.totalorder %s5469_s15, %s5469_s15 }
  0x21   :  { %p5476_p0 = por %p5475_p13, %p5474_p12 }
  0x23   :  { %p5477_p1 = pnand %p5476_p0, %p5470_p11 }
  0x25   :  { %5480 = shalt.err (!%p5477_p1)
}
  0x26   :  { %85 = dma.hbm_to_vmem [thread:$0]  %s6443_s8, 512, %s5686_s26, [#allocation10], %s5579_s19, %s5579_s19, %s5580_s20  }
  0x27   :  { %s5581_s17 = smov [#allocation4]   ;;  %s5582_s21 = smov [#allocation8]  }
  0x28   :  { %s33_s18 = sshll.u32 %s5581_s17, 4  ;;  %s63_s22 = sshll.u32 %s5582_s21, 4  ;;  %s34_s18 = int_to_ptr.vmem [resolvable:$true] %s33_s18  ;;  %s5723_s22 = int_to_ptr.vmem [resolvable:$true] %s63_s22 }
  0x29   :  { %s6454_s27 = sld [smem:[#allocation18_spill]] }
  0x2f   :  { %s5481_s28 = scalar_lea.hbm %s6454_s27, 256 }
  0x30   :  { %p5482_p2 = scmp.ne.s32.totalorder %s6454_s27, %s5481_s28  ;;  %p5485_p3 = scmp.lt.u32.totalorder %s5481_s28, %s6454_s27 }
  0x32   :  { %p5487_p4 = pnand %p5485_p3, %p5482_p2 }
  0x34   :  { %5490 = shalt.err (!%p5487_p4)
}
  0x35   :  { %s5491_s8 = scalar_lea.vmem %s34_s18, 256  ;;  %p5496_p6 = scmp.lt.s32.totalorder %s34_s18, %s34_s18 }
  0x36   :  { %p5492_p5 = scmp.ne.s32.totalorder %s34_s18, %s5491_s8  ;;  %p5497_p7 = scmp.lt.s32.totalorder %s5491_s8, %s5491_s8 }
  0x38   :  { %p5498_p8 = por %p5497_p7, %p5496_p6 }
  0x3a   :  { %p5499_p9 = pnand %p5498_p8, %p5492_p5 }
  0x3c   :  { %5502 = shalt.err (!%p5499_p9)
}
  0x3d   :  { %39 = dma.hbm_to_vmem [thread:$0]  %s6454_s27, 256, %s34_s18, [#allocation5], %s5579_s19, %s5579_s19, %s5580_s20  }
  0x3e   :  { %s5503_s21 = scalar_lea.hbm %s6440_s5, 512 }
  0x3f   :  { %p5504_p10 = scmp.ne.s32.totalorder %s6440_s5, %s5503_s21  ;;  %p5507_p11 = scmp.lt.u32.totalorder %s5503_s21, %s6440_s5 }
  0x41   :  { %p5509_p12 = pnand %p5507_p11, %p5504_p10 }
  0x43   :  { %5512 = shalt.err (!%p5509_p12)
}
  0x44   :  { %s5513_s30 = scalar_lea.vmem %s5723_s22, 512  ;;  %p5518_p0 = scmp.lt.s32.totalorder %s5723_s22, %s5723_s22 }
  0x45   :  { %p5514_p13 = scmp.ne.s32.totalorder %s5723_s22, %s5513_s30  ;;  %p5519_p1 = scmp.lt.s32.totalorder %s5513_s30, %s5513_s30 }
  0x47   :  { %p5520_p2 = por %p5519_p1, %p5518_p0 }
  0x49   :  { %p5521_p3 = pnand %p5520_p2, %p5514_p13 }
  0x4b   :  { %5524 = shalt.err (!%p5521_p3)
}
  0x4c   :  { %69 = dma.hbm_to_vmem [thread:$0]  %s6440_s5, 512, %s5723_s22, [#allocation7], %s5579_s19, %s5579_s19, %s5580_s20  }
  0x4d   :  { %s5583_s0 = smov [#allocation11]   ;;  %s5584_s8 = smov [#allocation12]  }
  0x4e   :  { %s92_s15 = sshll.u32 %s5583_s0, 4  ;;  %s102_s26 = sshll.u32 %s5584_s8, 4  ;;  %s93_s15 = int_to_ptr.vmem [resolvable:$true] %s92_s15  ;;  %s103_s26 = int_to_ptr.vmem [resolvable:$true] %s102_s26 }
  0x4f   :  { %s5525_s17 = scalar_lea.hbm %s6444_s9, 16 }
  0x50   :  { %p5526_p4 = scmp.ne.s32.totalorder %s6444_s9, %s5525_s17  ;;  %p5529_p5 = scmp.lt.u32.totalorder %s5525_s17, %s6444_s9 }
  0x52   :  { %p5531_p6 = pnand %p5529_p5, %p5526_p4 }
  0x54   :  { %5534 = shalt.err (!%p5531_p6)
}
  0x55   :  { %s5535_s5 = scalar_lea.vmem %s93_s15, 16  ;;  %s5539_s19 = scalar_lea.vmem %s93_s15, 32 }
  0x56   :  { %p5536_p7 = scmp.ne.s32.totalorder %s93_s15, %s5535_s5  ;;  %p5540_p8 = scmp.lt.s32.totalorder %s93_s15, %s93_s15 }
  0x57   :  { %p5541_p9 = scmp.lt.s32.totalorder %s5539_s19, %s5535_s5 }
  0x59   :  { %p5542_p10 = por %p5541_p9, %p5540_p8 }
  0x5b   :  { %p5543_p11 = pnand %p5542_p10, %p5536_p7 }
  0x5d   :  { %5546 = shalt.err (!%p5543_p11)
}
  0x5e   :  { %95 = dma.hbm_to_vmem [thread:$0]  %s6444_s9, 16, %s93_s15, [#allocation10]  }
  0x5f   :  { %s5547_s18 = scalar_lea.hbm %s6445_s10, 16 }
  0x60   :  { %p5548_p12 = scmp.ne.s32.totalorder %s6445_s10, %s5547_s18  ;;  %p5551_p13 = scmp.lt.u32.totalorder %s5547_s18, %s6445_s10 }
  0x62   :  { %p5553_p0 = pnand %p5551_p13, %p5548_p12 }
  0x64   :  { %5556 = shalt.err (!%p5553_p0)
}
  0x65   :  { %s5557_s24 = scalar_lea.vmem %s103_s26, 16  ;;  %s5561_s17 = scalar_lea.vmem %s103_s26, 32 }
  0x66   :  { %p5558_p1 = scmp.ne.s32.totalorder %s103_s26, %s5557_s24  ;;  %p5562_p2 = scmp.lt.s32.totalorder %s103_s26, %s103_s26 }
  0x67   :  { %p5563_p3 = scmp.lt.s32.totalorder %s5561_s17, %s5557_s24 }
  0x69   :  { %p5564_p4 = por %p5563_p3, %p5562_p2 }
  0x6b   :  { %p5565_p5 = pnand %p5564_p4, %p5558_p1 }
  0x6d   :  { %5568 = shalt.err (!%p5565_p5)
}
  0x6e   :  { %105 = dma.hbm_to_vmem [thread:$0]  %s6445_s10, 16, %s103_s26, [#allocation13]  }
  0x6f   :  { %5569 = dma.done.wait [#allocation5], 256  }
  0x70   :  { %5570 = vsyncadd [#allocation5], 4294967040 }
  0x71   :  { %5571 = dma.done.wait [#allocation7], 768  }
  0x72   :  { %5572 = vsyncadd [#allocation7], 4294966528 }
  0x73   :  { %5573 = dma.done.wait [#allocation10], 528  }
  0x74   :  { %5574 = vsyncadd [#allocation10], 4294966768 }
  0x75   :  { %5575 = dma.done.wait [#allocation13], 16  }
  0x76   :  { %5576 = vsyncadd [#allocation13], 4294967280  ;;  %v5585_v1 = vmov 0.0|0.0   ;;  %vm5586_vm0 = vmmov 0   ;;  %v5587_v2 = vmov 0.0   ;;  %vm169_vm1 = vcmask 130048  }
  0x77   :  { %4908 = vmatprep.subr.bf16.mxu1 %v5585_v1  ;;  %4454 = vmatprep.mubr.msk.f32.mxu1 %vm5586_vm0, %v5587_v2  ;;  %v160_v3 = vld [vmem:[#allocation6] sm:$0xff]  ;;  %v161_v4 = vld [vmem:[#allocation6 + $0x8] sm:$0xff]  ;;  %v135_v7 = vld [vmem:[%s6437_s2 + $0x8] sm:$0xff]  ;;  %s5588_s22 = smov 32   ;;  %vm251_vm2 = vcmask 261120   ;;  %vm713_vm3 = vcmask 254976  }
  0x78   :  { %v134_v5 = vld [vmem:[%s6437_s2] sm:$0xff]  ;;  %v4904_v6 = vpack.c.bf16 %v161_v4, %v160_v3  ;;  %v136_v10 = vld [vmem:[%s6437_s2 + $0x10] sm:$0xff]  ;;  %v137_v11 = vld [vmem:[%s6437_s2 + $0x18] sm:$0xff]  ;;  %vm3893_vm4 = vcmask 7168   ;;  %vm3895_vm5 = vcmask 15360   ;;  %vm3897_vm6 = vcmask 23552  }
  0x79   :  { %v158_v8 = vld [vmem:[#allocation4] sm:$0xff]  ;;  %v5793_v9 = vpack.c.bf16 %v135_v7, %v134_v5  ;;  %v159_v12 = vld [vmem:[#allocation4 + $0x8] sm:$0xff]  ;;  %v5803_v13 = vpack.c.bf16 %v137_v11, %v136_v10  ;;  %v4155_v14 = vld [vmem:[%s6438_s3] ss:$0 sm:$0xff]  ;;  %vm3899_vm7 = vcmask 31744   ;;  %vm3901_vm8 = vcmask 39936  }
  0x7a   :  { %4443 = vmatprep.mubr.msk.f32.mxu0 %vm169_vm1, %v158_v8  ;;  %4905 = vmatprep.subr.bf16.mxu0 %v4904_v6  ;;  %v142_v32 = vld [vmem:[#allocation8] sm:$0xff]  ;;  %v143_v33 = vld [vmem:[#allocation8 + $0x8] sm:$0xff]  ;;  %v144_v34 = vld [vmem:[#allocation8 + $0x10] sm:$0xff]  ;;  %vm3903_vm9 = vcmask 48128   ;;  %vm3905_vm10 = vcmask 56320   ;;  %vm3907_vm11 = vcmask 58368  }
  0x7b   :  { %4910 = vmatpush3.bf16.msra.mxu1 %v5793_v9  ;;  %4907 = vmatpush3.bf16.msra.mxu0 %v4904_v6  ;;  %v5828_v35 = vpack.c.bf16 %v143_v33, %v142_v32  ;;  %v145_v36 = vld [vmem:[#allocation8 + $0x18] sm:$0xff]  ;;  %v139_v39 = vld [vmem:[%s6439_s4 + $0x8] sm:$0xff]  ;;  %v140_v41 = vld [vmem:[%s6439_s4 + $0x10] sm:$0xff]  ;;  %vm4145_vm12 = vcmask 1024  }
  0x7c   :  { %4911 = vmatprep.subr.bf16.mxu1 %v5585_v1  ;;  %4914 = vmatprep.subr.bf16.mxu0 %v5585_v1  ;;  %v5831_v37 = vpack.c.bf16 %v145_v36, %v144_v34  ;;  %v138_v38 = vld [vmem:[%s6439_s4] sm:$0xff]  ;;  %v141_v42 = vld [vmem:[%s6439_s4 + $0x18] sm:$0xff]  ;;  %s5589_s4 = smov 64  }
  0x7d   :  { %v5841_v40 = vpack.c.bf16 %v139_v39, %v138_v38  ;;  %v5853_v44 = vpack.c.bf16 %v141_v42, %v140_v41  ;;  %v5874_v48 = vld [vmem:[%s6441_s6] ss:$0 sm:$0xff] }
  0x7e   :  { %4444 = vmatmul.mubr.msk.f32.vlgmr.msra.gmra.mrb[0].mxu0 %vm169_vm1, %v159_v12 }
  0x7f   :  { %4913 = vmatpush3.bf16.msra.mxu1 %v5803_v13  ;;  %4465 = vmatprep.mubr.msk.f32.mxu0 %vm5586_vm0, %v5587_v2 }
  0x80   :  { %4920 = vmatprep.subr.bf16.mxu1 %v5585_v1  ;;  %4916 = vmatpush3.bf16.msra.mxu0 %v5828_v35 }
  0x81   :  { %4917 = vmatprep.subr.bf16.mxu0 %v5585_v1 }
  0x82   :  { %4455 = vmatmul.mubr.f32.vlgmr.msra.gmra.mrb[0].mxu1 %v5587_v2 }
  0x83   :  { %4476 = vmatprep.mubr.msk.f32.mxu1 %vm5586_vm0, %v5587_v2 }
  0x84   :  { %4919 = vmatpush3.bf16.msra.mxu0 %v5831_v37 }
  0x85   :  { %4926 = vmatprep.subr.bf16.mxu0 %v5585_v1 }
  0x87   :  { %4466 = vmatmul.mubr.f32.vlgmr.msra.gmra.mrb[2].mxu0 %v5587_v2 }
  0x88   :  { %4928 = vmatpush3.bf16.msra.mxu0 %v5841_v40  ;;  %4487 = vmatprep.mubr.msk.f32.mxu0 %vm5586_vm0, %v5587_v2 }
  0x89   :  { %4929 = vmatprep.subr.bf16.mxu0 %v5585_v1 }
  0x8c   :  { %4931 = vmatpush3.bf16.msra.mxu0 %v5853_v44 }
  0x8d   :  { %4938 = vmatprep.subr.bf16.mxu0 %v5585_v1 }
 0x151   :  { %v4445_v15 = vpop.f32.mrb[0].mxu0 }
 0x152   :  { %v5818_v16 = vadd.f32 %v4445_v15, %v4155_v14  ;;  %v242_v17 = vpop.f32.mrb[1].mxu0 }
 0x153   :  { %v5820_v18 = vadd.f32 %v4155_v14, %v242_v17 }
 0x155   :  { %v321_v19 = vpop.f32.mrb[0].mxu1 }
 0x156   :  { %v477_v20 = vadd.f32 %v321_v19, %v5820_v18  ;;  %v4456_v21 = vpop.f32.mrb[1].mxu1 }
 0x157   :  { %v152_v21 = vld [vmem:[#allocation9 + $0x8] sm:$0xff] }
 0x158   :  { %5235 = vtanh.f32 %v477_v20  ;;  %v4160_v23 = vmul.f32 -1.442695, %v477_v20  ;;  %v151_v20 = vld [vmem:[#allocation9] sm:$0xff] }
 0x15a   :  { %5237 = vpow2.f32 %v4160_v23  ;;  %v5890_v23 = vpack.c.bf16 %v152_v21, %v151_v20 }
 0x15c   :  { %4922 = vmatpush3.bf16.msra.mxu1 %v5890_v23 }
 0x15d   :  { %4923 = vmatprep.subr.bf16.mxu1 %v5585_v1 }
 0x162   :  { %v5236_v22 = vpop.eup %5235 }
 0x163   :  { %487 = vrot.lane.b32.xlu0 %v5236_v22, %s5588_s22  ;;  %v153_v22 = vld [vmem:[#allocation9 + $0x10] sm:$0xff] }
 0x164   :  { %v5238_v24 = vpop.eup %5237 }
 0x165   :  { %v481_v25 = vadd.f32 1.0, %v5238_v24  ;;  %v154_v24 = vld [vmem:[#allocation9 + $0x18] sm:$0xff] }
 0x167   :  { %5239 = vrcp.f32 %v481_v25  ;;  %v5893_v25 = vpack.c.bf16 %v154_v24, %v153_v22 }
 0x169   :  { %4925 = vmatpush3.bf16.msra.mxu1 %v5893_v25 }
 0x16a   :  { %4932 = vmatprep.subr.bf16.mxu1 %v5585_v1 }
 0x16c   :  { %4477 = vmatmul.mubr.f32.vlgmr.msra.gmra.mrb[2].mxu1 %v5587_v2 }
 0x16d   :  { %4498 = vmatprep.mubr.msk.f32.mxu1 %vm5586_vm0, %v5587_v2 }
 0x171   :  { %v5240_v26 = vpop.eup %5239 }
 0x172   :  { %v485_v29 = vmul.f32 0.0, %v5240_v26 }
 0x1d5   :  { %v488_v27 = vpop.permute.xlu0 %487 }
 0x1d6   :  { %v490_v28 = vmul.f32 %v5240_v26, %v488_v27  ;;  %v148_v27 = vld [vmem:[%s6442_s7 + $0x8] sm:$0xff] }
 0x1d8   :  { %492 = vrot.lane.b32.xlu0 %v490_v28, %s5588_s22 }
 0x24a   :  { %v493_v30 = vpop.permute.xlu0 %492 }
 0x24b   :  { %v5825_v31 = vadd.f32 %v493_v30, %v485_v29  ;;  %v149_v30 = vld [vmem:[%s6442_s7 + $0x10] sm:$0xff] }
 0x24d   :  { %5241 = vtanh.f32 %v5825_v31  ;;  %v946_v12 = vrot.slane %v5825_v31, 6  ;;  %v150_v31 = vld [vmem:[%s6442_s7 + $0x18] sm:$0xff] }
 0x24e   :  { %v5919_v32 = vpack.c.bf16 %v150_v31, %v149_v30 }
 0x257   :  { %v5242_v43 = vpop.eup %5241 }
 0x258   :  { %498 = vrot.lane.b32.xlu1 %v5242_v43, %s5588_s22  ;;  %v5956_v43 = vld [vmem:[#allocation11] ss:$0 sm:$0xff] }
 0x2ca   :  { %v499_v45 = vpop.permute.xlu1 %498 }
 0x2cb   :  { %v501_v46 = vmul.f32 %v5240_v26, %v499_v45  ;;  %v147_v26 = vld [vmem:[%s6442_s7] sm:$0xff] }
 0x2cc   :  { %v5905_v28 = vpack.c.bf16 %v148_v27, %v147_v26 }
 0x2cd   :  { %503 = vrot.lane.b32.xlu1 %v501_v46, %s5589_s4 }
 0x2ce   :  { %4934 = vmatpush3.bf16.msra.mxu1 %v5905_v28 }
 0x2cf   :  { %4935 = vmatprep.subr.bf16.mxu1 %v5585_v1 }
 0x2d2   :  { %4937 = vmatpush3.bf16.msra.mxu1 %v5919_v32 }
 0x2d3   :  { %4944 = vmatprep.subr.bf16.mxu1 %v5585_v1 }
 0x33f   :  { %v504_v47 = vpop.permute.xlu1 %503 }
 0x340   :  { %4488 = vmatmul.mubr.msk.f32.vlgmr.msra.gmra.mrb[2].mxu0 %vm251_vm2, %v504_v47 }
 0x341   :  { %4940 = vmatpush3.bf16.msra.mxu0 %v5793_v9  ;;  %4509 = vmatprep.mubr.msk.f32.mxu0 %vm5586_vm0, %v5587_v2 }
 0x342   :  { %4941 = vmatprep.subr.bf16.mxu0 %v5585_v1 }
 0x345   :  { %4943 = vmatpush3.bf16.msra.mxu0 %v5803_v13 }
 0x346   :  { %4950 = vmatprep.subr.bf16.mxu0 %v5585_v1 }
 0x348   :  { %4510 = vmatmul.mubr.msk.f32.vlgmr.msra.gmra.mrb[4].mxu0 %vm251_vm2, %v504_v47 }
 0x349   :  { %4531 = vmatprep.mubr.msk.f32.mxu0 %vm5586_vm0, %v5587_v2  ;;  %4952 = vmatpush3.bf16.msra.mxu0 %v5890_v23 }
 0x34a   :  { %4953 = vmatprep.subr.bf16.mxu0 %v5585_v1 }
 0x34d   :  { %4955 = vmatpush3.bf16.msra.mxu0 %v5893_v25 }
 0x34e   :  { %4962 = vmatprep.subr.bf16.mxu0 %v5585_v1 }
 0x413   :  { %v573_v49 = vpop.f32.mrb[2].mxu0 }
 0x414   :  { %v5157_v50 = vadd.f32 %v5874_v48, %v573_v49  ;;  %v4489_v51 = vpop.f32.mrb[3].mxu0 }
 0x416   :  { %5243 = vtanh.f32 %v5157_v50  ;;  %v4162_v58 = vmul.f32 -1.442695, %v5157_v50 }
 0x41b   :  { %v785_v52 = vpop.f32.mrb[4].mxu0 }
 0x41c   :  { %v935_v53 = vrot.slane %v785_v52, 6  ;;  %v4511_v54 = vpop.f32.mrb[5].mxu0 }
 0x41e   :  { %v937_v55 = vadd.f32 %v935_v53, %v5820_v18 }
 0x420   :  { %v5244_v56 = vpop.eup %5243  ;;  %5245 = vtanh.f32 %v937_v55  ;;  %v4169_v59 = vmul.f32 -1.442695, %v937_v55 }
 0x421   :  { %586 = vrot.lane.b32.xlu0 %v5244_v56, %s5588_s22  ;;  %5247 = vpow2.f32 %v4162_v58 }
 0x422   :  { %5249 = vpow2.f32 %v4169_v59 }
 0x42a   :  { %v5246_v57 = vpop.eup %5245 }
 0x42b   :  { %950 = vrot.lane.b32.xlu1 %v5246_v57, %s5588_s22  ;;  %v5248_v60 = vpop.eup %5247 }
 0x42c   :  { %v580_v61 = vadd.f32 1.0, %v5248_v60  ;;  %v5250_v62 = vpop.eup %5249 }
 0x42d   :  { %v941_v63 = vadd.f32 1.0, %v5250_v62 }
 0x42e   :  { %5251 = vrcp.f32 %v580_v61 }
 0x42f   :  { %5253 = vrcp.f32 %v941_v63 }
 0x438   :  { %v5252_v0 = vpop.eup %5251 }
 0x439   :  { %v5254_v5 = vpop.eup %5253  ;;  %v584_v8 = vmul.f32 0.0, %v5252_v0 }
 0x43a   :  { %v948_v14 = vmul.f32 %v5254_v5, %v946_v12 }
 0x493   :  { %v587_v3 = vpop.permute.xlu0 %586 }
 0x494   :  { %v589_v4 = vmul.f32 %v5252_v0, %v587_v3 }
 0x496   :  { %591 = vrot.lane.b32.xlu0 %v589_v4, %s5588_s22 }
 0x49d   :  { %v951_v6 = vpop.permute.xlu1 %950 }
 0x49e   :  { %v953_v7 = vmul.f32 %v5254_v5, %v951_v6 }
 0x4a0   :  { %955 = vrot.lane.b32.xlu1 %v953_v7, %s5588_s22 }
 0x508   :  { %v592_v10 = vpop.permute.xlu0 %591 }
 0x509   :  { %v5882_v11 = vadd.f32 %v592_v10, %v584_v8 }
 0x50b   :  { %5255 = vtanh.f32 %v5882_v11 }
 0x512   :  { %v956_v15 = vpop.permute.xlu1 %955 }
 0x513   :  { %v5886_v17 = vadd.f32 %v956_v15, %v948_v14 }
 0x515   :  { %v5256_v19 = vpop.eup %5255  ;;  %5257 = vtanh.f32 %v5886_v17  ;;  %v1400_v31 = vrot.slane %v5886_v17, 6 }
 0x516   :  { %597 = vrot.lane.b32.xlu0 %v5256_v19, %s5588_s22 }
 0x51f   :  { %v5258_v29 = vpop.eup %5257 }
 0x520   :  { %961 = vrot.lane.b32.xlu1 %v5258_v29, %s5588_s22 }
 0x588   :  { %v598_v33 = vpop.permute.xlu0 %597 }
 0x589   :  { %v600_v34 = vmul.f32 %v5252_v0, %v598_v33 }
 0x58b   :  { %602 = vrot.lane.b32.xlu0 %v600_v34, %s5589_s4 }
 0x592   :  { %v962_v36 = vpop.permute.xlu1 %961 }
 0x593   :  { %v964_v38 = vmul.f32 %v5254_v5, %v962_v36 }
 0x595   :  { %v966_v39 = vrot.slane %v964_v38, 2 }
 0x597   :  { %967 = vrot.lane.b32.xlu1 %v966_v39, %s5589_s4 }
 0x5fd   :  { %v603_v41 = vpop.permute.xlu0 %602 }
 0x5fe   :  { %4499 = vmatmul.mubr.msk.f32.vlgmr.msra.gmra.mrb[2].mxu1 %vm251_vm2, %v603_v41 }
 0x5ff   :  { %4946 = vmatpush3.bf16.msra.mxu1 %v5828_v35  ;;  %4520 = vmatprep.mubr.msk.f32.mxu1 %vm5586_vm0, %v5587_v2 }
 0x600   :  { %4947 = vmatprep.subr.bf16.mxu1 %v5585_v1 }
 0x603   :  { %4949 = vmatpush3.bf16.msra.mxu1 %v5831_v37 }
 0x604   :  { %4956 = vmatprep.subr.bf16.mxu1 %v5585_v1 }
 0x606   :  { %4521 = vmatmul.mubr.msk.f32.vlgmr.msra.gmra.mrb[4].mxu1 %vm251_vm2, %v603_v41 }
 0x607   :  { %4958 = vmatpush3.bf16.msra.mxu1 %v5841_v40  ;;  %4542 = vmatprep.mubr.msk.f32.mxu1 %vm5586_vm0, %v5587_v2 }
 0x608   :  { %4959 = vmatprep.subr.bf16.mxu1 %v5585_v1 }
 0x609   :  { %v968_v42 = vpop.permute.xlu1 %967 }
 0x60b   :  { %4961 = vmatpush3.bf16.msra.mxu1 %v5853_v44 }
 0x60c   :  { %4968 = vmatprep.subr.bf16.mxu1 %v5585_v1 }
 0x60e   :  { %4543 = vmatmul.mubr.msk.f32.vlgmr.msra.gmra.mrb[4].mxu1 %vm251_vm2, %v968_v42 }
 0x60f   :  { %4970 = vmatpush3.bf16.msra.mxu1 %v5793_v9  ;;  %4564 = vmatprep.mubr.msk.f32.mxu1 %vm5586_vm0, %v5587_v2 }
 0x610   :  { %4971 = vmatprep.subr.bf16.mxu1 %v5585_v1 }
 0x613   :  { %4973 = vmatpush3.bf16.msra.mxu1 %v5803_v13 }
 0x614   :  { %4980 = vmatprep.subr.bf16.mxu1 %v5585_v1 }
 0x616   :  { %4565 = vmatmul.mubr.msk.f32.vlgmr.msra.gmra.mrb[6].mxu1 %vm251_vm2, %v968_v42 }
 0x617   :  { %4982 = vmatpush3.bf16.msra.mxu1 %v5890_v23  ;;  %4586 = vmatprep.mubr.msk.f32.mxu1 %vm5586_vm0, %v5587_v2 }
 0x618   :  { %4983 = vmatprep.subr.bf16.mxu1 %v5585_v1 }
 0x61b   :  { %4985 = vmatpush3.bf16.msra.mxu1 %v5893_v25 }
 0x61c   :  { %4992 = vmatprep.subr.bf16.mxu1 %v5585_v1 }
 0x6d1   :  { %v672_v45 = vpop.f32.mrb[2].mxu1 }
 0x6d2   :  { %v5158_v46 = vadd.f32 %v5956_v43, %v672_v45  ;;  %v4500_v47 = vpop.f32.mrb[3].mxu1 }
 0x6d4   :  { %5259 = vtanh.f32 %v5158_v46  ;;  %v4164_v59 = vmul.f32 -1.442695, %v5158_v46 }
 0x6de   :  { %v5260_v49 = vpop.eup %5259 }
 0x6df   :  { %685 = vrot.lane.b32.xlu0 %v5260_v49, %s5588_s22 }
 0x6e1   :  { %v1037_v50 = vpop.f32.mrb[4].mxu1 }
 0x6e2   :  { %v5159_v51 = vadd.f32 %v5874_v48, %v1037_v50  ;;  %v4544_v52 = vpop.f32.mrb[5].mxu1 }
 0x6e4   :  { %5261 = vtanh.f32 %v5159_v51  ;;  %v4171_v61 = vmul.f32 -1.442695, %v5159_v51 }
 0x6e9   :  { %v1239_v53 = vpop.f32.mrb[6].mxu1 }
 0x6ea   :  { %v1389_v54 = vrot.slane %v1239_v53, 4  ;;  %v4566_v55 = vpop.f32.mrb[7].mxu1 }
 0x6ec   :  { %v1391_v56 = vadd.f32 %v1389_v54, %v5820_v18 }
 0x6ee   :  { %v5262_v57 = vpop.eup %5261  ;;  %5263 = vtanh.f32 %v1391_v56  ;;  %v4177_v63 = vmul.f32 -1.442695, %v1391_v56 }
 0x6ef   :  { %1050 = vrot.lane.b32.xlu1 %v5262_v57, %s5588_s22  ;;  %5265 = vpow2.f32 %v4164_v59 }
 0x6f0   :  { %5267 = vpow2.f32 %v4171_v61 }
 0x6f8   :  { %v5264_v58 = vpop.eup %5263 }
 0x6f9   :  { %1404 = vrot.lane.b32.xlu0 %v5264_v58, %s5588_s22  ;;  %v5266_v60 = vpop.eup %5265 }
 0x6fa   :  { %v679_v62 = vadd.f32 1.0, %v5266_v60  ;;  %v5268_v0 = vpop.eup %5267 }
 0x6fb   :  { %v1044_v6 = vadd.f32 1.0, %v5268_v0 }
 0x6fc   :  { %5269 = vrcp.f32 %v679_v62 }
 0x6fd   :  { %5271 = vpow2.f32 %v4177_v63 }
 0x6fe   :  { %5273 = vrcp.f32 %v1044_v6 }
 0x706   :  { %v5270_v3 = vpop.eup %5269 }
 0x707   :  { %v5272_v7 = vpop.eup %5271  ;;  %v683_v21 = vmul.f32 0.0, %v5270_v3 }
 0x708   :  { %v1395_v8 = vadd.f32 1.0, %v5272_v7  ;;  %v5274_v10 = vpop.eup %5273 }
 0x709   :  { %v1048_v27 = vmul.f32 %v5274_v10, %v5882_v11 }
 0x70a   :  { %5275 = vrcp.f32 %v1395_v8 }
 0x714   :  { %v5276_v15 = vpop.eup %5275 }
 0x715   :  { %v1402_v33 = vmul.f32 %v5276_v15, %v1400_v31 }
 0x751   :  { %v686_v4 = vpop.permute.xlu0 %685 }
 0x752   :  { %v688_v5 = vmul.f32 %v5270_v3, %v686_v4 }
 0x754   :  { %690 = vrot.lane.b32.xlu1 %v688_v5, %s5588_s22 }
 0x761   :  { %v1051_v12 = vpop.permute.xlu1 %1050 }
 0x762   :  { %v1053_v14 = vmul.f32 %v5274_v10, %v1051_v12 }
 0x764   :  { %1055 = vrot.lane.b32.xlu0 %v1053_v14, %s5588_s22 }
 0x76b   :  { %v1405_v19 = vpop.permute.xlu0 %1404 }
 0x76c   :  { %v1407_v20 = vmul.f32 %v5276_v15, %v1405_v19 }
 0x76e   :  { %1409 = vrot.lane.b32.xlu1 %v1407_v20, %s5588_s22 }
 0x7c6   :  { %v691_v22 = vpop.permute.xlu1 %690 }
 0x7c7   :  { %v5967_v24 = vadd.f32 %v691_v22, %v683_v21 }
 0x7c9   :  { %5277 = vtanh.f32 %v5967_v24 }
 0x7d3   :  { %v5278_v26 = vpop.eup %5277 }
 0x7d4   :  { %696 = vrot.lane.b32.xlu0 %v5278_v26, %s5588_s22 }
 0x7d6   :  { %v1056_v29 = vpop.permute.xlu0 %1055 }
 0x7d7   :  { %v5972_v30 = vadd.f32 %v1056_v29, %v1048_v27 }
 0x7d9   :  { %5279 = vtanh.f32 %v5972_v30 }
 0x7e0   :  { %v1410_v34 = vpop.permute.xlu1 %1409 }
 0x7e1   :  { %v5976_v36 = vadd.f32 %v1410_v34, %v1402_v33 }
 0x7e3   :  { %v5280_v38 = vpop.eup %5279  ;;  %5281 = vtanh.f32 %v5976_v36 }
 0x7e4   :  { %1061 = vrot.lane.b32.xlu1 %v5280_v38, %s5588_s22 }
 0x7ed   :  { %v5282_v39 = vpop.eup %5281 }
 0x7ee   :  { %1415 = vrot.lane.b32.xlu0 %v5282_v39, %s5588_s22 }
 0x846   :  { %v697_v11 = vpop.permute.xlu0 %696 }
 0x847   :  { %v5981_v41 = vmul.f32 %v5270_v3, %v697_v11 }
 0x849   :  { %860 = vrot.lane.b32.xlu1 %v5981_v41, %s5589_s4 }
 0x856   :  { %v1062_v42 = vpop.permute.xlu1 %1061 }
 0x857   :  { %v1064_v17 = vmul.f32 %v5274_v10, %v1062_v42 }
 0x859   :  { %1066 = vrot.lane.b32.xlu0 %v1064_v17, %s5589_s4  ;;  %v1854_v17 = vrot.slane %v5976_v36, 6 }
 0x860   :  { %v1416_v45 = vpop.permute.xlu0 %1415 }
 0x861   :  { %v1418_v46 = vmul.f32 %v5276_v15, %v1416_v45 }
 0x863   :  { %v1420_v47 = vrot.slane %v1418_v46, 4 }
 0x865   :  { %1421 = vrot.lane.b32.xlu1 %v1420_v47, %s5589_s4 }
 0x8bb   :  { %v861_v49 = vpop.permute.xlu1 %860 }
 0x8bc   :  { %4532 = vmatmul.mubr.msk.f32.vlgmr.msra.gmra.mrb[6].mxu0 %vm251_vm2, %v861_v49 }
 0x8bd   :  { %4964 = vmatpush3.bf16.msra.mxu0 %v5905_v28  ;;  %4553 = vmatprep.mubr.msk.f32.mxu0 %vm5586_vm0, %v5587_v2 }
 0x8be   :  { %4965 = vmatprep.subr.bf16.mxu0 %v5585_v1 }
 0x8c1   :  { %4967 = vmatpush3.bf16.msra.mxu0 %v5919_v32 }
 0x8c2   :  { %4974 = vmatprep.subr.bf16.mxu0 %v5585_v1 }
 0x8cb   :  { %v1067_v50 = vpop.permute.xlu0 %1066 }
 0x8cc   :  { %4554 = vmatmul.mubr.msk.f32.vlgmr.msra.gmra.mrb[6].mxu0 %vm251_vm2, %v1067_v50 }
 0x8cd   :  { %4976 = vmatpush3.bf16.msra.mxu0 %v5828_v35  ;;  %4575 = vmatprep.mubr.msk.f32.mxu0 %vm5586_vm0, %v5587_v2 }
 0x8ce   :  { %4977 = vmatprep.subr.bf16.mxu0 %v5585_v1 }
 0x8d1   :  { %4979 = vmatpush3.bf16.msra.mxu0 %v5831_v37 }
 0x8d2   :  { %4986 = vmatprep.subr.bf16.mxu0 %v5585_v1 }
 0x8d4   :  { %4576 = vmatmul.mubr.msk.f32.vlgmr.msra.gmra.mrb[8].mxu0 %vm251_vm2, %v1067_v50 }
 0x8d5   :  { %4988 = vmatpush3.bf16.msra.mxu0 %v5841_v40  ;;  %4597 = vmatprep.mubr.msk.f32.mxu0 %vm5586_vm0, %v5587_v2 }
 0x8d6   :  { %4989 = vmatprep.subr.bf16.mxu0 %v5585_v1 }
 0x8d7   :  { %v1422_v51 = vpop.permute.xlu1 %1421 }
 0x8d9   :  { %4991 = vmatpush3.bf16.msra.mxu0 %v5853_v44 }
 0x8da   :  { %4998 = vmatprep.subr.bf16.mxu0 %v5585_v1 }
 0x8dc   :  { %4598 = vmatmul.mubr.msk.f32.vlgmr.msra.gmra.mrb[8].mxu0 %vm251_vm2, %v1422_v51 }
 0x8dd   :  { %5000 = vmatpush3.bf16.msra.mxu0 %v5793_v9  ;;  %4619 = vmatprep.mubr.msk.f32.mxu0 %vm5586_vm0, %v5587_v2 }
 0x8de   :  { %5001 = vmatprep.subr.bf16.mxu0 %v5585_v1 }
 0x8e1   :  { %5003 = vmatpush3.bf16.msra.mxu0 %v5803_v13 }
 0x8e2   :  { %5010 = vmatprep.subr.bf16.mxu0 %v5585_v1 }
 0x8e4   :  { %4620 = vmatmul.mubr.msk.f32.vlgmr.msra.gmra.mrb[10].mxu0 %vm251_vm2, %v1422_v51 }
 0x8e5   :  { %5012 = vmatpush3.bf16.msra.mxu0 %v5890_v23  ;;  %4641 = vmatprep.mubr.msk.f32.mxu0 %vm5586_vm0, %v5587_v2 }
 0x8e6   :  { %5013 = vmatprep.subr.bf16.mxu0 %v5585_v1 }
 0x8e9   :  { %5015 = vmatpush3.bf16.msra.mxu0 %v5893_v25 }
 0x8ea   :  { %5022 = vmatprep.subr.bf16.mxu0 %v5585_v1 }
 0x99f   :  { %v1136_v52 = vpop.f32.mrb[6].mxu0 }
 0x9a0   :  { %v5160_v53 = vadd.f32 %v5956_v43, %v1136_v52  ;;  %v4555_v54 = vpop.f32.mrb[7].mxu0 }
 0x9a2   :  { %5283 = vtanh.f32 %v5160_v53  ;;  %v4173_v3 = vmul.f32 -1.442695, %v5160_v53 }
 0x9ac   :  { %v5284_v55 = vpop.eup %5283 }
 0x9ad   :  { %1149 = vrot.lane.b32.xlu0 %v5284_v55, %s5588_s22 }
 0x9af   :  { %v1491_v56 = vpop.f32.mrb[8].mxu0 }
 0x9b0   :  { %v5161_v57 = vadd.f32 %v5874_v48, %v1491_v56  ;;  %v4599_v58 = vpop.f32.mrb[9].mxu0 }
 0x9b2   :  { %5285 = vtanh.f32 %v5161_v57  ;;  %v4179_v5 = vmul.f32 -1.442695, %v5161_v57 }
 0x9b7   :  { %v1693_v59 = vpop.f32.mrb[10].mxu0 }
 0x9b8   :  { %v1843_v60 = vrot.slane %v1693_v59, 2  ;;  %v4621_v61 = vpop.f32.mrb[11].mxu0 }
 0x9ba   :  { %v1845_v62 = vadd.f32 %v1843_v60, %v5820_v18 }
 0x9bc   :  { %v5286_v63 = vpop.eup %5285  ;;  %5287 = vtanh.f32 %v1845_v62  ;;  %v4185_v7 = vmul.f32 -1.442695, %v1845_v62 }
 0x9bd   :  { %1504 = vrot.lane.b32.xlu1 %v5286_v63, %s5588_s22  ;;  %5289 = vpow2.f32 %v4173_v3 }
 0x9be   :  { %5291 = vpow2.f32 %v4179_v5 }
 0x9c6   :  { %v5288_v0 = vpop.eup %5287 }
 0x9c7   :  { %1858 = vrot.lane.b32.xlu0 %v5288_v0, %s5588_s22  ;;  %v5290_v4 = vpop.eup %5289 }
 0x9c8   :  { %v1143_v6 = vadd.f32 1.0, %v5290_v4  ;;  %v5292_v8 = vpop.eup %5291 }
 0x9c9   :  { %v1498_v14 = vadd.f32 1.0, %v5292_v8 }
 0x9ca   :  { %5293 = vrcp.f32 %v1143_v6 }
 0x9cb   :  { %5295 = vpow2.f32 %v4185_v7 }
 0x9cc   :  { %5297 = vrcp.f32 %v1498_v14 }
 0x9d4   :  { %v5294_v10 = vpop.eup %5293 }
 0x9d5   :  { %v5296_v15 = vpop.eup %5295  ;;  %v1147_v31 = vmul.f32 %v5294_v10, %v5967_v24 }
 0x9d6   :  { %v1849_v19 = vadd.f32 1.0, %v5296_v15  ;;  %v5298_v20 = vpop.eup %5297 }
 0x9d7   :  { %v1502_v39 = vmul.f32 %v5298_v20, %v5972_v30 }
 0x9d8   :  { %5299 = vrcp.f32 %v1849_v19 }
 0x9e2   :  { %v5300_v26 = vpop.eup %5299 }
 0x9e3   :  { %v1856_v45 = vmul.f32 %v5300_v26, %v1854_v17 }
 0xa1f   :  { %v1150_v12 = vpop.permute.xlu0 %1149 }
 0xa20   :  { %v1152_v18 = vmul.f32 %v5294_v10, %v1150_v12 }
 0xa22   :  { %1154 = vrot.lane.b32.xlu1 %v1152_v18, %s5588_s22 }
 0xa2f   :  { %v1505_v21 = vpop.permute.xlu1 %1504 }
 0xa30   :  { %v1507_v22 = vmul.f32 %v5298_v20, %v1505_v21 }
 0xa32   :  { %1509 = vrot.lane.b32.xlu0 %v1507_v22, %s5588_s22 }
 0xa39   :  { %v1859_v27 = vpop.permute.xlu0 %1858 }
 0xa3a   :  { %v1861_v29 = vmul.f32 %v5300_v26, %v1859_v27 }
 0xa3c   :  { %1863 = vrot.lane.b32.xlu1 %v1861_v29, %s5588_s22 }
 0xa94   :  { %v1155_v33 = vpop.permute.xlu1 %1154 }
 0xa95   :  { %v6032_v34 = vadd.f32 %v1155_v33, %v1147_v31 }
 0xa97   :  { %5301 = vtanh.f32 %v6032_v34 }
 0xaa1   :  { %v5302_v38 = vpop.eup %5301 }
 0xaa2   :  { %1160 = vrot.lane.b32.xlu0 %v5302_v38, %s5588_s22 }
 0xaa4   :  { %v1510_v11 = vpop.permute.xlu0 %1509 }
 0xaa5   :  { %v6037_v42 = vadd.f32 %v1510_v11, %v1502_v39 }
 0xaa7   :  { %5303 = vtanh.f32 %v6037_v42 }
 0xaae   :  { %v1864_v46 = vpop.permute.xlu1 %1863 }
 0xaaf   :  { %v6041_v24 = vadd.f32 %v1864_v46, %v1856_v45 }
 0xab1   :  { %v5304_v47 = vpop.eup %5303  ;;  %5305 = vtanh.f32 %v6041_v24 }
 0xab2   :  { %1515 = vrot.lane.b32.xlu1 %v5304_v47, %s5588_s22 }
 0xabb   :  { %v5306_v49 = vpop.eup %5305 }
 0xabc   :  { %1869 = vrot.lane.b32.xlu0 %v5306_v49, %s5588_s22 }
 0xb14   :  { %v1161_v30 = vpop.permute.xlu0 %1160 }
 0xb15   :  { %v6046_v50 = vmul.f32 %v5294_v10, %v1161_v30 }
 0xb17   :  { %1314 = vrot.lane.b32.xlu1 %v6046_v50, %s5589_s4 }
 0xb24   :  { %v1516_v51 = vpop.permute.xlu1 %1515 }
 0xb25   :  { %v1518_v36 = vmul.f32 %v5298_v20, %v1516_v51 }
 0xb27   :  { %1520 = vrot.lane.b32.xlu0 %v1518_v36, %s5589_s4  ;;  %v2305_v36 = vrot.slane %v6041_v24, 6 }
 0xb2e   :  { %v1870_v52 = vpop.permute.xlu0 %1869 }
 0xb2f   :  { %v1872_v53 = vmul.f32 %v5300_v26, %v1870_v52 }
 0xb31   :  { %v1874_v54 = vrot.slane %v1872_v53, 6 }
 0xb33   :  { %1875 = vrot.lane.b32.xlu1 %v1874_v54, %s5589_s4 }
 0xb89   :  { %v1315_v55 = vpop.permute.xlu1 %1314 }
 0xb8a   :  { %4587 = vmatmul.mubr.msk.f32.vlgmr.msra.gmra.mrb[8].mxu1 %vm251_vm2, %v1315_v55 }
 0xb8b   :  { %4994 = vmatpush3.bf16.msra.mxu1 %v5905_v28  ;;  %4608 = vmatprep.mubr.msk.f32.mxu1 %vm5586_vm0, %v5587_v2 }
 0xb8c   :  { %4995 = vmatprep.subr.bf16.mxu1 %v5585_v1 }
 0xb8f   :  { %4997 = vmatpush3.bf16.msra.mxu1 %v5919_v32 }
 0xb90   :  { %5004 = vmatprep.subr.bf16.mxu1 %v5585_v1 }
 0xb99   :  { %v1521_v56 = vpop.permute.xlu0 %1520 }
 0xb9a   :  { %4609 = vmatmul.mubr.msk.f32.vlgmr.msra.gmra.mrb[8].mxu1 %vm251_vm2, %v1521_v56 }
 0xb9b   :  { %5006 = vmatpush3.bf16.msra.mxu1 %v5828_v35  ;;  %4630 = vmatprep.mubr.msk.f32.mxu1 %vm5586_vm0, %v5587_v2 }
 0xb9c   :  { %5007 = vmatprep.subr.bf16.mxu1 %v5585_v1 }
 0xb9f   :  { %5009 = vmatpush3.bf16.msra.mxu1 %v5831_v37 }
 0xba0   :  { %5016 = vmatprep.subr.bf16.mxu1 %v5585_v1 }
 0xba2   :  { %4631 = vmatmul.mubr.msk.f32.vlgmr.msra.gmra.mrb[10].mxu1 %vm251_vm2, %v1521_v56 }
 0xba3   :  { %5018 = vmatpush3.bf16.msra.mxu1 %v5841_v40  ;;  %4652 = vmatprep.mubr.msk.f32.mxu1 %vm5586_vm0, %v5587_v2 }
 0xba4   :  { %5019 = vmatprep.subr.bf16.mxu1 %v5585_v1 }
 0xba5   :  { %v1876_v57 = vpop.permute.xlu1 %1875 }
 0xba7   :  { %5021 = vmatpush3.bf16.msra.mxu1 %v5853_v44 }
 0xba8   :  { %5028 = vmatprep.subr.bf16.mxu1 %v5585_v1 }
 0xbaa   :  { %4653 = vmatmul.mubr.msk.f32.vlgmr.msra.gmra.mrb[10].mxu1 %vm251_vm2, %v1876_v57 }
 0xbab   :  { %5030 = vmatpush3.bf16.msra.mxu1 %v5793_v9  ;;  %4674 = vmatprep.mubr.msk.f32.mxu1 %vm5586_vm0, %v5587_v2 }
 0xbac   :  { %5031 = vmatprep.subr.bf16.mxu1 %v5585_v1 }
 0xbaf   :  { %5033 = vmatpush3.bf16.msra.mxu1 %v5803_v13 }
 0xbb0   :  { %5040 = vmatprep.subr.bf16.mxu1 %v5585_v1 }
 0xbb2   :  { %4675 = vmatmul.mubr.msk.f32.vlgmr.msra.gmra.mrb[12].mxu1 %vm251_vm2, %v1876_v57 }
 0xbb3   :  { %5042 = vmatpush3.bf16.msra.mxu1 %v5890_v23  ;;  %4696 = vmatprep.mubr.msk.f32.mxu1 %vm5586_vm0, %v5587_v2 }
 0xbb4   :  { %5043 = vmatprep.subr.bf16.mxu1 %v5585_v1 }
 0xbb7   :  { %5045 = vmatpush3.bf16.msra.mxu1 %v5893_v25 }
 0xbb8   :  { %5052 = vmatprep.subr.bf16.mxu1 %v5585_v1 }
 0xc6d   :  { %v1590_v58 = vpop.f32.mrb[8].mxu1 }
 0xc6e   :  { %v5162_v59 = vadd.f32 %v5956_v43, %v1590_v58  ;;  %v4610_v60 = vpop.f32.mrb[9].mxu1 }
 0xc70   :  { %5307 = vtanh.f32 %v5162_v59  ;;  %v4181_v8 = vmul.f32 -1.442695, %v5162_v59 }
 0xc7a   :  { %v5308_v61 = vpop.eup %5307 }
 0xc7b   :  { %1603 = vrot.lane.b32.xlu0 %v5308_v61, %s5588_s22 }
 0xc7d   :  { %v1945_v62 = vpop.f32.mrb[10].mxu1 }
 0xc7e   :  { %v5163_v63 = vadd.f32 %v5874_v48, %v1945_v62  ;;  %v4654_v0 = vpop.f32.mrb[11].mxu1 }
 0xc80   :  { %5309 = vtanh.f32 %v5163_v63  ;;  %v4187_v12 = vmul.f32 -1.442695, %v5163_v63 }
 0xc85   :  { %v2147_v3 = vpop.f32.mrb[12].mxu1 }
 0xc86   :  { %v2296_v4 = vadd.f32 %v2147_v3, %v5818_v16  ;;  %v4676_v5 = vpop.f32.mrb[13].mxu1 }
 0xc88   :  { %5311 = vtanh.f32 %v2296_v4  ;;  %v4193_v14 = vmul.f32 -1.442695, %v2296_v4 }
 0xc89   :  { %5313 = vpow2.f32 %v4181_v8 }
 0xc8a   :  { %v5310_v6 = vpop.eup %5309  ;;  %5315 = vpow2.f32 %v4187_v12 }
 0xc8b   :  { %1958 = vrot.lane.b32.xlu1 %v5310_v6, %s5588_s22 }
 0xc92   :  { %v5312_v7 = vpop.eup %5311 }
 0xc93   :  { %2309 = vrot.lane.b32.xlu0 %v5312_v7, %s5588_s22  ;;  %v5314_v10 = vpop.eup %5313 }
 0xc94   :  { %v1597_v18 = vadd.f32 1.0, %v5314_v10  ;;  %v5316_v15 = vpop.eup %5315 }
 0xc95   :  { %v1952_v22 = vadd.f32 1.0, %v5316_v15 }
 0xc96   :  { %5317 = vrcp.f32 %v1597_v18 }
 0xc97   :  { %5319 = vpow2.f32 %v4193_v14 }
 0xc98   :  { %5321 = vrcp.f32 %v1952_v22 }
 0xca0   :  { %v5318_v19 = vpop.eup %5317 }
 0xca1   :  { %v5320_v26 = vpop.eup %5319  ;;  %v1601_v17 = vmul.f32 %v5318_v19, %v6032_v34 }
 0xca2   :  { %v2300_v27 = vadd.f32 1.0, %v5320_v26  ;;  %v5322_v29 = vpop.eup %5321 }
 0xca3   :  { %v1956_v49 = vmul.f32 %v5322_v29, %v6037_v42 }
 0xca4   :  { %5323 = vrcp.f32 %v2300_v27 }
 0xcae   :  { %v5324_v38 = vpop.eup %5323 }
 0xcaf   :  { %v2307_v52 = vmul.f32 %v5324_v38, %v2305_v36 }
 0xced   :  { %v1604_v20 = vpop.permute.xlu0 %1603 }
 0xcee   :  { %v1606_v21 = vmul.f32 %v5318_v19, %v1604_v20 }
 0xcf0   :  { %1608 = vrot.lane.b32.xlu1 %v1606_v21, %s5588_s22 }
 0xcfd   :  { %v1959_v31 = vpop.permute.xlu1 %1958 }
 0xcfe   :  { %v1961_v33 = vmul.f32 %v5322_v29, %v1959_v31 }
 0xd00   :  { %1963 = vrot.lane.b32.xlu0 %v1961_v33, %s5588_s22 }
 0xd05   :  { %v2310_v39 = vpop.permute.xlu0 %2309 }
 0xd06   :  { %v2312_v11 = vmul.f32 %v5324_v38, %v2310_v39 }
 0xd08   :  { %2314 = vrot.lane.b32.xlu1 %v2312_v11, %s5588_s22 }
 0xd62   :  { %v1609_v45 = vpop.permute.xlu1 %1608 }
 0xd63   :  { %v6097_v46 = vadd.f32 %v1609_v45, %v1601_v17 }
 0xd65   :  { %5325 = vtanh.f32 %v6097_v46 }
 0xd6f   :  { %v5326_v47 = vpop.eup %5325 }
 0xd70   :  { %1614 = vrot.lane.b32.xlu0 %v5326_v47, %s5588_s22 }
 0xd72   :  { %v1964_v30 = vpop.permute.xlu0 %1963 }
 0xd73   :  { %v6102_v51 = vadd.f32 %v1964_v30, %v1956_v49 }
 0xd75   :  { %5327 = vtanh.f32 %v6102_v51 }
 0xd7a   :  { %v2315_v53 = vpop.permute.xlu1 %2314 }
 0xd7b   :  { %v6106_v34 = vadd.f32 %v2315_v53, %v2307_v52 }
 0xd7d   :  { %5329 = vtanh.f32 %v6106_v34 }
 0xd7f   :  { %v5328_v54 = vpop.eup %5327 }
 0xd80   :  { %1969 = vrot.lane.b32.xlu1 %v5328_v54, %s5588_s22 }
 0xd87   :  { %v5330_v55 = vpop.eup %5329 }
 0xd88   :  { %2320 = vrot.lane.b32.xlu0 %v5330_v55, %s5588_s22 }
 0xde2   :  { %v1615_v42 = vpop.permute.xlu0 %1614 }
 0xde3   :  { %v6111_v56 = vmul.f32 %v5318_v19, %v1615_v42 }
 0xde5   :  { %1768 = vrot.lane.b32.xlu1 %v6111_v56, %s5589_s4 }
 0xdf2   :  { %v1970_v57 = vpop.permute.xlu1 %1969 }
 0xdf3   :  { %v1972_v24 = vmul.f32 %v5322_v29, %v1970_v57 }
 0xdf5   :  { %1974 = vrot.lane.b32.xlu0 %v1972_v24, %s5589_s4  ;;  %v2758_v24 = vrot.slane %v6106_v34, 6 }
 0xdfa   :  { %v2321_v58 = vpop.permute.xlu0 %2320 }
 0xdfb   :  { %v2323_v59 = vmul.f32 %v5324_v38, %v2321_v58 }
 0xdfd   :  { %2325 = vrot.lane.b32.xlu1 %v2323_v59, %s5589_s4 }
 0xe57   :  { %v1769_v60 = vpop.permute.xlu1 %1768 }
 0xe58   :  { %4642 = vmatmul.mubr.msk.f32.vlgmr.msra.gmra.mrb[12].mxu0 %vm251_vm2, %v1769_v60 }
 0xe59   :  { %5024 = vmatpush3.bf16.msra.mxu0 %v5905_v28  ;;  %4663 = vmatprep.mubr.msk.f32.mxu0 %vm5586_vm0, %v5587_v2 }
 0xe5a   :  { %5025 = vmatprep.subr.bf16.mxu0 %v5585_v1 }
 0xe5d   :  { %5027 = vmatpush3.bf16.msra.mxu0 %v5919_v32 }
 0xe5e   :  { %5034 = vmatprep.subr.bf16.mxu0 %v5585_v1 }
 0xe67   :  { %v1975_v61 = vpop.permute.xlu0 %1974 }
 0xe68   :  { %4664 = vmatmul.mubr.msk.f32.vlgmr.msra.gmra.mrb[12].mxu0 %vm251_vm2, %v1975_v61 }
 0xe69   :  { %5036 = vmatpush3.bf16.msra.mxu0 %v5828_v35  ;;  %4685 = vmatprep.mubr.msk.f32.mxu0 %vm5586_vm0, %v5587_v2 }
 0xe6a   :  { %5037 = vmatprep.subr.bf16.mxu0 %v5585_v1 }
 0xe6d   :  { %5039 = vmatpush3.bf16.msra.mxu0 %v5831_v37 }
 0xe6e   :  { %5046 = vmatprep.subr.bf16.mxu0 %v5585_v1 }
 0xe6f   :  { %v2326_v62 = vpop.permute.xlu1 %2325 }
 0xe70   :  { %4686 = vmatmul.mubr.msk.f32.vlgmr.msra.gmra.mrb[14].mxu0 %vm251_vm2, %v1975_v61 }
 0xe71   :  { %5048 = vmatpush3.bf16.msra.mxu0 %v5841_v40  ;;  %4707 = vmatprep.mubr.msk.f32.mxu0 %vm5586_vm0, %v5587_v2 }
 0xe72   :  { %5049 = vmatprep.subr.bf16.mxu0 %v5585_v1 }
 0xe75   :  { %5051 = vmatpush3.bf16.msra.mxu0 %v5853_v44 }
 0xe76   :  { %5058 = vmatprep.subr.bf16.mxu0 %v5585_v1 }
 0xe78   :  { %4708 = vmatmul.mubr.msk.f32.vlgmr.msra.gmra.mrb[14].mxu0 %vm251_vm2, %v2326_v62 }
 0xe79   :  { %5060 = vmatpush3.bf16.msra.mxu0 %v5793_v9  ;;  %4729 = vmatprep.mubr.msk.f32.mxu0 %vm5586_vm0, %v5587_v2 }
 0xe7a   :  { %5061 = vmatprep.subr.bf16.mxu0 %v5585_v1 }
 0xe7d   :  { %5063 = vmatpush3.bf16.msra.mxu0 %v5803_v13 }
 0xe7e   :  { %5070 = vmatprep.subr.bf16.mxu0 %v5585_v1 }
 0xe80   :  { %4730 = vmatmul.mubr.msk.f32.vlgmr.msra.gmra.mrb[16].mxu0 %vm251_vm2, %v2326_v62 }
 0xe81   :  { %5072 = vmatpush3.bf16.msra.mxu0 %v5890_v23  ;;  %4751 = vmatprep.mubr.msk.f32.mxu0 %vm5586_vm0, %v5587_v2 }
 0xe82   :  { %5073 = vmatprep.subr.bf16.mxu0 %v5585_v1 }
 0xe85   :  { %5075 = vmatpush3.bf16.msra.mxu0 %v5893_v25 }
 0xe86   :  { %5082 = vmatprep.subr.bf16.mxu0 %v5585_v1 }
 0xf3b   :  { %v2044_v63 = vpop.f32.mrb[12].mxu0 }
 0xf3c   :  { %v5164_v0 = vadd.f32 %v5956_v43, %v2044_v63  ;;  %v4665_v3 = vpop.f32.mrb[13].mxu0 }
 0xf3e   :  { %5331 = vtanh.f32 %v5164_v0  ;;  %v4189_v19 = vmul.f32 -1.442695, %v5164_v0 }
 0xf48   :  { %v5332_v4 = vpop.eup %5331 }
 0xf49   :  { %2057 = vrot.lane.b32.xlu0 %v5332_v4, %s5588_s22 }
 0xf4b   :  { %v2395_v5 = vpop.f32.mrb[14].mxu0 }
 0xf4c   :  { %v5165_v6 = vadd.f32 %v5874_v48, %v2395_v5  ;;  %v4709_v7 = vpop.f32.mrb[15].mxu0 }
 0xf4e   :  { %5333 = vtanh.f32 %v5165_v6  ;;  %v4195_v21 = vmul.f32 -1.442695, %v5165_v6 }
 0xf53   :  { %v2597_v8 = vpop.f32.mrb[16].mxu0 }
 0xf54   :  { %v2747_v10 = vrot.slane %v2597_v8, 6  ;;  %v4731_v12 = vpop.f32.mrb[17].mxu0 }
 0xf56   :  { %v2749_v18 = vadd.f32 %v2747_v10, %v5818_v16 }
 0xf58   :  { %v5334_v14 = vpop.eup %5333  ;;  %5335 = vtanh.f32 %v2749_v18  ;;  %v4201_v48 = vmul.f32 -1.442695, %v2749_v18 }
 0xf59   :  { %2408 = vrot.lane.b32.xlu1 %v5334_v14, %s5588_s22  ;;  %5337 = vpow2.f32 %v4189_v19 }
 0xf5a   :  { %5339 = vpow2.f32 %v4195_v21 }
 0xf62   :  { %v5336_v15 = vpop.eup %5335 }
 0xf63   :  { %2762 = vrot.lane.b32.xlu0 %v5336_v15, %s5588_s22  ;;  %v5338_v20 = vpop.eup %5337  ;;  %v6222_v15 = vld [vmem:[%s6441_s6] ss:$0 sm:$0xff] }
 0xf64   :  { %v2051_v22 = vadd.f32 1.0, %v5338_v20  ;;  %v5340_v26 = vpop.eup %5339 }
 0xf65   :  { %v2402_v33 = vadd.f32 1.0, %v5340_v26 }
 0xf66   :  { %5341 = vrcp.f32 %v2051_v22 }
 0xf67   :  { %5343 = vpow2.f32 %v4201_v48 }
 0xf68   :  { %5345 = vrcp.f32 %v2402_v33 }
 0xf70   :  { %v5342_v27 = vpop.eup %5341 }
 0xf71   :  { %v5344_v38 = vpop.eup %5343  ;;  %v2055_v36 = vmul.f32 %v5342_v27, %v6097_v46 }
 0xf72   :  { %v2753_v39 = vadd.f32 1.0, %v5344_v38  ;;  %v5346_v11 = vpop.eup %5345 }
 0xf73   :  { %v2406_v55 = vmul.f32 %v5346_v11, %v6102_v51 }
 0xf74   :  { %5347 = vrcp.f32 %v2753_v39 }
 0xf7e   :  { %v5348_v47 = vpop.eup %5347 }
 0xf7f   :  { %v2760_v58 = vmul.f32 %v5348_v47, %v2758_v24 }
 0xfbb   :  { %v2058_v29 = vpop.permute.xlu0 %2057 }
 0xfbc   :  { %v2060_v31 = vmul.f32 %v5342_v27, %v2058_v29 }
 0xfbe   :  { %2062 = vrot.lane.b32.xlu1 %v2060_v31, %s5588_s22 }
 0xfcb   :  { %v2409_v17 = vpop.permute.xlu1 %2408 }
 0xfcc   :  { %v2411_v45 = vmul.f32 %v5346_v11, %v2409_v17 }
 0xfce   :  { %2413 = vrot.lane.b32.xlu0 %v2411_v45, %s5588_s22 }
 0xfd5   :  { %v2763_v49 = vpop.permute.xlu0 %2762 }
 0xfd6   :  { %v2765_v30 = vmul.f32 %v5348_v47, %v2763_v49 }
 0xfd8   :  { %2767 = vrot.lane.b32.xlu1 %v2765_v30, %s5588_s22 }
0x1030   :  { %v2063_v52 = vpop.permute.xlu1 %2062 }
0x1031   :  { %v6162_v53 = vadd.f32 %v2063_v52, %v2055_v36 }
0x1033   :  { %5349 = vtanh.f32 %v6162_v53 }
0x103d   :  { %v5350_v54 = vpop.eup %5349 }
0x103e   :  { %2068 = vrot.lane.b32.xlu0 %v5350_v54, %s5588_s22 }
0x1040   :  { %v2414_v42 = vpop.permute.xlu0 %2413 }
0x1041   :  { %v6167_v57 = vadd.f32 %v2414_v42, %v2406_v55 }
0x1043   :  { %5351 = vtanh.f32 %v6167_v57 }
0x104a   :  { %v2768_v59 = vpop.permute.xlu1 %2767 }
0x104b   :  { %v6171_v46 = vadd.f32 %v2768_v59, %v2760_v58 }
0x104d   :  { %v5352_v60 = vpop.eup %5351  ;;  %5353 = vtanh.f32 %v6171_v46 }
0x104e   :  { %2419 = vrot.lane.b32.xlu1 %v5352_v60, %s5588_s22 }
0x1057   :  { %v5354_v61 = vpop.eup %5353 }
0x1058   :  { %2773 = vrot.lane.b32.xlu0 %v5354_v61, %s5588_s22 }
0x10b0   :  { %v2069_v51 = vpop.permute.xlu0 %2068 }
0x10b1   :  { %v6176_v62 = vmul.f32 %v5342_v27, %v2069_v51 }
0x10b3   :  { %2222 = vrot.lane.b32.xlu1 %v6176_v62, %s5589_s4 }
0x10c0   :  { %v2420_v63 = vpop.permute.xlu1 %2419 }
0x10c1   :  { %v2422_v34 = vmul.f32 %v5346_v11, %v2420_v63 }
0x10c3   :  { %2424 = vrot.lane.b32.xlu0 %v2422_v34, %s5589_s4 }
0x10ca   :  { %v2774_v0 = vpop.permute.xlu0 %2773 }
0x10cb   :  { %v2776_v3 = vmul.f32 %v5348_v47, %v2774_v0 }
0x10cd   :  { %v2778_v4 = vrot.slane %v2776_v3, 2  ;;  %v3212_v3 = vrot.slane %v6171_v46, 6 }
0x10cf   :  { %2779 = vrot.lane.b32.xlu1 %v2778_v4, %s5589_s4 }
0x1125   :  { %v2223_v5 = vpop.permute.xlu1 %2222 }
0x1126   :  { %4697 = vmatmul.mubr.msk.f32.vlgmr.msra.gmra.mrb[14].mxu1 %vm251_vm2, %v2223_v5 }
0x1127   :  { %5054 = vmatpush3.bf16.msra.mxu1 %v5905_v28  ;;  %4718 = vmatprep.mubr.msk.f32.mxu1 %vm5586_vm0, %v5587_v2 }
0x1128   :  { %5055 = vmatprep.subr.bf16.mxu1 %v5585_v1 }
0x112b   :  { %5057 = vmatpush3.bf16.msra.mxu1 %v5919_v32 }
0x112c   :  { %5064 = vmatprep.subr.bf16.mxu1 %v5585_v1 }
0x1135   :  { %v2425_v6 = vpop.permute.xlu0 %2424 }
0x1136   :  { %4719 = vmatmul.mubr.msk.f32.vlgmr.msra.gmra.mrb[14].mxu1 %vm251_vm2, %v2425_v6 }
0x1137   :  { %5066 = vmatpush3.bf16.msra.mxu1 %v5828_v35  ;;  %4740 = vmatprep.mubr.msk.f32.mxu1 %vm5586_vm0, %v5587_v2 }
0x1138   :  { %5067 = vmatprep.subr.bf16.mxu1 %v5585_v1 }
0x113b   :  { %5069 = vmatpush3.bf16.msra.mxu1 %v5831_v37 }
0x113c   :  { %5076 = vmatprep.subr.bf16.mxu1 %v5585_v1 }
0x113e   :  { %4741 = vmatmul.mubr.msk.f32.vlgmr.msra.gmra.mrb[16].mxu1 %vm251_vm2, %v2425_v6 }
0x113f   :  { %5078 = vmatpush3.bf16.msra.mxu1 %v5841_v40  ;;  %4762 = vmatprep.mubr.msk.f32.mxu1 %vm5586_vm0, %v5587_v2 }
0x1140   :  { %5079 = vmatprep.subr.bf16.mxu1 %v5585_v1 }
0x1141   :  { %v2780_v7 = vpop.permute.xlu1 %2779 }
0x1143   :  { %5081 = vmatpush3.bf16.msra.mxu1 %v5853_v44 }
0x1144   :  { %5088 = vmatprep.subr.bf16.mxu1 %v5585_v1 }
0x1146   :  { %4763 = vmatmul.mubr.msk.f32.vlgmr.msra.gmra.mrb[16].mxu1 %vm251_vm2, %v2780_v7 }
0x1147   :  { %5090 = vmatpush3.bf16.msra.mxu1 %v5793_v9  ;;  %4784 = vmatprep.mubr.msk.f32.mxu1 %vm5586_vm0, %v5587_v2 }
0x1148   :  { %5091 = vmatprep.subr.bf16.mxu1 %v5585_v1 }
0x114b   :  { %5093 = vmatpush3.bf16.msra.mxu1 %v5803_v13 }
0x114c   :  { %5100 = vmatprep.subr.bf16.mxu1 %v5585_v1 }
0x114e   :  { %4785 = vmatmul.mubr.msk.f32.vlgmr.msra.gmra.mrb[18].mxu1 %vm251_vm2, %v2780_v7 }
0x114f   :  { %5102 = vmatpush3.bf16.msra.mxu1 %v5890_v23  ;;  %4806 = vmatprep.mubr.msk.f32.mxu1 %vm5586_vm0, %v5587_v2 }
0x1150   :  { %5103 = vmatprep.subr.bf16.mxu1 %v5585_v1 }
0x1153   :  { %5105 = vmatpush3.bf16.msra.mxu1 %v5893_v25 }
0x1154   :  { %5112 = vmatprep.subr.bf16.mxu1 %v5585_v1 }
0x1209   :  { %v2494_v8 = vpop.f32.mrb[14].mxu1 }
0x120a   :  { %v5166_v10 = vadd.f32 %v5956_v43, %v2494_v8  ;;  %v4720_v12 = vpop.f32.mrb[15].mxu1 }
0x120c   :  { %5355 = vtanh.f32 %v5166_v10  ;;  %v4197_v29 = vmul.f32 -1.442695, %v5166_v10 }
0x1216   :  { %v5356_v18 = vpop.eup %5355 }
0x1217   :  { %2507 = vrot.lane.b32.xlu0 %v5356_v18, %s5588_s22 }
0x1219   :  { %v2849_v14 = vpop.f32.mrb[16].mxu1 }
0x121a   :  { %v5167_v19 = vadd.f32 %v6222_v15, %v2849_v14  ;;  %v4764_v20 = vpop.f32.mrb[17].mxu1 }
0x121c   :  { %5357 = vtanh.f32 %v5167_v19  ;;  %v4203_v33 = vmul.f32 -1.442695, %v5167_v19 }
0x1221   :  { %v3051_v21 = vpop.f32.mrb[18].mxu1 }
0x1222   :  { %v3201_v22 = vrot.slane %v3051_v21, 4  ;;  %v4786_v48 = vpop.f32.mrb[19].mxu1 }
0x1224   :  { %v3203_v43 = vadd.f32 %v3201_v22, %v5818_v16  ;;  %v6287_v22 = vld [vmem:[#allocation11] ss:$0 sm:$0xff] }
0x1226   :  { %v5358_v26 = vpop.eup %5357  ;;  %5359 = vtanh.f32 %v3203_v43  ;;  %v4209_v39 = vmul.f32 -1.442695, %v3203_v43 }
0x1227   :  { %2862 = vrot.lane.b32.xlu1 %v5358_v26, %s5588_s22  ;;  %5361 = vpow2.f32 %v4197_v29 }
0x1228   :  { %5363 = vpow2.f32 %v4203_v33 }
0x1230   :  { %v5360_v27 = vpop.eup %5359 }
0x1231   :  { %3216 = vrot.lane.b32.xlu0 %v5360_v27, %s5588_s22  ;;  %v5362_v31 = vpop.eup %5361 }
0x1232   :  { %v2501_v38 = vadd.f32 1.0, %v5362_v31  ;;  %v5364_v11 = vpop.eup %5363 }
0x1233   :  { %v2856_v49 = vadd.f32 1.0, %v5364_v11 }
0x1234   :  { %5365 = vrcp.f32 %v2501_v38 }
0x1235   :  { %5367 = vpow2.f32 %v4209_v39 }
0x1236   :  { %5369 = vrcp.f32 %v2856_v49 }
0x123e   :  { %v5366_v17 = vpop.eup %5365 }
0x123f   :  { %v5368_v30 = vpop.eup %5367  ;;  %v2505_v59 = vmul.f32 %v5366_v17, %v6162_v53 }
0x1240   :  { %v3207_v36 = vadd.f32 1.0, %v5368_v30  ;;  %v5370_v52 = vpop.eup %5369 }
0x1241   :  { %v2860_v63 = vmul.f32 %v5370_v52, %v6167_v57 }
0x1242   :  { %5371 = vrcp.f32 %v3207_v36 }
0x124c   :  { %v5372_v42 = vpop.eup %5371 }
0x124d   :  { %v3214_v4 = vmul.f32 %v5372_v42, %v3212_v3 }
0x1289   :  { %v2508_v45 = vpop.permute.xlu0 %2507 }
0x128a   :  { %v2510_v47 = vmul.f32 %v5366_v17, %v2508_v45 }
0x128c   :  { %2512 = vrot.lane.b32.xlu1 %v2510_v47, %s5588_s22 }
0x1299   :  { %v2863_v54 = vpop.permute.xlu1 %2862 }
0x129a   :  { %v2865_v55 = vmul.f32 %v5370_v52, %v2863_v54 }
0x129c   :  { %2867 = vrot.lane.b32.xlu0 %v2865_v55, %s5588_s22 }
0x12a3   :  { %v3217_v24 = vpop.permute.xlu0 %3216 }
0x12a4   :  { %v3219_v58 = vmul.f32 %v5372_v42, %v3217_v24 }
0x12a6   :  { %3221 = vrot.lane.b32.xlu1 %v3219_v58, %s5588_s22 }
0x12fe   :  { %v2513_v60 = vpop.permute.xlu1 %2512 }
0x12ff   :  { %v6232_v61 = vadd.f32 %v2513_v60, %v2505_v59 }
0x1301   :  { %5373 = vtanh.f32 %v6232_v61 }
0x130b   :  { %v5374_v51 = vpop.eup %5373 }
0x130c   :  { %2518 = vrot.lane.b32.xlu0 %v5374_v51, %s5588_s22 }
0x130e   :  { %v2868_v34 = vpop.permute.xlu0 %2867 }
0x130f   :  { %v6237_v0 = vadd.f32 %v2868_v34, %v2860_v63 }
0x1311   :  { %5375 = vtanh.f32 %v6237_v0 }
0x1318   :  { %v3222_v5 = vpop.permute.xlu1 %3221 }
0x1319   :  { %v6241_v53 = vadd.f32 %v3222_v5, %v3214_v4 }
0x131b   :  { %v5376_v6 = vpop.eup %5375  ;;  %5377 = vtanh.f32 %v6241_v53 }
0x131c   :  { %2873 = vrot.lane.b32.xlu1 %v5376_v6, %s5588_s22 }
0x1325   :  { %v5378_v7 = vpop.eup %5377 }
0x1326   :  { %3227 = vrot.lane.b32.xlu0 %v5378_v7, %s5588_s22 }
0x137e   :  { %v2519_v57 = vpop.permute.xlu0 %2518 }
0x137f   :  { %v6246_v8 = vmul.f32 %v5366_v17, %v2519_v57 }
0x1381   :  { %2672 = vrot.lane.b32.xlu1 %v6246_v8, %s5589_s4 }
0x138e   :  { %v2874_v10 = vpop.permute.xlu1 %2873 }
0x138f   :  { %v2876_v46 = vmul.f32 %v5370_v52, %v2874_v10  ;;  %v3666_v10 = vrot.slane %v6241_v53, 6 }
0x1391   :  { %2878 = vrot.lane.b32.xlu0 %v2876_v46, %s5589_s4 }
0x1398   :  { %v3228_v12 = vpop.permute.xlu0 %3227 }
0x1399   :  { %v3230_v18 = vmul.f32 %v5372_v42, %v3228_v12 }
0x139b   :  { %v3232_v14 = vrot.slane %v3230_v18, 4 }
0x139d   :  { %3233 = vrot.lane.b32.xlu1 %v3232_v14, %s5589_s4 }
0x13f3   :  { %v2673_v19 = vpop.permute.xlu1 %2672 }
0x13f4   :  { %4752 = vmatmul.mubr.msk.f32.vlgmr.msra.gmra.mrb[18].mxu0 %vm251_vm2, %v2673_v19 }
0x13f5   :  { %5084 = vmatpush3.bf16.msra.mxu0 %v5905_v28  ;;  %4773 = vmatprep.mubr.msk.f32.mxu0 %vm5586_vm0, %v5587_v2 }
0x13f6   :  { %5085 = vmatprep.subr.bf16.mxu0 %v5585_v1 }
0x13f9   :  { %5087 = vmatpush3.bf16.msra.mxu0 %v5919_v32 }
0x13fa   :  { %5094 = vmatprep.subr.bf16.mxu0 %v5585_v1 }
0x1403   :  { %v2879_v20 = vpop.permute.xlu0 %2878 }
0x1404   :  { %4774 = vmatmul.mubr.msk.f32.vlgmr.msra.gmra.mrb[18].mxu0 %vm251_vm2, %v2879_v20 }
0x1405   :  { %5096 = vmatpush3.bf16.msra.mxu0 %v5828_v35  ;;  %4795 = vmatprep.mubr.msk.f32.mxu0 %vm5586_vm0, %v5587_v2 }
0x1406   :  { %5097 = vmatprep.subr.bf16.mxu0 %v5585_v1 }
0x1409   :  { %5099 = vmatpush3.bf16.msra.mxu0 %v5831_v37 }
0x140a   :  { %5106 = vmatprep.subr.bf16.mxu0 %v5585_v1 }
0x140c   :  { %4796 = vmatmul.mubr.msk.f32.vlgmr.msra.gmra.mrb[20].mxu0 %vm251_vm2, %v2879_v20 }
0x140d   :  { %5108 = vmatpush3.bf16.msra.mxu0 %v5841_v40  ;;  %4817 = vmatprep.mubr.msk.f32.mxu0 %vm5586_vm0, %v5587_v2 }
0x140e   :  { %5109 = vmatprep.subr.bf16.mxu0 %v5585_v1 }
0x140f   :  { %v3234_v21 = vpop.permute.xlu1 %3233 }
0x1411   :  { %5111 = vmatpush3.bf16.msra.mxu0 %v5853_v44 }
0x1412   :  { %5118 = vmatprep.subr.bf16.mxu0 %v5585_v1 }
0x1414   :  { %4818 = vmatmul.mubr.msk.f32.vlgmr.msra.gmra.mrb[20].mxu0 %vm251_vm2, %v3234_v21 }
0x1415   :  { %5120 = vmatpush3.bf16.msra.mxu0 %v5793_v9  ;;  %4839 = vmatprep.mubr.msk.f32.mxu0 %vm5586_vm0, %v5587_v2 }
0x1416   :  { %5121 = vmatprep.subr.bf16.mxu0 %v5585_v1 }
0x1419   :  { %5123 = vmatpush3.bf16.msra.mxu0 %v5803_v13 }
0x141a   :  { %5130 = vmatprep.subr.bf16.mxu0 %v5585_v1 }
0x141c   :  { %4840 = vmatmul.mubr.msk.f32.vlgmr.msra.gmra.mrb[22].mxu0 %vm251_vm2, %v3234_v21 }
0x141d   :  { %5132 = vmatpush3.bf16.msra.mxu0 %v5890_v23  ;;  %4861 = vmatprep.mubr.msk.f32.mxu0 %vm5586_vm0, %v5587_v2 }
0x141e   :  { %5133 = vmatprep.subr.bf16.mxu0 %v5585_v1 }
0x1421   :  { %5135 = vmatpush3.bf16.msra.mxu0 %v5893_v25 }
0x1422   :  { %5142 = vmatprep.subr.bf16.mxu0 %v5585_v1 }
0x14d7   :  { %v2948_v9 = vpop.f32.mrb[18].mxu0 }
0x14d8   :  { %v5168_v13 = vadd.f32 %v6287_v22, %v2948_v9  ;;  %v4775_v48 = vpop.f32.mrb[19].mxu0 }
0x14da   :  { %5379 = vtanh.f32 %v5168_v13  ;;  %v4205_v11 = vmul.f32 -1.442695, %v5168_v13 }
0x14e4   :  { %v5380_v43 = vpop.eup %5379 }
0x14e5   :  { %2961 = vrot.lane.b32.xlu0 %v5380_v43, %s5588_s22 }
0x14e7   :  { %v3303_v23 = vpop.f32.mrb[20].mxu0 }
0x14e8   :  { %v5169_v26 = vadd.f32 %v6222_v15, %v3303_v23  ;;  %v4819_v27 = vpop.f32.mrb[21].mxu0 }
0x14ea   :  { %5381 = vtanh.f32 %v5169_v26  ;;  %v4211_v45 = vmul.f32 -1.442695, %v5169_v26 }
0x14ef   :  { %v3505_v29 = vpop.f32.mrb[22].mxu0 }
0x14f0   :  { %v3655_v31 = vrot.slane %v3505_v29, 2  ;;  %v4841_v25 = vpop.f32.mrb[23].mxu0 }
0x14f2   :  { %v3657_v33 = vadd.f32 %v3655_v31, %v5818_v16 }
0x14f4   :  { %v5382_v38 = vpop.eup %5381  ;;  %5383 = vtanh.f32 %v3657_v33  ;;  %v4217_v49 = vmul.f32 -1.442695, %v3657_v33 }
0x14f5   :  { %3316 = vrot.lane.b32.xlu1 %v5382_v38, %s5588_s22  ;;  %5385 = vpow2.f32 %v4205_v11 }
0x14f6   :  { %5387 = vpow2.f32 %v4211_v45 }
0x14fe   :  { %v5384_v39 = vpop.eup %5383 }
0x14ff   :  { %3670 = vrot.lane.b32.xlu0 %v5384_v39, %s5588_s22  ;;  %v5386_v17 = vpop.eup %5385 }
0x1500   :  { %v2955_v47 = vadd.f32 1.0, %v5386_v17  ;;  %v5388_v30 = vpop.eup %5387 }
0x1501   :  { %v3310_v54 = vadd.f32 1.0, %v5388_v30 }
0x1502   :  { %5389 = vrcp.f32 %v2955_v47 }
0x1503   :  { %5391 = vpow2.f32 %v4217_v49 }
0x1504   :  { %5393 = vrcp.f32 %v3310_v54 }
0x150c   :  { %v5390_v36 = vpop.eup %5389 }
0x150d   :  { %v5392_v55 = vpop.eup %5391  ;;  %v2959_v34 = vmul.f32 %v5390_v36, %v6232_v61 }
0x150e   :  { %v3661_v42 = vadd.f32 1.0, %v5392_v55  ;;  %v5394_v24 = vpop.eup %5393 }
0x150f   :  { %v3314_v6 = vmul.f32 %v5394_v24, %v6237_v0 }
0x1510   :  { %5395 = vrcp.f32 %v3661_v42 }
0x151a   :  { %v5396_v60 = vpop.eup %5395 }
0x151b   :  { %v3668_v46 = vmul.f32 %v5396_v60, %v3666_v10 }
0x1557   :  { %v2962_v52 = vpop.permute.xlu0 %2961 }
0x1558   :  { %v2964_v16 = vmul.f32 %v5390_v36, %v2962_v52 }
0x155a   :  { %2966 = vrot.lane.b32.xlu1 %v2964_v16, %s5588_s22 }
0x1567   :  { %v3317_v58 = vpop.permute.xlu1 %3316 }
0x1568   :  { %v3319_v59 = vmul.f32 %v5394_v24, %v3317_v58 }
0x156a   :  { %3321 = vrot.lane.b32.xlu0 %v3319_v59, %s5588_s22 }
0x1571   :  { %v3671_v51 = vpop.permute.xlu0 %3670 }
0x1572   :  { %v3673_v63 = vmul.f32 %v5396_v60, %v3671_v51 }
0x1574   :  { %3675 = vrot.lane.b32.xlu1 %v3673_v63, %s5588_s22 }
0x15cc   :  { %v2967_v3 = vpop.permute.xlu1 %2966 }
0x15cd   :  { %v6299_v4 = vadd.f32 %v2967_v3, %v2959_v34 }
0x15cf   :  { %5397 = vtanh.f32 %v6299_v4 }
0x15d9   :  { %v5398_v5 = vpop.eup %5397 }
0x15da   :  { %2972 = vrot.lane.b32.xlu0 %v5398_v5, %s5588_s22 }
0x15dc   :  { %v3322_v7 = vpop.permute.xlu0 %3321 }
0x15dd   :  { %v6304_v57 = vadd.f32 %v3322_v7, %v3314_v6 }
0x15df   :  { %5399 = vtanh.f32 %v6304_v57 }
0x15e6   :  { %v3676_v12 = vpop.permute.xlu1 %3675 }
0x15e7   :  { %v3678_v61 = vadd.f32 %v3676_v12, %v3668_v46 }
0x15e9   :  { %v5400_v18 = vpop.eup %5399  ;;  %5401 = vtanh.f32 %v3678_v61 }
0x15ea   :  { %3327 = vrot.lane.b32.xlu1 %v5400_v18, %s5588_s22 }
0x15f3   :  { %v5402_v14 = vpop.eup %5401 }
0x15f4   :  { %3681 = vrot.lane.b32.xlu0 %v5402_v14, %s5588_s22 }
0x164c   :  { %v2973_v19 = vpop.permute.xlu0 %2972 }
0x164d   :  { %v6310_v20 = vmul.f32 %v5390_v36, %v2973_v19 }
0x164f   :  { %3126 = vrot.lane.b32.xlu1 %v6310_v20, %s5589_s4 }
0x165c   :  { %v3328_v0 = vpop.permute.xlu1 %3327 }
0x165d   :  { %v3330_v21 = vmul.f32 %v5394_v24, %v3328_v0 }
0x165f   :  { %3332 = vrot.lane.b32.xlu0 %v3330_v21, %s5589_s4 }
0x1666   :  { %v3682_v53 = vpop.permute.xlu0 %3681 }
0x1667   :  { %v3684_v9 = vmul.f32 %v5396_v60, %v3682_v53 }
0x1669   :  { %v3686_v13 = vrot.slane %v3684_v9, 6 }
0x166b   :  { %3687 = vrot.lane.b32.xlu1 %v3686_v13, %s5589_s4 }
0x16c1   :  { %v3127_v48 = vpop.permute.xlu1 %3126 }
0x16c2   :  { %4807 = vmatmul.mubr.msk.f32.vlgmr.msra.gmra.mrb[20].mxu1 %vm251_vm2, %v3127_v48 }
0x16c3   :  { %5114 = vmatpush3.bf16.msra.mxu1 %v5905_v28  ;;  %4828 = vmatprep.mubr.msk.f32.mxu1 %vm5586_vm0, %v5587_v2 }
0x16c4   :  { %5115 = vmatprep.subr.bf16.mxu1 %v5585_v1 }
0x16c7   :  { %5117 = vmatpush3.bf16.msra.mxu1 %v5919_v32 }
0x16c8   :  { %5124 = vmatprep.subr.bf16.mxu1 %v5585_v1 }
0x16d1   :  { %v3333_v43 = vpop.permute.xlu0 %3332 }
0x16d2   :  { %4829 = vmatmul.mubr.msk.f32.vlgmr.msra.gmra.mrb[20].mxu1 %vm251_vm2, %v3333_v43 }
0x16d3   :  { %5126 = vmatpush3.bf16.msra.mxu1 %v5828_v35  ;;  %4850 = vmatprep.mubr.msk.f32.mxu1 %vm5586_vm0, %v5587_v2 }
0x16d4   :  { %5127 = vmatprep.subr.bf16.mxu1 %v5585_v1 }
0x16d7   :  { %5129 = vmatpush3.bf16.msra.mxu1 %v5831_v37 }
0x16d8   :  { %5136 = vmatprep.subr.bf16.mxu1 %v5585_v1 }
0x16da   :  { %4851 = vmatmul.mubr.msk.f32.vlgmr.msra.gmra.mrb[22].mxu1 %vm251_vm2, %v3333_v43 }
0x16db   :  { %5138 = vmatpush3.bf16.msra.mxu1 %v5841_v40  ;;  %4872 = vmatprep.mubr.msk.f32.mxu1 %vm5586_vm0, %v5587_v2 }
0x16dc   :  { %5139 = vmatprep.subr.bf16.mxu1 %v5585_v1 }
0x16dd   :  { %v3688_v35 = vpop.permute.xlu1 %3687 }
0x16df   :  { %5141 = vmatpush3.bf16.msra.mxu1 %v5853_v44 }
0x16e0   :  { %5148 = vmatprep.subr.bf16.mxu1 %v5585_v1 }
0x16e2   :  { %4873 = vmatmul.mubr.msk.f32.vlgmr.msra.gmra.mrb[22].mxu1 %vm251_vm2, %v3688_v35 }
0x16e3   :  { %4894 = vmatprep.mubr.msk.f32.mxu1 %vm5586_vm0, %v5587_v2 }
0x17a5   :  { %v3402_v37 = vpop.f32.mrb[20].mxu1 }
0x17a6   :  { %v5170_v23 = vadd.f32 %v6287_v22, %v3402_v37  ;;  %v4830_v26 = vpop.f32.mrb[21].mxu1 }
0x17a8   :  { %5403 = vtanh.f32 %v5170_v23  ;;  %v4213_v25 = vmul.f32 -1.442695, %v5170_v23 }
0x17b2   :  { %v5404_v40 = vpop.eup %5403 }
0x17b3   :  { %3415 = vrot.lane.b32.xlu0 %v5404_v40, %s5588_s22 }
0x17b5   :  { %v3757_v27 = vpop.f32.mrb[22].mxu1 }
0x17b6   :  { %v5171_v29 = vadd.f32 %v6222_v15, %v3757_v27  ;;  %v4874_v44 = vpop.f32.mrb[23].mxu1 }
0x17b8   :  { %5405 = vtanh.f32 %v5171_v29  ;;  %v4219_v38 = vmul.f32 -1.442695, %v5171_v29 }
0x17b9   :  { %5407 = vpow2.f32 %v4213_v25 }
0x17ba   :  { %5409 = vpow2.f32 %v4219_v38 }
0x17c2   :  { %v5406_v31 = vpop.eup %5405 }
0x17c3   :  { %3770 = vrot.lane.b32.xlu1 %v5406_v31, %s5588_s22  ;;  %v5408_v33 = vpop.eup %5407 }
0x17c4   :  { %v3409_v39 = vadd.f32 1.0, %v5408_v33  ;;  %v5410_v11 = vpop.eup %5409 }
0x17c5   :  { %v3764_v49 = vadd.f32 1.0, %v5410_v11 }
0x17c6   :  { %5411 = vrcp.f32 %v3409_v39 }
0x17c7   :  { %5413 = vrcp.f32 %v3764_v49 }
0x17d0   :  { %v5412_v17 = vpop.eup %5411 }
0x17d1   :  { %v5414_v15 = vpop.eup %5413  ;;  %v3413_v52 = vmul.f32 %v5412_v17, %v6299_v4 }
0x17d2   :  { %v3768_v42 = vmul.f32 %v5414_v15, %v6304_v57  ;;  %v4165_v57 = vld [vmem:[#allocation12] ss:$0 sm:$0xff] }
0x1825   :  { %v3416_v45 = vpop.permute.xlu0 %3415 }
0x1826   :  { %v3418_v47 = vmul.f32 %v5412_v17, %v3416_v45 }
0x1828   :  { %3420 = vrot.lane.b32.xlu0 %v3418_v47, %s5588_s22 }
0x1835   :  { %v3771_v30 = vpop.permute.xlu1 %3770 }
0x1836   :  { %v3773_v36 = vmul.f32 %v5414_v15, %v3771_v30 }
0x1838   :  { %3775 = vrot.lane.b32.xlu1 %v3773_v36, %s5588_s22 }
0x189a   :  { %v3421_v16 = vpop.permute.xlu0 %3420 }
0x189b   :  { %v3423_v54 = vadd.f32 %v3421_v16, %v3413_v52  ;;  %v717_v16 = vstv %s6446_s11 }
0x189d   :  { %5415 = vtanh.f32 %v3423_v54 }
0x18a7   :  { %v5416_v55 = vpop.eup %5415 }
0x18a8   :  { %3426 = vrot.lane.b32.xlu0 %v5416_v55, %s5588_s22 }
0x18aa   :  { %v3776_v24 = vpop.permute.xlu1 %3775 }
0x18ab   :  { %v3778_v58 = vadd.f32 %v3776_v24, %v3768_v42 }
0x18ad   :  { %5417 = vtanh.f32 %v3778_v58 }
0x18b7   :  { %v5418_v59 = vpop.eup %5417 }
0x18b8   :  { %3781 = vrot.lane.b32.xlu1 %v5418_v59, %s5588_s22 }
0x191a   :  { %v3427_v60 = vpop.permute.xlu0 %3426 }
0x191b   :  { %v6350_v51 = vmul.f32 %v5412_v17, %v3427_v60 }
0x191d   :  { %3580 = vrot.lane.b32.xlu0 %v6350_v51, %s5589_s4 }
0x192a   :  { %v3782_v63 = vpop.permute.xlu1 %3781 }
0x192b   :  { %v3784_v34 = vmul.f32 %v5414_v15, %v3782_v63 }
0x192d   :  { %3786 = vrot.lane.b32.xlu1 %v3784_v34, %s5589_s4 }
0x198f   :  { %v3581_v3 = vpop.permute.xlu0 %3580 }
0x1990   :  { %4862 = vmatmul.mubr.msk.f32.vlgmr.msra.gmra.mrb[24].mxu0 %vm251_vm2, %v3581_v3 }
0x1991   :  { %5144 = vmatpush3.bf16.msra.mxu0 %v5905_v28  ;;  %4883 = vmatprep.mubr.msk.f32.mxu0 %vm5586_vm0, %v5587_v2 }
0x1992   :  { %5145 = vmatprep.subr.bf16.mxu0 %v5585_v1 }
0x1995   :  { %5147 = vmatpush3.bf16.msra.mxu0 %v5919_v32 }
0x1996   :  { %5154 = vmatprep.subr.bf16.mxu0 %v5585_v1 }
0x199f   :  { %v3787_v4 = vpop.permute.xlu1 %3786 }
0x19a0   :  { %4884 = vmatmul.mubr.msk.f32.vlgmr.msra.gmra.mrb[24].mxu0 %vm251_vm2, %v3787_v4 }
0x19a1   :  { %4901 = vmatprep.mubr.msk.f32.mxu0 %vm5586_vm0, %v5587_v2 }
0x1a73   :  { %v3856_v5 = vpop.f32.mrb[24].mxu0 }
0x1a74   :  { %v5172_v6 = vadd.f32 %v6287_v22, %v3856_v5  ;;  %v4885_v7 = vpop.f32.mrb[25].mxu0 }
0x1a76   :  { %5419 = vtanh.f32 %v5172_v6  ;;  %v4221_v32 = vmul.f32 -1.442695, %v5172_v6 }
0x1a78   :  { %5421 = vpow2.f32 %v4221_v32 }
0x1a80   :  { %v5420_v28 = vpop.eup %5419 }
0x1a81   :  { %3869 = vrot.lane.b32.xlu0 %v5420_v28, %s5588_s22 }
0x1a82   :  { %v5422_v10 = vpop.eup %5421 }
0x1a83   :  { %v3863_v46 = vadd.f32 1.0, %v5422_v10 }
0x1a85   :  { %705 = vrot.lane.b32.xlu0 %v4165_v57, %s5589_s4  ;;  %5423 = vrcp.f32 %v3863_v46 }
0x1a8f   :  { %v5424_v12 = vpop.eup %5423 }
0x1a90   :  { %v3867_v21 = vmul.f32 %v5424_v12, %v3423_v54 }
0x1af3   :  { %v3870_v61 = vpop.permute.xlu0 %3869 }
0x1af4   :  { %v3872_v18 = vmul.f32 %v5424_v12, %v3870_v61 }
0x1af6   :  { %3874 = vrot.lane.b32.xlu1 %v3872_v18, %s5588_s22 }
0x1af7   :  { %v706_v2 = vpop.permute.xlu0 %705 }
0x1af8   :  { %v708_v22 = vmul.f32 %v706_v2, %v5981_v41  ;;  %v1618_v14 = vmul.f32 %v6111_v56, %v706_v2  ;;  %v2522_v19 = vmul.f32 %v6246_v8, %v706_v2  ;;  %v3430_v0 = vmul.f32 %v6350_v51, %v706_v2 }
0x1af9   :  { %v1164_v23 = vmul.f32 %v6046_v50, %v706_v2  ;;  %v2072_v26 = vmul.f32 %v6176_v62, %v706_v2  ;;  %v2976_v40 = vmul.f32 %v6310_v20, %v706_v2 }
0x1afa   :  { %710 = vrot.lane.b32.xlu0 %v708_v22, %s5589_s4 }
0x1afe   :  { %1620 = vrot.lane.b32.xlu0 %v1618_v14, %s5589_s4 }
0x1b02   :  { %2524 = vrot.lane.b32.xlu0 %v2522_v19, %s5589_s4 }
0x1b06   :  { %3432 = vrot.lane.b32.xlu0 %v3430_v0, %s5589_s4 }
0x1b68   :  { %v3875_v53 = vpop.permute.xlu1 %3874 }
0x1b69   :  { %v3877_v9 = vadd.f32 %v3875_v53, %v3867_v21  ;;  %v5590_v21 = vmov 1   ;;  %v5591_v53 = vmov 0  }
0x1b6a   :  { %5227 = vset.pattern.permute.xlu0 %v5590_v21  ;;  %5226 = vset.pattern.permute.xlu1 %v5591_v53 }
0x1b6b   :  { %5425 = vtanh.f32 %v3877_v9 }
0x1b6c   :  { %v711_v13 = vpop.permute.xlu0 %710 }
0x1b6d   :  { %v714_v48 = vsel %vm713_vm3, %v711_v13, 0.0 }
0x1b6e   :  { %715 = vadd.xlane.f32.xlu0 %v714_v48 }
0x1b70   :  { %v1621_v43 = vpop.permute.xlu0 %1620 }
0x1b71   :  { %v1623_v35 = vsel %vm713_vm3, %v1621_v43, 0.0  ;;  %v5592_v43 = vmov 2  }
0x1b72   :  { %1624 = vadd.xlane.f32.xlu0 %v1623_v35  ;;  %v5593_v35 = vmov 7  }
0x1b74   :  { %v2525_v11 = vpop.permute.xlu0 %2524 }
0x1b75   :  { %v5426_v37 = vpop.eup %5425  ;;  %v2527_v45 = vsel %vm713_vm3, %v2525_v11, 0.0 }
0x1b76   :  { %3880 = vrot.lane.b32.xlu1 %v5426_v37, %s5588_s22  ;;  %v5594_v37 = vmov 3  }
0x1b78   :  { %v3433_v47 = vpop.permute.xlu0 %3432 }
0x1b79   :  { %v3435_v49 = vsel %vm713_vm3, %v3433_v47, 0.0 }
0x1b7a   :  { %1166 = vrot.lane.b32.xlu1 %v1164_v23, %s5589_s4  ;;  %v5595_v23 = vmov 4  }
0x1b7e   :  { %2074 = vrot.lane.b32.xlu1 %v2072_v26, %s5589_s4  ;;  %v5596_v26 = vmov 5  }
0x1b82   :  { %2978 = vrot.lane.b32.xlu1 %v2976_v40, %s5589_s4  ;;  %v5597_v40 = vmov 6  }
0x1be8   :  { %v3881_v27 = vpop.permute.xlu1 %3880 }
0x1be9   :  { %v6386_v29 = vmul.f32 %v5424_v12, %v3881_v27  ;;  %v3968_v27 = vld [vmem:[%s6447_s12] sm:$0xff] }
0x1beb   :  { %v3884_v44 = vmul.f32 %v6386_v29, %v706_v2 }
0x1bec   :  { %v1167_v31 = vpop.permute.xlu1 %1166 }
0x1bed   :  { %3886 = vrot.lane.b32.xlu1 %v3884_v44, %s5589_s4  ;;  %v1169_v17 = vsel %vm713_vm3, %v1167_v31, 0.0  ;;  %v3969_v44 = vld [vmem:[%s6447_s12 + $0x8] sm:$0xff]  ;;  %v3970_v31 = vld [vmem:[%s6447_s12 + $0x10] sm:$0xff] }
0x1bf0   :  { %v2075_v25 = vpop.permute.xlu1 %2074 }
0x1bf1   :  { %v2077_v33 = vsel %vm713_vm3, %v2075_v25, 0.0  ;;  %v5149_v25 = vpack.c.bf16 %v3969_v44, %v3968_v27 }
0x1bf2   :  { %2078 = vadd.xlane.f32.xlu0 %v2077_v33  ;;  %v3971_v33 = vld [vmem:[%s6447_s12 + $0x18] sm:$0xff] }
0x1bf3   :  { %5150 = vmatpush3.bf16.msra.mxu1 %v5149_v25 }
0x1bf4   :  { %v2979_v38 = vpop.permute.xlu1 %2978  ;;  %5151 = vmatprep.subr.bf16.mxu1 %v5585_v1 }
0x1bf5   :  { %v2981_v39 = vsel %vm713_vm3, %v2979_v38, 0.0  ;;  %v5152_v38 = vpack.c.bf16 %v3971_v33, %v3970_v31 }
0x1bf6   :  { %2982 = vadd.xlane.f32.xlu0 %v2981_v39 }
0x1bf7   :  { %5153 = vmatpush3.bf16.msra.mxu1 %v5152_v38 }
0x1bfb   :  { %v716_v36 = vpop.xlane.xlu0 %715 }
0x1bfc   :  { %v718_v42 = vadd.f32 %v717_v16, %v716_v36 }
0x1bff   :  { %v1625_v55 = vpop.xlane.xlu0 %1624 }
0x1c00   :  { %v1626_v59 = vadd.f32 %v1625_v55, %v717_v16 }
0x1c11   :  { %1170 = vadd.xlane.f32.xlu1 %v1169_v17 }
0x1c15   :  { %2528 = vadd.xlane.f32.xlu1 %v2527_v45 }
0x1c19   :  { %3436 = vadd.xlane.f32.xlu1 %v3435_v49 }
0x1c5f   :  { %v3887_v15 = vpop.permute.xlu1 %3886 }
0x1c60   :  { %v3889_v30 = vsel %vm713_vm3, %v3887_v15, 0.0 }
0x1c61   :  { %3890 = vadd.xlane.f32.xlu0 %v3889_v30 }
0x1c7f   :  { %v2079_v60 = vpop.xlane.xlu0 %2078 }
0x1c80   :  { %v2080_v34 = vadd.f32 %v2079_v60, %v717_v16 }
0x1c83   :  { %v2983_v6 = vpop.xlane.xlu0 %2982 }
0x1c84   :  { %v2984_v57 = vadd.f32 %v2983_v6, %v717_v16  ;;  %v4224_v6 = vld [vmem:[#allocation3] ss:$0 sm:$0xff] }
0x1c9e   :  { %v1171_v52 = vpop.xlane.xlu1 %1170 }
0x1c9f   :  { %v1172_v54 = vadd.f32 %v1171_v52, %v717_v16 }
0x1ca1   :  { %v3894_v24 = vsel %vm3893_vm4, %v718_v42, %v1172_v54 }
0x1ca2   :  { %v2529_v58 = vpop.xlane.xlu1 %2528  ;;  %v3896_v63 = vsel %vm3895_vm5, %v3894_v24, %v1626_v59 }
0x1ca3   :  { %v2530_v3 = vadd.f32 %v2529_v58, %v717_v16  ;;  %v3898_v4 = vsel %vm3897_vm6, %v3896_v63, %v2080_v34 }
0x1ca5   :  { %v3900_v7 = vsel %vm3899_vm7, %v3898_v4, %v2530_v3 }
0x1ca6   :  { %v3437_v5 = vpop.xlane.xlu1 %3436  ;;  %v3902_v46 = vsel %vm3901_vm8, %v3900_v7, %v2984_v57 }
0x1ca7   :  { %v3438_v28 = vadd.f32 %v3437_v5, %v717_v16 }
0x1ca9   :  { %v3904_v12 = vsel %vm3903_vm9, %v3902_v46, %v3438_v28 }
0x1cee   :  { %v3891_v32 = vpop.xlane.xlu0 %3890 }
0x1cef   :  { %v3892_v10 = vadd.f32 %v3891_v32, %v717_v16 }
0x1cf1   :  { %v3906_v61 = vsel %vm3905_vm10, %v3904_v12, %v3892_v10 }
0x1cf2   :  { %v3908_v18 = vsel %vm3907_vm11, %v3906_v61, -inf }
0x1cf3   :  { %3909 = vmax.xlane.f32.xlu1 %v3908_v18 }
0x1d80   :  { %v3910_v2 = vpop.xlane.xlu1 %3909 }
0x1d81   :  { %v3911_v22 = vsub.f32 %v3906_v61, %v3910_v2 }
0x1d83   :  { %v3912_v14 = vmul.f32 1.442695, %v3911_v22 }
0x1d85   :  { %5427 = vpow2.f32 %v3912_v14 }
0x1d8f   :  { %v5428_v19 = vpop.eup %5427 }
0x1d90   :  { %v3914_v0 = vsel %vm3907_vm11, %v5428_v19, 0.0 }
0x1d91   :  { %3915 = vadd.xlane.f32.xlu0 %v3914_v0 }
0x1e1e   :  { %v3916_v9 = vpop.xlane.xlu0 %3915 }
0x1e1f   :  { %5429 = vrcp.f32 %v3916_v9 }
0x1e29   :  { %v5430_v13 = vpop.eup %5429 }
0x1e2a   :  { %v3918_v48 = vmul.f32 %v5430_v13, %v5428_v19 }
0x1e2c   :  { %3927 = vperm.xlu0 %5227, %v3918_v48   ;;  %3921 = vperm.xlu1 %5226, %v3918_v48  }
0x1e30   :  { %5228 = vset.pattern.permute.xlu1 %v5592_v43  ;;  %5234 = vset.pattern.permute.xlu0 %v5593_v35 }
0x1e31   :  { %3933 = vperm.xlu1 %5228, %v3918_v48  }
0x1e35   :  { %5229 = vset.pattern.permute.xlu1 %v5594_v37 }
0x1e36   :  { %3939 = vperm.xlu1 %5229, %v3918_v48  }
0x1e3a   :  { %5230 = vset.pattern.permute.xlu1 %v5595_v23 }
0x1e3b   :  { %3945 = vperm.xlu1 %5230, %v3918_v48  }
0x1e3f   :  { %5231 = vset.pattern.permute.xlu1 %v5596_v26 }
0x1e40   :  { %3951 = vperm.xlu1 %5231, %v3918_v48  }
0x1e44   :  { %5232 = vset.pattern.permute.xlu1 %v5597_v40 }
0x1e45   :  { %3957 = vperm.xlu1 %5232, %v3918_v48  }
0x1e49   :  { %5233 = vset.pattern.permute.xlu1 %v5593_v35 }
0x1e4a   :  { %3963 = vperm.xlu1 %5233, %v3918_v48  }
0x1eab   :  { %v3922_v39 = vpop.permute.xlu1 %3921  ;;  %v3928_v45 = vpop.permute.xlu0 %3927 }
0x1eac   :  { %v3930_v49 = vmul.f32 %v3928_v45, %v6046_v50  ;;  %v3924_v15 = vmul.f32 %v3922_v39, %v5981_v41 }
0x1eae   :  { %v3931_v52 = vadd.f32 %v3930_v49, %v3924_v15 }
0x1eb0   :  { %v3934_v11 = vpop.permute.xlu1 %3933 }
0x1eb1   :  { %v3936_v30 = vmul.f32 %v3934_v11, %v6111_v56 }
0x1eb3   :  { %v3937_v54 = vadd.f32 %v3936_v30, %v3931_v52 }
0x1eb5   :  { %v3940_v17 = vpop.permute.xlu1 %3939 }
0x1eb6   :  { %v3942_v16 = vmul.f32 %v3940_v17, %v6176_v62  ;;  %v4055_v62 = vld [vmem:[%s6449_s14] sm:$0xff] }
0x1eb8   :  { %v3943_v1 = vadd.f32 %v3942_v16, %v3937_v54 }
0x1eba   :  { %v3946_v47 = vpop.permute.xlu1 %3945 }
0x1ebb   :  { %v3948_v55 = vmul.f32 %v3946_v47, %v6246_v8  ;;  %v4056_v8 = vld [vmem:[%s6449_s14 + $0x8] sm:$0xff] }
0x1ebd   :  { %v3949_v58 = vadd.f32 %v3948_v55, %v3943_v1 }
0x1ebf   :  { %v3952_v36 = vpop.permute.xlu1 %3951 }
0x1ec0   :  { %v3954_v42 = vmul.f32 %v3952_v36, %v6310_v20  ;;  %v5155_v20 = vpack.c.bf16 %v4056_v8, %v4055_v62 }
0x1ec2   :  { %v3955_v60 = vadd.f32 %v3954_v42, %v3949_v58  ;;  %5156 = vmatpush3.bf16.msra.mxu0 %v5155_v20 }
0x1ec4   :  { %v3958_v24 = vpop.permute.xlu1 %3957 }
0x1ec5   :  { %v3960_v59 = vmul.f32 %v3958_v24, %v6350_v51  ;;  %v4222_v51 = vld [vmem:[%s6448_s13] ss:$0 sm:$0xff] }
0x1ec7   :  { %v3961_v63 = vadd.f32 %v3960_v59, %v3955_v60 }
0x1ec9   :  { %v3964_v50 = vpop.permute.xlu1 %3963 }
0x1eca   :  { %v3966_v41 = vmul.f32 %v3964_v50, %v6386_v29 }
0x1ecc   :  { %v3967_v56 = vadd.f32 %v3966_v41, %v3961_v63 }
0x1ece   :  { %3980 = vrot.lane.b32.xlu1 %v3967_v56, %s5589_s4 }
0x1f40   :  { %v3981_v34 = vpop.permute.xlu1 %3980 }
0x1f41   :  { %4895 = vmatmul.mubr.msk.f32.vlgmr.msra.gmra.mrb[24].mxu1 %vm251_vm2, %v3981_v34 }
0x2014   :  { %v4050_v29 = vpop.f32.mrb[24].mxu1 }
0x2015   :  { %v4051_v3 = vadd.f32 %v4222_v51, %v4050_v29  ;;  %v4896_v4 = vpop.f32.mrb[25].mxu1 }
0x2017   :  { %v4054_v5 = vmax.f32 %v4051_v3, 0.0 }
0x2019   :  { %4902 = vmatmul.mubr.msk.f32.vlgmr.msra.gmra.mrb[26].mxu0 %vm169_vm1, %v4054_v5 }
0x20ec   :  { %v4133_v7 = vpop.f32.mrb[26].mxu0 }
0x20ed   :  { %v4134_v28 = vadd.f32 %v4224_v6, %v4133_v7  ;;  %v4903_v57 = vpop.f32.mrb[27].mxu0 }
0x20ef   :  { %v4226_v32 = vmul.f32 -1.442695, %v4134_v28 }
0x20f1   :  { %5431 = vpow2.f32 %v4226_v32 }
0x20fb   :  { %v5432_v10 = vpop.eup %5431 }
0x20fc   :  { %v4140_v46 = vadd.f32 1.0, %v5432_v10 }
0x20fe   :  { %5433 = vrcp.f32 %v4140_v46 }
0x2108   :  { %v5434_v12 = vpop.eup %5433 }
0x2109   :  { %v4143_v61 = vmul.f32 0.08, %v5434_v12 }
0x210b   :  { %v4144_v18 = vadd.f32 0.08, %v4143_v61 }
0x210d   :  { %4146 = vst.msk [vmem:[%s6451_s16] sm:$0x3] %vm4145_vm12, %v4144_v18 }
0x210e   :  { %4151 = vsyncpa [#allocation5], 1 }
0x210f   :  { %4152 = vsyncpa [#allocation7], 1 }
0x2110   :  { %4153 = vsyncpa [#allocation10], 1 }
0x2111   :  { %4154 = vsyncpa [#allocation13], 1 }

</bundles_post_ra>
